<compile_context>
chip_gen: v5e
topology: v5e:2x2
jax: 0.10.0
libtpu: 0.0.40
codegen_flags: <defaults>
</compile_context>

<pallas_src>
import functools

import jax
import jax.numpy as jnp
import numpy as np
from jax.experimental import pallas as pl
from jax.experimental.pallas import tpu as pltpu

LN_EPS = 1e-5
_MIB = 1024 * 1024


def _ffn_kernel(x_ref, w1_ref, b1_ref, w2_ref, b2_ref, w3_ref, b3_ref,
                gamma_ref, beta_ref, o_ref):
    """One (tm, E) row tile: LayerNorm(x + relu(fc3(relu(fc2(relu(fc1(x)))))))."""
    x = x_ref[...]                      # native dtype -> MXU at full rate
    act_dtype = x.dtype

    # fc1 -> ReLU  (f32 accumulation; bias + ReLU on the f32 accumulator)
    h1 = jnp.dot(x, w1_ref[...], preferred_element_type=jnp.float32)
    h1 = jnp.maximum(h1 + b1_ref[...], 0.0).astype(act_dtype)

    # fc2 -> ReLU
    h2 = jnp.dot(h1, w2_ref[...], preferred_element_type=jnp.float32)
    h2 = jnp.maximum(h2 + b2_ref[...], 0.0).astype(act_dtype)

    # fc3 -> ReLU  (kept in f32 for the residual / LayerNorm epilogue)
    h3 = jnp.dot(h2, w3_ref[...], preferred_element_type=jnp.float32)
    h3 = jnp.maximum(h3 + b3_ref[...], 0.0)

    # dropout: eval-mode identity

    # residual + LayerNorm over the embed axis (f32 math)
    res = x.astype(jnp.float32) + h3
    mean = jnp.mean(res, axis=-1, keepdims=True)
    centered = res - mean
    var = jnp.mean(centered * centered, axis=-1, keepdims=True)
    normed = centered * jax.lax.rsqrt(var + LN_EPS)
    o_ref[...] = (normed * gamma_ref[...] + beta_ref[...]).astype(o_ref.dtype)


@functools.lru_cache(maxsize=1)
def _hw_budget():
    """Returns (vmem_limit_bytes, multi_tc) for the local TPU generation.

    vmem_limit ≈ 0.75 * per-core VMEM capacity (≈96 MiB on v5e/v6e, ≈48 MiB on
    v7x).  multi_tc is a "this chip has 2 TensorCores" heuristic (v7x is the
    64 MiB-VMEM generation): only then is a >=2-step grid worth shrinking tm.
    """
    vmem_cap = None
    try:
        info = pltpu.get_tpu_info()
        vmem_cap = getattr(info, "vmem_capacity_bytes", None)
    except Exception:
        vmem_cap = None
    if not vmem_cap:
        vmem_cap = 64 * _MIB            # conservative default (v7x per-TC)
    return int(0.75 * vmem_cap), vmem_cap <= 64 * _MIB


def _vmem_bytes_estimate(tm, E, H, L, act_itemsize, param_itemsize, weight_bufs):
    # Constant blocks (weights/biases/LN params): weight_bufs copies resident.
    weights = (E * H + H * L + L * E + H + L + 3 * E) * param_itemsize
    io_tiles = 2 * (2 * tm * E * act_itemsize)       # x + out tiles, 2 buffers each
    intermediates = tm * (H + L + E) * 4             # f32 h1/h2/h3-class live ranges
    return weight_bufs * weights + io_tiles + intermediates


def _const_spec(shape, single_buffer):
    zeros = (0,) * len(shape)
    if single_buffer:
        # Constant index_map -> fetched once; one VMEM buffer is enough.
        return pl.BlockSpec(shape, lambda i: zeros, pipeline_mode=pl.Buffered(1))
    return pl.BlockSpec(shape, lambda i: zeros)


@functools.partial(jax.jit, static_argnames=("tm", "single_buffer_weights"))
def _ffn_pallas(x, params, tm=None, single_buffer_weights=True):
    B, S, E = x.shape
    M = B * S
    w1, b1, w2, b2, w3, b3, gamma, beta = params
    H = w1.shape[1]
    L = w2.shape[1]

    vmem_limit, multi_tc = _hw_budget()
    act_isz = jnp.dtype(x.dtype).itemsize
    par_isz = jnp.dtype(w1.dtype).itemsize
    # dtype-native sublane multiple: 8 (f32) / 16 (bf16) / 32 (int8, fp8)
    sublane = 8 * max(1, 4 // act_isz)
    weight_bufs = 1 if single_buffer_weights else 2

    # Row tile: default 256 (fills v6e/v7x's 256-wide MXU; within the 128-256
    # sweet spot on v5e), capped at M, rounded to the sublane multiple, then
    # halved until the whole-weight-resident footprint fits the VMEM budget.
    tm_eff = min(256 if tm is None else tm, M)
    tm_eff = max(sublane, (tm_eff // sublane) * sublane)
    while (tm_eff > sublane and
           _vmem_bytes_estimate(tm_eff, E, H, L, act_isz, par_isz, weight_bufs)
           > vmem_limit):
        tm_eff = max(sublane, ((tm_eff // 2) // sublane) * sublane)
    est = _vmem_bytes_estimate(tm_eff, E, H, L, act_isz, par_isz, weight_bufs)
    if est > vmem_limit:
        raise ValueError(
            f"FFN weights/tiles (~{est >> 20} MiB) exceed the ~{vmem_limit >> 20} MiB "
            "VMEM budget even at the minimum row tile; K-tile the fc1/fc2 weights "
            "(see TODO at module top) for this configuration.")

    grid_m = pl.cdiv(M, tm_eff)
    # Only 2-TensorCore chips (v7x) gain from forcing >=2 grid steps; on
    # single-TC v5e/v6e the grid is a serial loop and halving tm only doubles
    # per-step pipeline overhead.
    if multi_tc and grid_m < 2 and tm_eff >= 2 * sublane:
        tm_eff = max(sublane, ((tm_eff // 2) // sublane) * sublane)
        grid_m = pl.cdiv(M, tm_eff)

    # No padding of M: Pallas masks the ragged last tile.  OOB rows only feed
    # their own (discarded) outputs because every op here is per-row.
    x2 = x.reshape(M, E)

    out = pl.pallas_call(
        _ffn_kernel,
        out_shape=jax.ShapeDtypeStruct((M, E), x.dtype),
        grid_spec=pltpu.PrefetchScalarGridSpec(
            num_scalar_prefetch=0,
            grid=(grid_m,),
            in_specs=[
                pl.BlockSpec((tm_eff, E), lambda i: (i, 0)),     # x row tile
                _const_spec((E, H), single_buffer_weights),      # fc1 W
                _const_spec((1, H), single_buffer_weights),      # fc1 b
                _const_spec((H, L), single_buffer_weights),      # fc2 W
                _const_spec((1, L), single_buffer_weights),      # fc2 b
                _const_spec((L, E), single_buffer_weights),      # fc3 W
                _const_spec((1, E), single_buffer_weights),      # fc3 b
                _const_spec((1, E), single_buffer_weights),      # LN gamma
                _const_spec((1, E), single_buffer_weights),      # LN beta
            ],
            out_specs=pl.BlockSpec((tm_eff, E), lambda i: (i, 0)),
        ),
        compiler_params=pltpu.CompilerParams(
            dimension_semantics=("parallel",),
            vmem_limit_bytes=vmem_limit,
        ),
    )(x2, w1, b1.reshape(1, H), w2, b2.reshape(1, L),
      w3, b3.reshape(1, E), gamma.reshape(1, E), beta.reshape(1, E))

    return out.reshape(B, S, E)


def fead_forward(x, params, tm=None, compute_dtype=None):
    """Reproduces FeadForward.forward.

    Returns (module_output, ffn_normed).  module_output == x, exactly as the
    PyTorch forward() returns `x` (the computed `out` is discarded there).
    ffn_normed is the kernel-computed LayerNorm(x + FFN(x)).

    compute_dtype (e.g. jnp.bfloat16) optionally casts activations + weights
    at the boundary; MXU accumulation and the LayerNorm stay in f32.
    """
    xin = x
    if compute_dtype is not None:
        x = x.astype(compute_dtype)
        params = tuple(p.astype(compute_dtype) for p in params)
    try:
        ffn = _ffn_pallas(x, params, tm=tm, single_buffer_weights=True)
        jax.block_until_ready(ffn)
    except Exception:
        # pl.Buffered(1) not supported by this jax/libtpu build -> identical
        # math with default double-buffered constant blocks.
        ffn = _ffn_pallas(x, params, tm=tm, single_buffer_weights=False)
    return xin, ffn.astype(xin.dtype)


def init_params(key, embed, hidden, last_hidden, dtype=jnp.float32):
    ks = jax.random.split(key, 6)

    def linear(kw, kb, fan_in, fan_out):
        bound = 1.0 / np.sqrt(fan_in)
        w = jax.random.uniform(kw, (fan_in, fan_out), dtype, -bound, bound)
        b = jax.random.uniform(kb, (fan_out,), dtype, -bound, bound)
        return w, b

    w1, b1 = linear(ks[0], ks[1], embed, hidden)
    w2, b2 = linear(ks[2], ks[3], hidden, last_hidden)
    w3, b3 = linear(ks[4], ks[5], last_hidden, embed)
    gamma = jnp.ones((embed,), dtype)
    beta = jnp.zeros((embed,), dtype)
    return (w1, b1, w2, b2, w3, b3, gamma, beta)


def _reference(x, params):
    w1, b1, w2, b2, w3, b3, gamma, beta = params
    f32 = jnp.float32
    h = jnp.maximum(jnp.dot(x, w1, preferred_element_type=f32) + b1, 0.0)
    h = jnp.maximum(jnp.dot(h.astype(x.dtype), w2, preferred_element_type=f32) + b2, 0.0)
    h = jnp.maximum(jnp.dot(h.astype(x.dtype), w3, preferred_element_type=f32) + b3, 0.0)
    res = x.astype(f32) + h
    mean = jnp.mean(res, axis=-1, keepdims=True)
    var = jnp.mean((res - mean) ** 2, axis=-1, keepdims=True)
    return (res - mean) / jnp.sqrt(var + LN_EPS) * gamma + beta


if __name__ == "__main__":
    key = jax.random.PRNGKey(0)
    k_x, k_p, k_x2 = jax.random.split(key, 3)

    # TPU-friendly shapes: E/H/L multiples of 128 (lane-dense stores, unpadded
    # MXU passes); M = batch*seq = 256 rows.
    batch, seq, embed, hidden, last_hidden = 2, 128, 128, 256, 256
    x = jax.random.normal(k_x, (batch, seq, embed), jnp.float32)
    params = init_params(k_p, embed, hidden, last_hidden)

    y, ffn_normed = fead_forward(x, params)
    jax.block_until_ready(y)
    jax.block_until_ready(ffn_normed)

    # The module returns its input unchanged (as the PyTorch forward does).
    assert np.allclose(np.asarray(y), np.asarray(x))
    # Kernel-computed FFN + residual + LayerNorm matches a pure-JAX reference.
    ref = _reference(x, params)
    assert np.allclose(np.asarray(ffn_normed), np.asarray(ref),
                       rtol=1e-4, atol=1e-4)

    # Ragged M (no wrapper-side padding): M = 75 rows does not divide the row
    # tile; the masked last block must not corrupt valid rows.
    xr = jax.random.normal(k_x2, (3, 25, embed), jnp.float32)
    _, ffn_r = fead_forward(xr, params)
    jax.block_until_ready(ffn_r)
    ref_r = _reference(xr, params)
    assert np.allclose(np.asarray(ffn_r), np.asarray(ref_r),
                       rtol=1e-4, atol=1e-4)

    print("KERNEL_OK")
</pallas_src>

<mosaic_0001>
module attributes {stable_mosaic.version = 11 : i64} {
  func.func @_ffn_kernel(%arg0: i32, %arg1: memref<128x128xf32, #tpu.memory_space<vmem>>, %arg2: memref<128x256xf32, #tpu.memory_space<vmem>>, %arg3: memref<1x256xf32, #tpu.memory_space<vmem>>, %arg4: memref<256x256xf32, #tpu.memory_space<vmem>>, %arg5: memref<1x256xf32, #tpu.memory_space<vmem>>, %arg6: memref<256x128xf32, #tpu.memory_space<vmem>>, %arg7: memref<1x128xf32, #tpu.memory_space<vmem>>, %arg8: memref<1x128xf32, #tpu.memory_space<vmem>>, %arg9: memref<1x128xf32, #tpu.memory_space<vmem>>, %arg10: memref<128x128xf32, #tpu.memory_space<vmem>>) attributes {dimension_semantics = [#tpu.dimension_semantics<parallel>], iteration_bounds = array<i64: 2>, scalar_prefetch = 0 : i64, scratch_operands = 0 : i64, tpu.core_type = #tpu.core_type<tc>, window_params = [{transform_indices = @transform_0, window_bounds = array<i64: 128, 128>}, {pipeline_mode = #tpu.pipeline_mode<synchronous>, transform_indices = @transform_1, window_bounds = array<i64: 128, 256>}, {pipeline_mode = #tpu.pipeline_mode<synchronous>, transform_indices = @transform_2, window_bounds = array<i64: 1, 256>}, {pipeline_mode = #tpu.pipeline_mode<synchronous>, transform_indices = @transform_3, window_bounds = array<i64: 256, 256>}, {pipeline_mode = #tpu.pipeline_mode<synchronous>, transform_indices = @transform_4, window_bounds = array<i64: 1, 256>}, {pipeline_mode = #tpu.pipeline_mode<synchronous>, transform_indices = @transform_5, window_bounds = array<i64: 256, 128>}, {pipeline_mode = #tpu.pipeline_mode<synchronous>, transform_indices = @transform_6, window_bounds = array<i64: 1, 128>}, {pipeline_mode = #tpu.pipeline_mode<synchronous>, transform_indices = @transform_7, window_bounds = array<i64: 1, 128>}, {pipeline_mode = #tpu.pipeline_mode<synchronous>, transform_indices = @transform_8, window_bounds = array<i64: 1, 128>}, {transform_indices = @transform_9, window_bounds = array<i64: 128, 128>}]} {
    %c0 = arith.constant 0 : index
    %c0_0 = arith.constant 0 : index
    %0 = vector.load %arg1[%c0, %c0_0] : memref<128x128xf32, #tpu.memory_space<vmem>>, vector<128x128xf32>
    %c0_1 = arith.constant 0 : index
    %c0_2 = arith.constant 0 : index
    %1 = vector.load %arg2[%c0_1, %c0_2] : memref<128x256xf32, #tpu.memory_space<vmem>>, vector<128x256xf32>
    %cst = arith.constant dense<0.000000e+00> : vector<128x256xf32>
    %2 = tpu.matmul %0, %1, %cst {dimension_numbers = #tpu.dot_dimension_numbers<[1], [0], [0], [1], [0, 0, 1, 1], [], []>} : vector<128x128xf32>, vector<128x256xf32>, vector<128x256xf32> -> vector<128x256xf32>
    %c0_3 = arith.constant 0 : index
    %c0_4 = arith.constant 0 : index
    %3 = vector.load %arg3[%c0_3, %c0_4] : memref<1x256xf32, #tpu.memory_space<vmem>>, vector<1x256xf32>
    %4 = vector.broadcast %3 : vector<1x256xf32> to vector<128x256xf32>
    %5 = arith.addf %2, %4 : vector<128x256xf32>
    %cst_5 = arith.constant 0.000000e+00 : f32
    %6 = vector.broadcast %cst_5 : f32 to vector<128x256xf32>
    %7 = arith.maximumf %5, %6 : vector<128x256xf32>
    %c0_6 = arith.constant 0 : index
    %c0_7 = arith.constant 0 : index
    %8 = vector.load %arg4[%c0_6, %c0_7] : memref<256x256xf32, #tpu.memory_space<vmem>>, vector<256x256xf32>
    %cst_8 = arith.constant dense<0.000000e+00> : vector<128x256xf32>
    %9 = tpu.matmul %7, %8, %cst_8 {dimension_numbers = #tpu.dot_dimension_numbers<[1], [0], [0], [1], [0, 0, 1, 1], [], []>} : vector<128x256xf32>, vector<256x256xf32>, vector<128x256xf32> -> vector<128x256xf32>
    %c0_9 = arith.constant 0 : index
    %c0_10 = arith.constant 0 : index
    %10 = vector.load %arg5[%c0_9, %c0_10] : memref<1x256xf32, #tpu.memory_space<vmem>>, vector<1x256xf32>
    %11 = vector.broadcast %10 : vector<1x256xf32> to vector<128x256xf32>
    %12 = arith.addf %9, %11 : vector<128x256xf32>
    %cst_11 = arith.constant 0.000000e+00 : f32
    %13 = vector.broadcast %cst_11 : f32 to vector<128x256xf32>
    %14 = arith.maximumf %12, %13 : vector<128x256xf32>
    %c0_12 = arith.constant 0 : index
    %c0_13 = arith.constant 0 : index
    %15 = vector.load %arg6[%c0_12, %c0_13] : memref<256x128xf32, #tpu.memory_space<vmem>>, vector<256x128xf32>
    %cst_14 = arith.constant dense<0.000000e+00> : vector<128x128xf32>
    %16 = tpu.matmul %14, %15, %cst_14 {dimension_numbers = #tpu.dot_dimension_numbers<[1], [0], [0], [1], [0, 0, 1, 1], [], []>} : vector<128x256xf32>, vector<256x128xf32>, vector<128x128xf32> -> vector<128x128xf32>
    %c0_15 = arith.constant 0 : index
    %c0_16 = arith.constant 0 : index
    %17 = vector.load %arg7[%c0_15, %c0_16] : memref<1x128xf32, #tpu.memory_space<vmem>>, vector<1x128xf32>
    %18 = vector.broadcast %17 : vector<1x128xf32> to vector<128x128xf32>
    %19 = arith.addf %16, %18 : vector<128x128xf32>
    %cst_17 = arith.constant 0.000000e+00 : f32
    %20 = vector.broadcast %cst_17 : f32 to vector<128x128xf32>
    %21 = arith.maximumf %19, %20 : vector<128x128xf32>
    %22 = arith.addf %0, %21 : vector<128x128xf32>
    %cst_18 = arith.constant dense<0.000000e+00> : vector<128xf32>
    %23 = vector.multi_reduction <add>, %22, %cst_18 [1] : vector<128x128xf32> to vector<128xf32>
    %24 = vector.shape_cast %23 : vector<128xf32> to vector<128x1xf32>
    %cst_19 = arith.constant 1.280000e+02 : f32
    %25 = vector.broadcast %cst_19 : f32 to vector<128x1xf32>
    %26 = arith.divf %24, %25 : vector<128x1xf32>
    %27 = vector.broadcast %26 : vector<128x1xf32> to vector<128x128xf32>
    %28 = arith.subf %22, %27 : vector<128x128xf32>
    %29 = arith.mulf %28, %28 : vector<128x128xf32>
    %cst_20 = arith.constant dense<0.000000e+00> : vector<128xf32>
    %30 = vector.multi_reduction <add>, %29, %cst_20 [1] : vector<128x128xf32> to vector<128xf32>
    %31 = vector.shape_cast %30 : vector<128xf32> to vector<128x1xf32>
    %cst_21 = arith.constant 1.280000e+02 : f32
    %32 = vector.broadcast %cst_21 : f32 to vector<128x1xf32>
    %33 = arith.divf %31, %32 : vector<128x1xf32>
    %cst_22 = arith.constant 9.99999974E-6 : f32
    %34 = vector.broadcast %cst_22 : f32 to vector<128x1xf32>
    %35 = arith.addf %33, %34 : vector<128x1xf32>
    %36 = math.rsqrt %35 : vector<128x1xf32>
    %37 = vector.broadcast %36 : vector<128x1xf32> to vector<128x128xf32>
    %38 = arith.mulf %28, %37 : vector<128x128xf32>
    %c0_23 = arith.constant 0 : index
    %c0_24 = arith.constant 0 : index
    %39 = vector.load %arg8[%c0_23, %c0_24] : memref<1x128xf32, #tpu.memory_space<vmem>>, vector<1x128xf32>
    %40 = vector.broadcast %39 : vector<1x128xf32> to vector<128x128xf32>
    %41 = arith.mulf %38, %40 : vector<128x128xf32>
    %c0_25 = arith.constant 0 : index
    %c0_26 = arith.constant 0 : index
    %42 = vector.load %arg9[%c0_25, %c0_26] : memref<1x128xf32, #tpu.memory_space<vmem>>, vector<1x128xf32>
    %43 = vector.broadcast %42 : vector<1x128xf32> to vector<128x128xf32>
    %44 = arith.addf %41, %43 : vector<128x128xf32>
    %c0_27 = arith.constant 0 : index
    %c0_28 = arith.constant 0 : index
    %45 = vector.load %arg10[%c0_27, %c0_28] : memref<128x128xf32, #tpu.memory_space<vmem>>, vector<128x128xf32>
    tpu.vector_store %arg10[%c0_27, %c0_28], %44 {strides = array<i32>} : memref<128x128xf32, #tpu.memory_space<vmem>>, vector<128x128xf32>,
    return
  }
  func.func @transform_0(%arg0: i32) -> (i32, i32) {
    %c0_i32 = arith.constant 0 : i32
    %c0_i32_0 = arith.constant 0 : i32
    return %arg0, %c0_i32 : i32, i32
  }
  func.func @transform_1(%arg0: i32) -> (i32, i32) {
    %c0_i32 = arith.constant 0 : i32
    %c0_i32_0 = arith.constant 0 : i32
    %c0_i32_1 = arith.constant 0 : i32
    return %c0_i32, %c0_i32_0 : i32, i32
  }
  func.func @transform_2(%arg0: i32) -> (i32, i32) {
    %c0_i32 = arith.constant 0 : i32
    %c0_i32_0 = arith.constant 0 : i32
    %c0_i32_1 = arith.constant 0 : i32
    return %c0_i32, %c0_i32_0 : i32, i32
  }
  func.func @transform_3(%arg0: i32) -> (i32, i32) {
    %c0_i32 = arith.constant 0 : i32
    %c0_i32_0 = arith.constant 0 : i32
    %c0_i32_1 = arith.constant 0 : i32
    return %c0_i32, %c0_i32_0 : i32, i32
  }
  func.func @transform_4(%arg0: i32) -> (i32, i32) {
    %c0_i32 = arith.constant 0 : i32
    %c0_i32_0 = arith.constant 0 : i32
    %c0_i32_1 = arith.constant 0 : i32
    return %c0_i32, %c0_i32_0 : i32, i32
  }
  func.func @transform_5(%arg0: i32) -> (i32, i32) {
    %c0_i32 = arith.constant 0 : i32
    %c0_i32_0 = arith.constant 0 : i32
    %c0_i32_1 = arith.constant 0 : i32
    return %c0_i32, %c0_i32_0 : i32, i32
  }
  func.func @transform_6(%arg0: i32) -> (i32, i32) {
    %c0_i32 = arith.constant 0 : i32
    %c0_i32_0 = arith.constant 0 : i32
    %c0_i32_1 = arith.constant 0 : i32
    return %c0_i32, %c0_i32_0 : i32, i32
  }
  func.func @transform_7(%arg0: i32) -> (i32, i32) {
    %c0_i32 = arith.constant 0 : i32
    %c0_i32_0 = arith.constant 0 : i32
    %c0_i32_1 = arith.constant 0 : i32
    return %c0_i32, %c0_i32_0 : i32, i32
  }
  func.func @transform_8(%arg0: i32) -> (i32, i32) {
    %c0_i32 = arith.constant 0 : i32
    %c0_i32_0 = arith.constant 0 : i32
    %c0_i32_1 = arith.constant 0 : i32
    return %c0_i32, %c0_i32_0 : i32, i32
  }
  func.func @transform_9(%arg0: i32) -> (i32, i32) {
    %c0_i32 = arith.constant 0 : i32
    %c0_i32_0 = arith.constant 0 : i32
    return %arg0, %c0_i32 : i32, i32
  }
}

module attributes {stable_mosaic.version = 11 : i64} {
  func.func @_ffn_kernel(%arg0: i32, %arg1: memref<128x128xf32, #tpu.memory_space<vmem>>, %arg2: memref<128x256xf32, #tpu.memory_space<vmem>>, %arg3: memref<1x256xf32, #tpu.memory_space<vmem>>, %arg4: memref<256x256xf32, #tpu.memory_space<vmem>>, %arg5: memref<1x256xf32, #tpu.memory_space<vmem>>, %arg6: memref<256x128xf32, #tpu.memory_space<vmem>>, %arg7: memref<1x128xf32, #tpu.memory_space<vmem>>, %arg8: memref<1x128xf32, #tpu.memory_space<vmem>>, %arg9: memref<1x128xf32, #tpu.memory_space<vmem>>, %arg10: memref<128x128xf32, #tpu.memory_space<vmem>>) attributes {dimension_semantics = [#tpu.dimension_semantics<parallel>], iteration_bounds = array<i64: 2>, scalar_prefetch = 0 : i64, scratch_operands = 0 : i64, tpu.core_type = #tpu.core_type<tc>, window_params = [{transform_indices = @transform_0, window_bounds = array<i64: 128, 128>}, {pipeline_mode = #tpu.pipeline_mode<synchronous>, transform_indices = @transform_1, window_bounds = array<i64: 128, 256>}, {pipeline_mode = #tpu.pipeline_mode<synchronous>, transform_indices = @transform_2, window_bounds = array<i64: 1, 256>}, {pipeline_mode = #tpu.pipeline_mode<synchronous>, transform_indices = @transform_3, window_bounds = array<i64: 256, 256>}, {pipeline_mode = #tpu.pipeline_mode<synchronous>, transform_indices = @transform_4, window_bounds = array<i64: 1, 256>}, {pipeline_mode = #tpu.pipeline_mode<synchronous>, transform_indices = @transform_5, window_bounds = array<i64: 256, 128>}, {pipeline_mode = #tpu.pipeline_mode<synchronous>, transform_indices = @transform_6, window_bounds = array<i64: 1, 128>}, {pipeline_mode = #tpu.pipeline_mode<synchronous>, transform_indices = @transform_7, window_bounds = array<i64: 1, 128>}, {pipeline_mode = #tpu.pipeline_mode<synchronous>, transform_indices = @transform_8, window_bounds = array<i64: 1, 128>}, {transform_indices = @transform_9, window_bounds = array<i64: 128, 128>}]} {
    %c0 = arith.constant 0 : index
    %c0_0 = arith.constant 0 : index
    %0 = vector.load %arg1[%c0, %c0_0] : memref<128x128xf32, #tpu.memory_space<vmem>>, vector<128x128xf32>
    %c0_1 = arith.constant 0 : index
    %c0_2 = arith.constant 0 : index
    %1 = vector.load %arg2[%c0_1, %c0_2] : memref<128x256xf32, #tpu.memory_space<vmem>>, vector<128x256xf32>
    %cst = arith.constant dense<0.000000e+00> : vector<128x256xf32>
    %2 = tpu.matmul %0, %1, %cst {dimension_numbers = #tpu.dot_dimension_numbers<[1], [0], [0], [1], [0, 0, 1, 1], [], []>} : vector<128x128xf32>, vector<128x256xf32>, vector<128x256xf32> -> vector<128x256xf32>
    %c0_3 = arith.constant 0 : index
    %c0_4 = arith.constant 0 : index
    %3 = vector.load %arg3[%c0_3, %c0_4] : memref<1x256xf32, #tpu.memory_space<vmem>>, vector<1x256xf32>
    %4 = vector.broadcast %3 : vector<1x256xf32> to vector<128x256xf32>
    %5 = arith.addf %2, %4 : vector<128x256xf32>
    %cst_5 = arith.constant 0.000000e+00 : f32
    %6 = vector.broadcast %cst_5 : f32 to vector<128x256xf32>
    %7 = arith.maximumf %5, %6 : vector<128x256xf32>
    %c0_6 = arith.constant 0 : index
    %c0_7 = arith.constant 0 : index
    %8 = vector.load %arg4[%c0_6, %c0_7] : memref<256x256xf32, #tpu.memory_space<vmem>>, vector<256x256xf32>
    %cst_8 = arith.constant dense<0.000000e+00> : vector<128x256xf32>
    %9 = tpu.matmul %7, %8, %cst_8 {dimension_numbers = #tpu.dot_dimension_numbers<[1], [0], [0], [1], [0, 0, 1, 1], [], []>} : vector<128x256xf32>, vector<256x256xf32>, vector<128x256xf32> -> vector<128x256xf32>
    %c0_9 = arith.constant 0 : index
    %c0_10 = arith.constant 0 : index
    %10 = vector.load %arg5[%c0_9, %c0_10] : memref<1x256xf32, #tpu.memory_space<vmem>>, vector<1x256xf32>
    %11 = vector.broadcast %10 : vector<1x256xf32> to vector<128x256xf32>
    %12 = arith.addf %9, %11 : vector<128x256xf32>
    %cst_11 = arith.constant 0.000000e+00 : f32
    %13 = vector.broadcast %cst_11 : f32 to vector<128x256xf32>
    %14 = arith.maximumf %12, %13 : vector<128x256xf32>
    %c0_12 = arith.constant 0 : index
    %c0_13 = arith.constant 0 : index
    %15 = vector.load %arg6[%c0_12, %c0_13] : memref<256x128xf32, #tpu.memory_space<vmem>>, vector<256x128xf32>
    %cst_14 = arith.constant dense<0.000000e+00> : vector<128x128xf32>
    %16 = tpu.matmul %14, %15, %cst_14 {dimension_numbers = #tpu.dot_dimension_numbers<[1], [0], [0], [1], [0, 0, 1, 1], [], []>} : vector<128x256xf32>, vector<256x128xf32>, vector<128x128xf32> -> vector<128x128xf32>
    %c0_15 = arith.constant 0 : index
    %c0_16 = arith.constant 0 : index
    %17 = vector.load %arg7[%c0_15, %c0_16] : memref<1x128xf32, #tpu.memory_space<vmem>>, vector<1x128xf32>
    %18 = vector.broadcast %17 : vector<1x128xf32> to vector<128x128xf32>
    %19 = arith.addf %16, %18 : vector<128x128xf32>
    %cst_17 = arith.constant 0.000000e+00 : f32
    %20 = vector.broadcast %cst_17 : f32 to vector<128x128xf32>
    %21 = arith.maximumf %19, %20 : vector<128x128xf32>
    %22 = arith.addf %0, %21 : vector<128x128xf32>
    %cst_18 = arith.constant dense<0.000000e+00> : vector<128xf32>
    %23 = vector.multi_reduction <add>, %22, %cst_18 [1] : vector<128x128xf32> to vector<128xf32>
    %24 = vector.shape_cast %23 : vector<128xf32> to vector<128x1xf32>
    %cst_19 = arith.constant 1.280000e+02 : f32
    %25 = vector.broadcast %cst_19 : f32 to vector<128x1xf32>
    %26 = arith.divf %24, %25 : vector<128x1xf32>
    %27 = vector.broadcast %26 : vector<128x1xf32> to vector<128x128xf32>
    %28 = arith.subf %22, %27 : vector<128x128xf32>
    %29 = arith.mulf %28, %28 : vector<128x128xf32>
    %cst_20 = arith.constant dense<0.000000e+00> : vector<128xf32>
    %30 = vector.multi_reduction <add>, %29, %cst_20 [1] : vector<128x128xf32> to vector<128xf32>
    %31 = vector.shape_cast %30 : vector<128xf32> to vector<128x1xf32>
    %cst_21 = arith.constant 1.280000e+02 : f32
    %32 = vector.broadcast %cst_21 : f32 to vector<128x1xf32>
    %33 = arith.divf %31, %32 : vector<128x1xf32>
    %cst_22 = arith.constant 9.99999974E-6 : f32
    %34 = vector.broadcast %cst_22 : f32 to vector<128x1xf32>
    %35 = arith.addf %33, %34 : vector<128x1xf32>
    %36 = math.rsqrt %35 : vector<128x1xf32>
    %37 = vector.broadcast %36 : vector<128x1xf32> to vector<128x128xf32>
    %38 = arith.mulf %28, %37 : vector<128x128xf32>
    %c0_23 = arith.constant 0 : index
    %c0_24 = arith.constant 0 : index
    %39 = vector.load %arg8[%c0_23, %c0_24] : memref<1x128xf32, #tpu.memory_space<vmem>>, vector<1x128xf32>
    %40 = vector.broadcast %39 : vector<1x128xf32> to vector<128x128xf32>
    %41 = arith.mulf %38, %40 : vector<128x128xf32>
    %c0_25 = arith.constant 0 : index
    %c0_26 = arith.constant 0 : index
    %42 = vector.load %arg9[%c0_25, %c0_26] : memref<1x128xf32, #tpu.memory_space<vmem>>, vector<1x128xf32>
    %43 = vector.broadcast %42 : vector<1x128xf32> to vector<128x128xf32>
    %44 = arith.addf %41, %43 : vector<128x128xf32>
    %c0_27 = arith.constant 0 : index
    %c0_28 = arith.constant 0 : index
    %45 = vector.load %arg10[%c0_27, %c0_28] : memref<128x128xf32, #tpu.memory_space<vmem>>, vector<128x128xf32>
    tpu.vector_store %arg10[%c0_27, %c0_28], %44 {strides = array<i32>} : memref<128x128xf32, #tpu.memory_space<vmem>>, vector<128x128xf32>,
    return
  }
  func.func @transform_0(%arg0: i32) -> (i32, i32) {
    %c0_i32 = arith.constant 0 : i32
    %c0_i32_0 = arith.constant 0 : i32
    return %arg0, %c0_i32 : i32, i32
  }
  func.func @transform_1(%arg0: i32) -> (i32, i32) {
    %c0_i32 = arith.constant 0 : i32
    %c0_i32_0 = arith.constant 0 : i32
    %c0_i32_1 = arith.constant 0 : i32
    return %c0_i32, %c0_i32_0 : i32, i32
  }
  func.func @transform_2(%arg0: i32) -> (i32, i32) {
    %c0_i32 = arith.constant 0 : i32
    %c0_i32_0 = arith.constant 0 : i32
    %c0_i32_1 = arith.constant 0 : i32
    return %c0_i32, %c0_i32_0 : i32, i32
  }
  func.func @transform_3(%arg0: i32) -> (i32, i32) {
    %c0_i32 = arith.constant 0 : i32
    %c0_i32_0 = arith.constant 0 : i32
    %c0_i32_1 = arith.constant 0 : i32
    return %c0_i32, %c0_i32_0 : i32, i32
  }
  func.func @transform_4(%arg0: i32) -> (i32, i32) {
    %c0_i32 = arith.constant 0 : i32
    %c0_i32_0 = arith.constant 0 : i32
    %c0_i32_1 = arith.constant 0 : i32
    return %c0_i32, %c0_i32_0 : i32, i32
  }
  func.func @transform_5(%arg0: i32) -> (i32, i32) {
    %c0_i32 = arith.constant 0 : i32
    %c0_i32_0 = arith.constant 0 : i32
    %c0_i32_1 = arith.constant 0 : i32
    return %c0_i32, %c0_i32_0 : i32, i32
  }
  func.func @transform_6(%arg0: i32) -> (i32, i32) {
    %c0_i32 = arith.constant 0 : i32
    %c0_i32_0 = arith.constant 0 : i32
    %c0_i32_1 = arith.constant 0 : i32
    return %c0_i32, %c0_i32_0 : i32, i32
  }
  func.func @transform_7(%arg0: i32) -> (i32, i32) {
    %c0_i32 = arith.constant 0 : i32
    %c0_i32_0 = arith.constant 0 : i32
    %c0_i32_1 = arith.constant 0 : i32
    return %c0_i32, %c0_i32_0 : i32, i32
  }
  func.func @transform_8(%arg0: i32) -> (i32, i32) {
    %c0_i32 = arith.constant 0 : i32
    %c0_i32_0 = arith.constant 0 : i32
    %c0_i32_1 = arith.constant 0 : i32
    return %c0_i32, %c0_i32_0 : i32, i32
  }
  func.func @transform_9(%arg0: i32) -> (i32, i32) {
    %c0_i32 = arith.constant 0 : i32
    %c0_i32_0 = arith.constant 0 : i32
    return %arg0, %c0_i32 : i32, i32
  }
}

</mosaic_0001>

<bundles_post_ra>
// kernel: _ffn_pallas.1
= control target key start
LH: loop header
LB: loop body
LE: loop exit
PB: predicated region body
PF: predicated region fallthrough
CT: control target
= control target key end

     0   :  { %s2637_s0 = inlined_call_operand.hbm [shape: f32[256,128], index: 0, kind: input, shape index: {}]   ;;  %s2638_s1 = inlined_call_operand.hbm [shape: f32[128,256], index: 1, kind: input, shape index: {}]   ;;  %s2639_s2 = inlined_call_operand.vmem [shape: f32[1,256], index: 2, kind: input, shape index: {}]   ;;  %s2640_s3 = inlined_call_operand.hbm [shape: f32[256,256], index: 3, kind: input, shape index: {}]   ;;  %s2641_s4 = inlined_call_operand.vmem [shape: f32[1,256], index: 4, kind: input, shape index: {}]   ;;  %s2642_s5 = inlined_call_operand.hbm [shape: f32[256,128], index: 5, kind: input, shape index: {}]   ;;  %s2643_s6 = inlined_call_operand.vmem [shape: f32[1,128], index: 6, kind: input, shape index: {}]   ;;  %s2644_s7 = inlined_call_operand.vmem [shape: f32[1,128], index: 7, kind: input, shape index: {}]   ;;  %s2645_s8 = inlined_call_operand.vmem [shape: f32[1,128], index: 8, kind: input, shape index: {}]   ;;  %s2646_s9 = inlined_call_operand.hbm [shape: f32[256,128], index: 9, kind: output, shape index: {}]  }
   0x1   :  { %2649 = sst [smem:[#allocation15_spill]] %s2638_s1 }
   0x2   :  { %2650 = sst [smem:[#allocation16_spill]] %s2640_s3 }
   0x3   :  { %2651 = sst [smem:[#allocation17_spill]] %s2642_s5 }
   0x4   :  { %14 = vsyncpa [#allocation3], 0 }
   0x5   :  { %16 = vsyncpa [#allocation3 + $0x1], 0 }
   0x6   :  { %17 = vsyncpa [#allocation6], 0 }
   0x7   :  { %18 = vsyncpa [#allocation9], 0 }
   0x8   :  { %19 = vsyncpa [#allocation4], 0 }
   0x9   :  { %21 = vsyncpa [#allocation4 + $0x1], 0  ;;  %s2097_s30 = smov 0   ;;  %s2099_s10 = smov 0  }
   0xa   :  { %s2101_s11 = smov 0   ;;  %s2103_s12 = smov 0  }
   0xb LB: > { %s2118_s13 = sadd.s32 4294967295, %s2035_s12   ;;  %s1682_s14 = sadd.s32 4294967294, %s2035_s12   ;;  %s2035_s12 = sphi %s2103_s12, %s2667_s12   ;;  %s2031_s11 = sphi %s2101_s11, %s2666_s11   ;;  %s2027_s10 = sphi %s2099_s10, %s2665_s10   ;;  %s2023_s30 = sphi %s2097_s30, %s2664_s30  }
   0xc   : > { %p47_p0 = scmp.ne.s32.totalorder %s2027_s10, %s2023_s30  ;;  %p48_p1 = scmp.eq.s32.totalorder %s2118_s13, 0 }
   0xd   : > { %p239_p2 = scmp.eq.s32.totalorder %s2118_s13, 1  ;;  %p245_p3 = scmp.eq.s32.totalorder %s1682_s14, 1 }
   0xe   : > { %p2127_p4 = por %p48_p1, %p47_p0  ;;  %p1683_p5 = scmp.ge.s32.totalorder %s2035_s12, 1 }
   0xf   : > { %p2132_p6 = por %p245_p3, %p47_p0  ;;  %p252_p7 = scmp.lt.s32.totalorder %s2035_s12, 3 }
  0x10   : > { %s2654_s1 = sld [smem:[#allocation15_spill]]  ;;  %s2037_s21 = smov [#allocation5]  }
  0x11   : > { %p2140_p8 = pnand %p1683_p5, %p252_p7  ;;  %s265_s22 = sshll.u32 %s2037_s21, 4  ;;  %s266_s22 = int_to_ptr.vmem [resolvable:$true] %s265_s22 }
  0x12   : > { %s2657_s3 = sld [smem:[#allocation16_spill]]  ;;  %s2038_s27 = smov 256  }
  0x13   : > { %p1720_p9 = pneg %p2140_p8  ;;  %s2039_s28 = smov 16  }
  0x14   : > { %s2040_s29 = smov [#allocation7]   ;;  %s2658_s5 = sld [smem:[#allocation17_spill]] }
  0x15   : > { %p2148_p10 = pnand %p1720_p9, %p48_p1  ;;  %s282_s14 = sshll.u32 %s2040_s29, 4  ;;  %s283_s14 = int_to_ptr.vmem [resolvable:$true] %s282_s14 }
  0x16   : > { %s263_s19 = sshll.u32 %s2654_s1, 4  ;;  %s2041_s24 = smov [#allocation8]   ;;  %s264_s19 = int_to_ptr.hbm [resolvable:$true] %s263_s19 }
  0x17   : > { %1723 = dma.hbm_to_vmem [thread:$0]  (!%p2148_p10), %s264_s19, 4096, %s266_s22, [#allocation6], %s2038_s27, %s2038_s27, %s2039_s28  }
  0x18   : > { %s280_s26 = sshll.u32 %s2657_s3, 4  ;;  %s299_s19 = sshll.u32 %s2041_s24, 4  ;;  %s281_s26 = int_to_ptr.hbm [resolvable:$true] %s280_s26  ;;  %s300_s19 = int_to_ptr.vmem [resolvable:$true] %s299_s19 }
  0x19   : > { %1726 = dma.hbm_to_vmem [thread:$0]  (!%p2148_p10), %s281_s26, 8192, %s283_s14, [#allocation6], %s2038_s27, %s2038_s27, %s2039_s28  }
  0x1a   : > { %s297_s21 = sshll.u32 %s2658_s5, 4  ;;  %s2647_s22 = smov 128   ;;  %s298_s21 = int_to_ptr.hbm [resolvable:$true] %s297_s21 }
  0x1b   : > { %s2648_s25 = smov 8   ;;  %s2169_s29 = sadd.s32 1, %s2035_s12  }
  0x1c   : > { %1729 = dma.hbm_to_vmem [thread:$0]  (!%p2148_p10), %s298_s21, 4096, %s300_s19, [#allocation9], %s2647_s22, %s2647_s22, %s2648_s25  }
  0x1d   : > { %s31_s17 = ssub.s32 %s2035_s12, %s2169_s29  ;;  %s34_s18 = sadd.s32 1, %s2031_s11 }
  0x1e   : > { %p32_p12 = scmp.eq.s32.totalorder %s31_s17, 0  ;;  %p41_p13 = scmp.ne.s32.totalorder %s2031_s11, %s2027_s10 }
  0x1f   : > { %p42_p0 = scmp.eq.s32.totalorder %s2035_s12, 0  ;;  %p1741_p5 = scmp.lt.s32.totalorder %s2035_s12, 2 }
  0x20   : > { %s2178_s26 = scalar_select %p32_p12, %s2031_s11, %s34_s18  }
  0x21   : > { %p2182_p3 = por %p239_p2, %p41_p13  ;;  %s322_s23 = sand.u32 1, %s2031_s11  }
  0x22   : > { %s1702_s28 = sshll.u32 %s2035_s12, 7  ;;  %p43_p7 = por %p42_p0, %p41_p13 }
  0x23   : > { %s1688_s14 = sshll.u32 %s322_s23, 7  ;;  %s331_s19 = scalar_lea.hbm %s2637_s0, %s1702_s28 }
  0x24   : > { %s332_s22 = sshll.u32 %s331_s19, 4  ;;  %s326_s17 = scalar_lea.vmem [#allocation2], %s1688_s14  ;;  %s333_s22 = int_to_ptr.hbm [resolvable:$true] %s332_s22 }
  0x25   : > { %s334_s25 = sshll.u32 %s326_s17, 4  ;;  %p2192_p9 = pnand %p1741_p5, %p43_p7  ;;  %s335_s25 = int_to_ptr.vmem [resolvable:$true] %s334_s25 }
  0x26   : > { %s323_s1 = scalar_lea.sflag [#allocation3], %s322_s23  ;;  %s1931_s3 = sshra.s32 %s333_s22, 4  ;;  %s1932_s3 = int_to_ptr.hbm [resolvable:$true] %s1931_s3 }
  0x27   : > { %s1933_s5 = scalar_lea.hbm %s1932_s3, 128  ;;  %p1935_p10 = pneg %p2192_p9 }
  0x28   : > { %p1934_p2 = scmp.ne.s32.totalorder %s1932_s3, %s1933_s5  ;;  %s1938_s14 = scalar_lea.hbm %s2637_s0, 256 }
  0x29   : > { %p1939_p0 = scmp.lt.s32.totalorder %s1932_s3, %s2637_s0  ;;  %p1940_p5 = scmp.lt.s32.totalorder %s1938_s14, %s1933_s5 }
  0x2a   : > { %p1936_p12 = pnand %p1935_p10, %p1934_p2 }
  0x2b   : > { %p1941_p7 = por %p1940_p5, %p1939_p0 }
  0x2c   : > { %p1937_p13 = pneg %p1936_p12 }
  0x2e   : > { %p1942_p11 = pnand %p1941_p7, %p1937_p13 }
  0x30   : > { %1945 = shalt.err (!%p1942_p11)
}
  0x31   : > { %s2661_s23 = smov 8   ;;  %s2662_s17 = smov 128  }
  0x32   : > { %1733 = dma.hbm_to_vmem [thread:$0]  (!%p2192_p9), %s333_s22, 2048, %s335_s25, %s323_s1, %s2662_s17, %s2662_s17, %s2661_s23  }
  0x33   : > { %346 = sbr.rel (%p2140_p8) target bundleno = 891 (0x37b), region = 56  ;;  %s2212_s28 = sand.u32 (!%p2140_p8), 1, %s2027_s10  }
  0x34   : > { %s1692_s3 = sshll.u32 (!%p2140_p8), %s2212_s28, 7  ;;  %s349_s5 = scalar_lea.sflag (!%p2140_p8), [#allocation3], %s2212_s28 }
  0x35   : > { %s2218_s21 = scalar_lea.vmem (!%p2140_p8), [#allocation2], %s1692_s3 }
  0x38   : > { %2006 = dma.done.wait (%p2127_p4), %s349_s5, 2048  }
  0x39   : > { %2008 = vsyncadd (%p2127_p4), %s349_s5, 4294965248 }
  0x3a   : > { %2010 = dma.done.wait (%p48_p1), [#allocation6], 12288  }
  0x3b   : > { %2012 = vsyncadd (%p48_p1), [#allocation6], 4294955008 }
  0x3c   : > { %2014 = dma.done.wait (%p48_p1), [#allocation9], 4096  }
  0x3d   : > { %2016 = vsyncadd (%p48_p1), [#allocation9], 4294963200  ;;  %v451_v0 = vld [vmem:[#allocation5 + $0xf0] sm:$0xff]  ;;  %v449_v1 = vld [vmem:[#allocation5 + $0xe0] sm:$0xff]  ;;  %s2528_s17 = scalar_lea.vmem [#allocation10], %s1692_s3  ;;  %s1703_s3 = sshll.u32 %s2118_s13, 7 }
  0x3e   : > { %v452_v2 = vld [vmem:[#allocation5 + $0xf8] sm:$0xff]  ;;  %459 = vmatpush.msra.mxu0 %v451_v0  ;;  %v450_v3 = vld [vmem:[#allocation5 + $0xe8] sm:$0xff]  ;;  %v447_v4 = vld [vmem:[#allocation5 + $0xd0] sm:$0xff]  ;;  %s1576_s1 = scalar_lea.hbm %s2646_s9, %s1703_s3  ;;  %s1577_s15 = sshll.u32 %s2528_s17, 4  ;;  %s1578_s15 = int_to_ptr.vmem [resolvable:$true] %s1577_s15 }
  0x3f   : > { %524 = vmatpush.msra.mxu1 %v452_v2  ;;  %v448_v5 = vld [vmem:[#allocation5 + $0xd8] sm:$0xff]  ;;  %v445_v6 = vld [vmem:[#allocation5 + $0xc0] sm:$0xff]  ;;  %v446_v7 = vld [vmem:[#allocation5 + $0xc8] sm:$0xff]  ;;  %s1579_s13 = sshll.u32 %s1576_s1, 4  ;;  %s1565_s20 = scalar_lea.sflag [#allocation4], %s2212_s28  ;;  %s1580_s13 = int_to_ptr.hbm [resolvable:$true] %s1579_s13 }
  0x40   : > { %460 = vmatpush.msra.mxu0 %v449_v1  ;;  %v443_v8 = vld [vmem:[#allocation5 + $0xb0] sm:$0xff]  ;;  %v444_v9 = vld [vmem:[#allocation5 + $0xb8] sm:$0xff]  ;;  %v441_v10 = vld [vmem:[#allocation5 + $0xa0] sm:$0xff]  ;;  %s1975_s22 = sshra.s32 %s1580_s13, 4  ;;  %s1981_s24 = scalar_lea.hbm %s2646_s9, 256  ;;  %s1976_s22 = int_to_ptr.hbm [resolvable:$true] %s1975_s22 }
  0x41   : > { %525 = vmatpush.msra.mxu1 %v450_v3  ;;  %v442_v11 = vld [vmem:[#allocation5 + $0xa8] sm:$0xff]  ;;  %v439_v12 = vld [vmem:[#allocation5 + $0x90] sm:$0xff]  ;;  %v440_v13 = vld [vmem:[#allocation5 + $0x98] sm:$0xff]  ;;  %s1977_s25 = scalar_lea.hbm %s1976_s22, 128  ;;  %p1982_p11 = scmp.lt.s32.totalorder %s1976_s22, %s2646_s9 }
  0x42   : > { %461 = vmatpush.msra.mxu0 %v447_v4  ;;  %v437_v14 = vld [vmem:[#allocation5 + $0x80] sm:$0xff]  ;;  %v438_v15 = vld [vmem:[#allocation5 + $0x88] sm:$0xff]  ;;  %v435_v16 = vld [vmem:[#allocation5 + $0x70] sm:$0xff]  ;;  %p1978_p1 = scmp.ne.s32.totalorder %s1976_s22, %s1977_s25  ;;  %p1983_p9 = scmp.lt.s32.totalorder %s1981_s24, %s1977_s25 }
  0x43   : > { %526 = vmatpush.msra.mxu1 %v448_v5  ;;  %v436_v17 = vld [vmem:[#allocation5 + $0x78] sm:$0xff]  ;;  %v433_v18 = vld [vmem:[#allocation5 + $0x60] sm:$0xff]  ;;  %v434_v19 = vld [vmem:[#allocation5 + $0x68] sm:$0xff] }
  0x44   : > { %462 = vmatpush.msra.mxu0 %v445_v6  ;;  %v431_v20 = vld [vmem:[#allocation5 + $0x50] sm:$0xff]  ;;  %v432_v21 = vld [vmem:[#allocation5 + $0x58] sm:$0xff]  ;;  %v429_v22 = vld [vmem:[#allocation5 + $0x40] sm:$0xff]  ;;  %p1979_p4 = pnand %p1978_p1, %p2182_p3  ;;  %p1984_p2 = por %p1983_p9, %p1982_p11 }
  0x45   : > { %527 = vmatpush.msra.mxu1 %v446_v7  ;;  %v430_v23 = vld [vmem:[#allocation5 + $0x48] sm:$0xff]  ;;  %v427_v24 = vld [vmem:[#allocation5 + $0x30] sm:$0xff]  ;;  %v428_v25 = vld [vmem:[#allocation5 + $0x38] sm:$0xff] }
  0x46   : > { %463 = vmatpush.msra.mxu0 %v443_v8  ;;  %v425_v26 = vld [vmem:[#allocation5 + $0x20] sm:$0xff]  ;;  %v426_v27 = vld [vmem:[#allocation5 + $0x28] sm:$0xff]  ;;  %v423_v28 = vld [vmem:[#allocation5 + $0x10] sm:$0xff]  ;;  %p1980_p8 = pneg %p1979_p4 }
  0x47   : > { %528 = vmatpush.msra.mxu1 %v444_v9  ;;  %v424_v29 = vld [vmem:[#allocation5 + $0x18] sm:$0xff]  ;;  %v421_v30 = vld [vmem:[#allocation5] sm:$0xff]  ;;  %v422_v31 = vld [vmem:[#allocation5 + $0x8] sm:$0xff] }
  0x48   : > { %464 = vmatpush.msra.mxu0 %v441_v10  ;;  %v405_v32 = vld [vmem:[%s2218_s21] sm:$0xff]  ;;  %v652_v33 = vld [vmem:[#allocation7 + $0xf8] sm:$0xff]  ;;  %v650_v35 = vld [vmem:[#allocation7 + $0xe8] sm:$0xff]  ;;  %p1985_p10 = pnand %p1984_p2, %p1980_p8 }
  0x49   : > { %529 = vmatpush.msra.mxu1 %v442_v11  ;;  %v684_v34 = vld [vmem:[#allocation7 + $0x1f8] sm:$0xff]  ;;  %v682_v36 = vld [vmem:[#allocation7 + $0x1e8] sm:$0xff]  ;;  %v407_v44 = vld [vmem:[%s2218_s21 + $0x10] sm:$0xff] }
  0x4a   : > { %465 = vmatpush.msra.mxu0 %v439_v12  ;;  %v648_v37 = vld [vmem:[#allocation7 + $0xd8] sm:$0xff]  ;;  %v646_v39 = vld [vmem:[#allocation7 + $0xc8] sm:$0xff]  ;;  %v409_v50 = vld [vmem:[%s2218_s21 + $0x20] sm:$0xff] }
  0x4b   : > { %530 = vmatpush.msra.mxu1 %v440_v13  ;;  %v680_v38 = vld [vmem:[#allocation7 + $0x1d8] sm:$0xff]  ;;  %v678_v40 = vld [vmem:[#allocation7 + $0x1c8] sm:$0xff]  ;;  %v411_v56 = vld [vmem:[%s2218_s21 + $0x30] sm:$0xff] }
  0x4c   : > { %466 = vmatpush.msra.mxu0 %v437_v14  ;;  %v406_v41 = vld [vmem:[%s2218_s21 + $0x8] sm:$0xff]  ;;  %v644_v42 = vld [vmem:[#allocation7 + $0xb8] sm:$0xff]  ;;  %v413_v62 = vld [vmem:[%s2218_s21 + $0x40] sm:$0xff] }
  0x4d   : > { %531 = vmatpush.msra.mxu1 %v438_v15  ;;  %v676_v43 = vld [vmem:[#allocation7 + $0x1b8] sm:$0xff]  ;;  %v642_v45 = vld [vmem:[#allocation7 + $0xa8] sm:$0xff]  ;;  %v651_v0 = vld [vmem:[#allocation7 + $0xf0] sm:$0xff] }
  0x4e   : > { %467 = vmatpush.msra.mxu0 %v435_v16  ;;  %v674_v46 = vld [vmem:[#allocation7 + $0x1a8] sm:$0xff]  ;;  %v408_v47 = vld [vmem:[%s2218_s21 + $0x18] sm:$0xff]  ;;  %691 = vmatpush.msra.mxu2 %v651_v0  ;;  %v649_v2 = vld [vmem:[#allocation7 + $0xe0] sm:$0xff] }
  0x4f   : > { %532 = vmatpush.msra.mxu1 %v436_v17  ;;  %v640_v48 = vld [vmem:[#allocation7 + $0x98] sm:$0xff]  ;;  %v638_v51 = vld [vmem:[#allocation7 + $0x88] sm:$0xff]  ;;  %v683_v3 = vld [vmem:[#allocation7 + $0x1f0] sm:$0xff] }
  0x50   : > { %468 = vmatpush.msra.mxu0 %v433_v18  ;;  %v672_v49 = vld [vmem:[#allocation7 + $0x198] sm:$0xff]  ;;  %v670_v52 = vld [vmem:[#allocation7 + $0x188] sm:$0xff]  ;;  %756 = vmatpush.msra.mxu3 %v683_v3  ;;  %v647_v4 = vld [vmem:[#allocation7 + $0xd0] sm:$0xff] }
  0x51   : > { %533 = vmatpush.msra.mxu1 %v434_v19  ;;  %v410_v53 = vld [vmem:[%s2218_s21 + $0x28] sm:$0xff]  ;;  %v636_v54 = vld [vmem:[#allocation7 + $0x78] sm:$0xff]  ;;  %v681_v5 = vld [vmem:[#allocation7 + $0x1e0] sm:$0xff]  ;;  %692 = vmatpush.msra.mxu2 %v649_v2 }
  0x52   : > { %469 = vmatpush.msra.mxu0 %v431_v20  ;;  %v668_v55 = vld [vmem:[#allocation7 + $0x178] sm:$0xff]  ;;  %v634_v57 = vld [vmem:[#allocation7 + $0x68] sm:$0xff]  ;;  %757 = vmatpush.msra.mxu3 %v681_v5  ;;  %v645_v7 = vld [vmem:[#allocation7 + $0xc0] sm:$0xff] }
  0x53   : > { %534 = vmatpush.msra.mxu1 %v432_v21  ;;  %v666_v58 = vld [vmem:[#allocation7 + $0x168] sm:$0xff]  ;;  %v412_v59 = vld [vmem:[%s2218_s21 + $0x38] sm:$0xff]  ;;  %693 = vmatpush.msra.mxu2 %v647_v4  ;;  %v679_v8 = vld [vmem:[#allocation7 + $0x1d0] sm:$0xff] }
  0x54   : > { %470 = vmatpush.msra.mxu0 %v429_v22  ;;  %v632_v60 = vld [vmem:[#allocation7 + $0x58] sm:$0xff]  ;;  %v630_v63 = vld [vmem:[#allocation7 + $0x48] sm:$0xff]  ;;  %758 = vmatpush.msra.mxu3 %v679_v8  ;;  %v643_v10 = vld [vmem:[#allocation7 + $0xb0] sm:$0xff] }
  0x55   : > { %535 = vmatpush.msra.mxu1 %v430_v23  ;;  %v664_v61 = vld [vmem:[#allocation7 + $0x158] sm:$0xff]  ;;  %v662_v1 = vld [vmem:[#allocation7 + $0x148] sm:$0xff]  ;;  %694 = vmatpush.msra.mxu2 %v645_v7  ;;  %v677_v11 = vld [vmem:[#allocation7 + $0x1c0] sm:$0xff] }
  0x56   : > { %471 = vmatpush.msra.mxu0 %v427_v24  ;;  %v414_v6 = vld [vmem:[%s2218_s21 + $0x48] sm:$0xff]  ;;  %v628_v9 = vld [vmem:[#allocation7 + $0x38] sm:$0xff]  ;;  %v641_v13 = vld [vmem:[#allocation7 + $0xa0] sm:$0xff]  ;;  %759 = vmatpush.msra.mxu3 %v677_v11 }
  0x57   : > { %536 = vmatpush.msra.mxu1 %v428_v25  ;;  %v660_v12 = vld [vmem:[#allocation7 + $0x138] sm:$0xff]  ;;  %v675_v14 = vld [vmem:[#allocation7 + $0x1b0] sm:$0xff]  ;;  %695 = vmatpush.msra.mxu2 %v643_v10  ;;  %v673_v16 = vld [vmem:[#allocation7 + $0x1a0] sm:$0xff] }
  0x58   : > { %472 = vmatpush.msra.mxu0 %v425_v26  ;;  %v639_v15 = vld [vmem:[#allocation7 + $0x90] sm:$0xff]  ;;  %760 = vmatpush.msra.mxu3 %v675_v14  ;;  %v637_v18 = vld [vmem:[#allocation7 + $0x80] sm:$0xff]  ;;  %v626_v20 = vld [vmem:[#allocation7 + $0x28] sm:$0xff] }
  0x59   : > { %537 = vmatpush.msra.mxu1 %v426_v27  ;;  %v415_v17 = vld [vmem:[%s2218_s21 + $0x50] sm:$0xff]  ;;  %696 = vmatpush.msra.mxu2 %v641_v13  ;;  %v669_v22 = vld [vmem:[#allocation7 + $0x180] sm:$0xff]  ;;  %v658_v23 = vld [vmem:[#allocation7 + $0x128] sm:$0xff] }
  0x5a   : > { %473 = vmatpush.msra.mxu0 %v423_v28  ;;  %761 = vmatpush.msra.mxu3 %v673_v16  ;;  %v671_v19 = vld [vmem:[#allocation7 + $0x190] sm:$0xff]  ;;  %v633_v24 = vld [vmem:[#allocation7 + $0x60] sm:$0xff]  ;;  %v416_v28 = vld [vmem:[%s2218_s21 + $0x58] sm:$0xff] }
  0x5b   : > { %538 = vmatpush.msra.mxu1 %v424_v29  ;;  %697 = vmatpush.msra.mxu2 %v639_v15  ;;  %v635_v21 = vld [vmem:[#allocation7 + $0x70] sm:$0xff]  ;;  %v665_v27 = vld [vmem:[#allocation7 + $0x160] sm:$0xff]  ;;  %v994_v7 = vld [vmem:[#allocation8 + $0x58] sm:$0xff] }
  0x5c   : > { %474 = vmatpush.msra.mxu0 %v421_v30  ;;  %762 = vmatpush.msra.mxu3 %v671_v19  ;;  %v667_v25 = vld [vmem:[#allocation7 + $0x170] sm:$0xff]  ;;  %v629_v29 = vld [vmem:[#allocation7 + $0x40] sm:$0xff] }
  0x5d   : > { %539 = vmatpush.msra.mxu1 %v422_v31  ;;  %475 = vmatmul.f32.vlgmr.msra.gmra.mxu0 %v405_v32  ;;  %v631_v26 = vld [vmem:[#allocation7 + $0x50] sm:$0xff]  ;;  %v624_v31 = vld [vmem:[#allocation7 + $0x18] sm:$0xff]  ;;  %v1011_v4 = vld [vmem:[#allocation8 + $0xe0] sm:$0xff] }
  0x5e   : > { %540 = vmatmul.f32.vlgmr.msra.gmra.mxu1 %v405_v32  ;;  %821 = vmatpush.msrb.mxu0 %v652_v33  ;;  %v663_v30 = vld [vmem:[#allocation7 + $0x150] sm:$0xff]  ;;  %v661_v33 = vld [vmem:[#allocation7 + $0x140] sm:$0xff] }
  0x5f   : > { %886 = vmatpush.msrb.mxu1 %v684_v34  ;;  %698 = vmatpush.msra.mxu2 %v637_v18  ;;  %v627_v32 = vld [vmem:[#allocation7 + $0x30] sm:$0xff]  ;;  %v656_v34 = vld [vmem:[#allocation7 + $0x118] sm:$0xff] }
  0x60   : > { %822 = vmatpush.msrb.mxu0 %v650_v35  ;;  %763 = vmatpush.msra.mxu3 %v669_v22  ;;  %v625_v35 = vld [vmem:[#allocation7 + $0x20] sm:$0xff]  ;;  %v993_v15 = vld [vmem:[#allocation8 + $0x50] sm:$0xff] }
  0x61   : > { %887 = vmatpush.msrb.mxu1 %v682_v36  ;;  %699 = vmatpush.msra.mxu2 %v635_v21  ;;  %v659_v36 = vld [vmem:[#allocation7 + $0x130] sm:$0xff] }
  0x62   : > { %823 = vmatpush.msrb.mxu0 %v648_v37  ;;  %764 = vmatpush.msra.mxu3 %v667_v25  ;;  %v417_v37 = vld [vmem:[%s2218_s21 + $0x60] sm:$0xff] }
  0x63   : > { %888 = vmatpush.msrb.mxu1 %v680_v38  ;;  %700 = vmatpush.msra.mxu2 %v633_v24  ;;  %v623_v38 = vld [vmem:[#allocation7 + $0x10] sm:$0xff] }
  0x64   : > { %824 = vmatpush.msrb.mxu0 %v646_v39  ;;  %765 = vmatpush.msra.mxu3 %v665_v27  ;;  %v657_v39 = vld [vmem:[#allocation7 + $0x120] sm:$0xff] }
  0x65   : > { %889 = vmatpush.msrb.mxu1 %v678_v40  ;;  %478 = vmatmul.f32.gmra.mxu0 %v406_v41  ;;  %v621_v40 = vld [vmem:[#allocation7] sm:$0xff] }
  0x66   : > { %543 = vmatmul.f32.gmra.mxu1 %v406_v41  ;;  %825 = vmatpush.msrb.mxu0 %v644_v42  ;;  %v655_v41 = vld [vmem:[#allocation7 + $0x110] sm:$0xff]  ;;  %v622_v42 = vld [vmem:[#allocation7 + $0x8] sm:$0xff] }
  0x67   : > { %890 = vmatpush.msrb.mxu1 %v676_v43  ;;  %701 = vmatpush.msra.mxu2 %v631_v26  ;;  %v653_v43 = vld [vmem:[#allocation7 + $0x100] sm:$0xff] }
  0x68   : > { %826 = vmatpush.msrb.mxu0 %v642_v45  ;;  %766 = vmatpush.msra.mxu3 %v663_v30  ;;  %v418_v45 = vld [vmem:[%s2218_s21 + $0x68] sm:$0xff] }
  0x69   : > { %891 = vmatpush.msrb.mxu1 %v674_v46  ;;  %702 = vmatpush.msra.mxu2 %v629_v29  ;;  %v998_v46 = vld [vmem:[#allocation8 + $0x78] sm:$0xff]  ;;  %v1008_v30 = vld [vmem:[#allocation8 + $0xc8] sm:$0xff] }
  0x6a   : > { %827 = vmatpush.msrb.mxu0 %v640_v48  ;;  %767 = vmatpush.msra.mxu3 %v661_v33  ;;  %v1014_v48 = vld [vmem:[#allocation8 + $0xf8] sm:$0xff] }
  0x6b   : > { %892 = vmatpush.msrb.mxu1 %v672_v49  ;;  %703 = vmatpush.msra.mxu2 %v627_v32  ;;  %v997_v49 = vld [vmem:[#allocation8 + $0x70] sm:$0xff] }
  0x6c   : > { %828 = vmatpush.msrb.mxu0 %v638_v51  ;;  %768 = vmatpush.msra.mxu3 %v659_v36  ;;  %v1013_v51 = vld [vmem:[#allocation8 + $0xf0] sm:$0xff] }
  0x6d   : > { %481 = vmatmul.f32.gmra.mxu0 %v407_v44  ;;  %893 = vmatpush.msrb.mxu1 %v670_v52  ;;  %v453_v52 = vld [vmem:[%s2639_s2] sm:$0x3] }
  0x6e   : > { %546 = vmatmul.f32.gmra.mxu1 %v407_v44  ;;  %829 = vmatpush.msrb.mxu0 %v636_v54  ;;  %v654_v44 = vld [vmem:[#allocation7 + $0x108] sm:$0xff]  ;;  %v2253_v54 = vperm.slane %v453_v52, 1 }
  0x6f   : > { %894 = vmatpush.msrb.mxu1 %v668_v55  ;;  %704 = vmatpush.msra.mxu2 %v625_v35  ;;  %v996_v55 = vld [vmem:[#allocation8 + $0x68] sm:$0xff] }
  0x70   : > { %830 = vmatpush.msrb.mxu0 %v634_v57  ;;  %769 = vmatpush.msra.mxu3 %v657_v39  ;;  %v990_v39 = vld [vmem:[#allocation8 + $0x38] sm:$0xff] }
  0x71   : > { %895 = vmatpush.msrb.mxu1 %v666_v58  ;;  %705 = vmatpush.msra.mxu2 %v623_v38  ;;  %v1007_v38 = vld [vmem:[#allocation8 + $0xc0] sm:$0xff] }
  0x72   : > { %831 = vmatpush.msrb.mxu0 %v632_v60  ;;  %770 = vmatpush.msra.mxu3 %v655_v41  ;;  %v1012_v60 = vld [vmem:[#allocation8 + $0xe8] sm:$0xff] }
  0x73   : > { %896 = vmatpush.msrb.mxu1 %v664_v61  ;;  %706 = vmatpush.msra.mxu2 %v621_v40 }
  0x74   : > { %832 = vmatpush.msrb.mxu0 %v630_v63  ;;  %771 = vmatpush.msra.mxu3 %v653_v43  ;;  %v995_v63 = vld [vmem:[#allocation8 + $0x60] sm:$0xff] }
  0x75   : > { %484 = vmatmul.f32.gmra.mxu0 %v408_v47  ;;  %897 = vmatpush.msrb.mxu1 %v662_v1 }
  0x76   : > { %549 = vmatmul.f32.gmra.mxu1 %v408_v47  ;;  %833 = vmatpush.msrb.mxu0 %v628_v9  ;;  %v419_v47 = vld [vmem:[%s2218_s21 + $0x70] sm:$0xff] }
  0x77   : > { %898 = vmatpush.msrb.mxu1 %v660_v12  ;;  %1019 = vmatpush.msrb.mxu2 %v998_v46  ;;  %v1010_v12 = vld [vmem:[#allocation8 + $0xd8] sm:$0xff] }
  0x78   : > { %834 = vmatpush.msrb.mxu0 %v626_v20  ;;  %1084 = vmatpush.msrb.mxu3 %v1014_v48  ;;  %v1009_v20 = vld [vmem:[#allocation8 + $0xd0] sm:$0xff]  ;;  %v1006_v46 = vld [vmem:[#allocation8 + $0xb8] sm:$0xff] }
  0x79   : > { %899 = vmatpush.msrb.mxu1 %v658_v23  ;;  %1020 = vmatpush.msrb.mxu2 %v997_v49  ;;  %v992_v23 = vld [vmem:[#allocation8 + $0x48] sm:$0xff] }
  0x7a   : > { %835 = vmatpush.msrb.mxu0 %v624_v31  ;;  %1085 = vmatpush.msrb.mxu3 %v1013_v51  ;;  %v991_v31 = vld [vmem:[#allocation8 + $0x40] sm:$0xff] }
  0x7b   : > { %900 = vmatpush.msrb.mxu1 %v656_v34  ;;  %1021 = vmatpush.msrb.mxu2 %v996_v55 }
  0x7c   : > { %836 = vmatpush.msrb.mxu0 %v622_v42  ;;  %1086 = vmatpush.msrb.mxu3 %v1012_v60 }
  0x7d   : > { %487 = vmatmul.f32.gmra.mxu0 %v409_v50  ;;  %901 = vmatpush.msrb.mxu1 %v654_v44 }
  0x7e   : > { %552 = vmatmul.f32.gmra.mxu1 %v409_v50  ;;  %v420_v50 = vld [vmem:[%s2218_s21 + $0x78] sm:$0xff]  ;;  %1022 = vmatpush.msrb.mxu2 %v995_v63 }
  0x7f   : > { %1087 = vmatpush.msrb.mxu3 %v1011_v4 }
  0x80   : > { %1023 = vmatpush.msrb.mxu2 %v994_v7 }
  0x81   : > { %1088 = vmatpush.msrb.mxu3 %v1010_v12 }
  0x82   : > { %1024 = vmatpush.msrb.mxu2 %v993_v15 }
  0x83   : > { %1089 = vmatpush.msrb.mxu3 %v1009_v20 }
  0x84   : > { %1025 = vmatpush.msrb.mxu2 %v992_v23 }
  0x85   : > { %490 = vmatmul.f32.gmra.mxu0 %v410_v53  ;;  %1090 = vmatpush.msrb.mxu3 %v1008_v30 }
  0x86   : > { %555 = vmatmul.f32.gmra.mxu1 %v410_v53  ;;  %v2251_v53 = vperm.slane %v453_v52, 0  ;;  %1026 = vmatpush.msrb.mxu2 %v991_v31 }
  0x87   : > { %1091 = vmatpush.msrb.mxu3 %v1007_v38 }
  0x88   : > { %1027 = vmatpush.msrb.mxu2 %v990_v39 }
  0x89   : > { %1092 = vmatpush.msrb.mxu3 %v1006_v46 }
  0x8d   : > { %493 = vmatmul.f32.gmra.mxu0 %v411_v56 }
  0x8e   : > { %558 = vmatmul.f32.gmra.mxu1 %v411_v56 }
  0x95   : > { %496 = vmatmul.f32.gmra.mxu0 %v412_v59 }
  0x96   : > { %561 = vmatmul.f32.gmra.mxu1 %v412_v59 }
  0x9d   : > { %499 = vmatmul.f32.gmra.mxu0 %v413_v62 }
  0x9e   : > { %564 = vmatmul.f32.gmra.mxu1 %v413_v62 }
  0xa5   : > { %502 = vmatmul.f32.gmra.mxu0 %v414_v6 }
  0xa6   : > { %567 = vmatmul.f32.gmra.mxu1 %v414_v6 }
  0xad   : > { %505 = vmatmul.f32.gmra.mxu0 %v415_v17 }
  0xae   : > { %570 = vmatmul.f32.gmra.mxu1 %v415_v17 }
  0xb5   : > { %508 = vmatmul.f32.gmra.mxu0 %v416_v28 }
  0xb6   : > { %573 = vmatmul.f32.gmra.mxu1 %v416_v28 }
  0xbd   : > { %511 = vmatmul.f32.gmra.mxu0 %v417_v37 }
  0xbe   : > { %576 = vmatmul.f32.gmra.mxu1 %v417_v37 }
  0xc5   : > { %514 = vmatmul.f32.gmra.mxu0 %v418_v45 }
  0xc6   : > { %579 = vmatmul.f32.gmra.mxu1 %v418_v45 }
  0xcd   : > { %517 = vmatmul.f32.gmra.mxu0 %v419_v47 }
  0xce   : > { %582 = vmatmul.f32.gmra.mxu1 %v419_v47  ;;  %v989_v47 = vld [vmem:[#allocation8 + $0x30] sm:$0xff] }
  0xcf   : > { %1028 = vmatpush.msrb.mxu2 %v989_v47 }
  0xd5   : > { %520 = vmatmul.f32.gmra.mxu0 %v420_v50 }
  0xd6   : > { %585 = vmatmul.f32.gmra.mxu1 %v420_v50 }
  0xda   : > { %v476_v56 = vpop.f32.mrf.mxu0 }
  0xdb   : > { %v541_v57 = vpop.f32.mrf.mxu1  ;;  %v477_v58 = vadd.f32 %v476_v56, %v2251_v53  ;;  %v1005_v56 = vld [vmem:[#allocation8 + $0xb0] sm:$0xff] }
  0xdc   : > { %v542_v59 = vadd.f32 %v541_v57, %v2253_v54  ;;  %1093 = vmatpush.msrb.mxu3 %v1005_v56  ;;  %v988_v57 = vld [vmem:[#allocation8 + $0x28] sm:$0xff] }
  0xdd   : > { %v589_v61 = vmax.f32 %v477_v58, 0.0  ;;  %1029 = vmatpush.msrb.mxu2 %v988_v57 }
  0xde   : > { %v590_v62 = vmax.f32 %v542_v59, 0.0 }
  0xdf   : > { %707 = vmatmul.f32.vlgmr.msra.gmra.mxu2 %v589_v61  ;;  %837 = vmatmul.f32.vlgmr.msrb.gmra.mxu0 %v589_v61 }
  0xe0   : > { %772 = vmatmul.f32.vlgmr.msra.gmra.mxu3 %v590_v62  ;;  %902 = vmatmul.f32.vlgmr.msrb.gmra.mxu1 %v590_v62 }
  0xe2   : > { %v479_v0 = vpop.f32.mrf.mxu0 }
  0xe3   : > { %v544_v1 = vpop.f32.mrf.mxu1  ;;  %v480_v2 = vadd.f32 %v479_v0, %v2251_v53  ;;  %v1004_v0 = vld [vmem:[#allocation8 + $0xa8] sm:$0xff] }
  0xe4   : > { %v545_v3 = vadd.f32 %v544_v1, %v2253_v54  ;;  %1094 = vmatpush.msrb.mxu3 %v1004_v0  ;;  %v987_v1 = vld [vmem:[#allocation8 + $0x20] sm:$0xff] }
  0xe5   : > { %v591_v5 = vmax.f32 %v480_v2, 0.0  ;;  %1030 = vmatpush.msrb.mxu2 %v987_v1 }
  0xe6   : > { %v592_v6 = vmax.f32 %v545_v3, 0.0 }
  0xe7   : > { %710 = vmatmul.f32.gmra.mxu2 %v591_v5  ;;  %840 = vmatmul.f32.gmra.mxu0 %v591_v5 }
  0xe8   : > { %775 = vmatmul.f32.gmra.mxu3 %v592_v6  ;;  %905 = vmatmul.f32.gmra.mxu1 %v592_v6 }
  0xea   : > { %v482_v8 = vpop.f32.mrf.mxu0 }
  0xeb   : > { %v547_v9 = vpop.f32.mrf.mxu1  ;;  %v483_v10 = vadd.f32 %v482_v8, %v2251_v53  ;;  %v1003_v8 = vld [vmem:[#allocation8 + $0xa0] sm:$0xff] }
  0xec   : > { %v548_v11 = vadd.f32 %v547_v9, %v2253_v54  ;;  %1095 = vmatpush.msrb.mxu3 %v1003_v8  ;;  %v986_v9 = vld [vmem:[#allocation8 + $0x18] sm:$0xff] }
  0xed   : > { %v593_v13 = vmax.f32 %v483_v10, 0.0  ;;  %1031 = vmatpush.msrb.mxu2 %v986_v9 }
  0xee   : > { %v594_v14 = vmax.f32 %v548_v11, 0.0 }
  0xef   : > { %713 = vmatmul.f32.gmra.mxu2 %v593_v13  ;;  %843 = vmatmul.f32.gmra.mxu0 %v593_v13 }
  0xf0   : > { %778 = vmatmul.f32.gmra.mxu3 %v594_v14  ;;  %908 = vmatmul.f32.gmra.mxu1 %v594_v14 }
  0xf2   : > { %v485_v16 = vpop.f32.mrf.mxu0 }
  0xf3   : > { %v550_v17 = vpop.f32.mrf.mxu1  ;;  %v486_v18 = vadd.f32 %v485_v16, %v2251_v53  ;;  %v1002_v16 = vld [vmem:[#allocation8 + $0x98] sm:$0xff] }
  0xf4   : > { %v551_v19 = vadd.f32 %v550_v17, %v2253_v54  ;;  %1096 = vmatpush.msrb.mxu3 %v1002_v16  ;;  %v985_v17 = vld [vmem:[#allocation8 + $0x10] sm:$0xff] }
  0xf5   : > { %v595_v21 = vmax.f32 %v486_v18, 0.0  ;;  %1032 = vmatpush.msrb.mxu2 %v985_v17 }
  0xf6   : > { %v596_v22 = vmax.f32 %v551_v19, 0.0 }
  0xf7   : > { %716 = vmatmul.f32.gmra.mxu2 %v595_v21  ;;  %846 = vmatmul.f32.gmra.mxu0 %v595_v21 }
  0xf8   : > { %781 = vmatmul.f32.gmra.mxu3 %v596_v22  ;;  %911 = vmatmul.f32.gmra.mxu1 %v596_v22 }
  0xfa   : > { %v488_v24 = vpop.f32.mrf.mxu0 }
  0xfb   : > { %v553_v25 = vpop.f32.mrf.mxu1  ;;  %v489_v26 = vadd.f32 %v488_v24, %v2251_v53  ;;  %v1001_v24 = vld [vmem:[#allocation8 + $0x90] sm:$0xff] }
  0xfc   : > { %v554_v27 = vadd.f32 %v553_v25, %v2253_v54  ;;  %1097 = vmatpush.msrb.mxu3 %v1001_v24  ;;  %v984_v25 = vld [vmem:[#allocation8 + $0x8] sm:$0xff] }
  0xfd   : > { %v597_v28 = vmax.f32 %v489_v26, 0.0  ;;  %v1000_v26 = vld [vmem:[#allocation8 + $0x88] sm:$0xff]  ;;  %1033 = vmatpush.msrb.mxu2 %v984_v25 }
  0xfe   : > { %v598_v29 = vmax.f32 %v554_v27, 0.0  ;;  %1098 = vmatpush.msrb.mxu3 %v1000_v26 }
  0xff   : > { %719 = vmatmul.f32.gmra.mxu2 %v597_v28  ;;  %849 = vmatmul.f32.gmra.mxu0 %v597_v28 }
 0x100   : > { %784 = vmatmul.f32.gmra.mxu3 %v598_v29  ;;  %914 = vmatmul.f32.gmra.mxu1 %v598_v29 }
 0x102   : > { %v491_v32 = vpop.f32.mrf.mxu0 }
 0x103   : > { %v556_v33 = vpop.f32.mrf.mxu1  ;;  %v492_v34 = vadd.f32 %v491_v32, %v2251_v53 }
 0x104   : > { %v557_v35 = vadd.f32 %v556_v33, %v2253_v54  ;;  %v983_v33 = vld [vmem:[#allocation8] sm:$0xff] }
 0x105   : > { %v599_v36 = vmax.f32 %v492_v34, 0.0  ;;  %v999_v34 = vld [vmem:[#allocation8 + $0x80] sm:$0xff]  ;;  %1034 = vmatpush.msrb.mxu2 %v983_v33 }
 0x106   : > { %v600_v37 = vmax.f32 %v557_v35, 0.0  ;;  %1099 = vmatpush.msrb.mxu3 %v999_v34 }
 0x107   : > { %722 = vmatmul.f32.gmra.mxu2 %v599_v36  ;;  %852 = vmatmul.f32.gmra.mxu0 %v599_v36 }
 0x108   : > { %787 = vmatmul.f32.gmra.mxu3 %v600_v37  ;;  %917 = vmatmul.f32.gmra.mxu1 %v600_v37 }
 0x10a   : > { %v494_v40 = vpop.f32.mrf.mxu0 }
 0x10b   : > { %v559_v41 = vpop.f32.mrf.mxu1  ;;  %v495_v42 = vadd.f32 %v494_v40, %v2251_v53 }
 0x10c   : > { %v560_v43 = vadd.f32 %v559_v41, %v2253_v54 }
 0x10d   : > { %v601_v44 = vmax.f32 %v495_v42, 0.0 }
 0x10e   : > { %v602_v45 = vmax.f32 %v560_v43, 0.0 }
 0x10f   : > { %725 = vmatmul.f32.gmra.mxu2 %v601_v44  ;;  %855 = vmatmul.f32.gmra.mxu0 %v601_v44 }
 0x110   : > { %790 = vmatmul.f32.gmra.mxu3 %v602_v45  ;;  %920 = vmatmul.f32.gmra.mxu1 %v602_v45 }
 0x112   : > { %v497_v48 = vpop.f32.mrf.mxu0 }
 0x113   : > { %v562_v49 = vpop.f32.mrf.mxu1  ;;  %v498_v50 = vadd.f32 %v497_v48, %v2251_v53 }
 0x114   : > { %v563_v51 = vadd.f32 %v562_v49, %v2253_v54 }
 0x115   : > { %v603_v52 = vmax.f32 %v498_v50, 0.0 }
 0x116   : > { %v604_v55 = vmax.f32 %v563_v51, 0.0 }
 0x117   : > { %728 = vmatmul.f32.gmra.mxu2 %v603_v52  ;;  %858 = vmatmul.f32.gmra.mxu0 %v603_v52 }
 0x118   : > { %793 = vmatmul.f32.gmra.mxu3 %v604_v55  ;;  %923 = vmatmul.f32.gmra.mxu1 %v604_v55  ;;  %v685_v55 = vld [vmem:[%s2641_s4] sm:$0x3] }
 0x119   : > { %v2290_v56 = vperm.slane %v685_v55, 1 }
 0x11a   : > { %v500_v58 = vpop.f32.mrf.mxu0 }
 0x11b   : > { %v565_v59 = vpop.f32.mrf.mxu1  ;;  %v501_v60 = vadd.f32 %v500_v58, %v2251_v53 }
 0x11c   : > { %v566_v61 = vadd.f32 %v565_v59, %v2253_v54 }
 0x11d   : > { %v605_v62 = vmax.f32 %v501_v60, 0.0 }
 0x11e   : > { %v606_v63 = vmax.f32 %v566_v61, 0.0 }
 0x11f   : > { %731 = vmatmul.f32.gmra.mxu2 %v605_v62  ;;  %861 = vmatmul.f32.gmra.mxu0 %v605_v62 }
 0x120   : > { %796 = vmatmul.f32.gmra.mxu3 %v606_v63  ;;  %926 = vmatmul.f32.gmra.mxu1 %v606_v63 }
 0x122   : > { %v503_v2 = vpop.f32.mrf.mxu0 }
 0x123   : > { %v568_v3 = vpop.f32.mrf.mxu1  ;;  %v504_v4 = vadd.f32 %v503_v2, %v2251_v53 }
 0x124   : > { %v569_v5 = vadd.f32 %v568_v3, %v2253_v54 }
 0x125   : > { %v607_v6 = vmax.f32 %v504_v4, 0.0 }
 0x126   : > { %v608_v7 = vmax.f32 %v569_v5, 0.0 }
 0x127   : > { %734 = vmatmul.f32.gmra.mxu2 %v607_v6  ;;  %864 = vmatmul.f32.gmra.mxu0 %v607_v6 }
 0x128   : > { %799 = vmatmul.f32.gmra.mxu3 %v608_v7  ;;  %929 = vmatmul.f32.gmra.mxu1 %v608_v7 }
 0x12a   : > { %v506_v10 = vpop.f32.mrf.mxu0 }
 0x12b   : > { %v571_v11 = vpop.f32.mrf.mxu1  ;;  %v507_v12 = vadd.f32 %v506_v10, %v2251_v53 }
 0x12c   : > { %v572_v13 = vadd.f32 %v571_v11, %v2253_v54 }
 0x12d   : > { %v609_v14 = vmax.f32 %v507_v12, 0.0 }
 0x12e   : > { %v610_v15 = vmax.f32 %v572_v13, 0.0 }
 0x12f   : > { %737 = vmatmul.f32.gmra.mxu2 %v609_v14  ;;  %867 = vmatmul.f32.gmra.mxu0 %v609_v14 }
 0x130   : > { %802 = vmatmul.f32.gmra.mxu3 %v610_v15  ;;  %932 = vmatmul.f32.gmra.mxu1 %v610_v15 }
 0x132   : > { %v509_v18 = vpop.f32.mrf.mxu0 }
 0x133   : > { %v574_v19 = vpop.f32.mrf.mxu1  ;;  %v510_v20 = vadd.f32 %v509_v18, %v2251_v53 }
 0x134   : > { %v575_v21 = vadd.f32 %v574_v19, %v2253_v54 }
 0x135   : > { %v611_v22 = vmax.f32 %v510_v20, 0.0 }
 0x136   : > { %v612_v23 = vmax.f32 %v575_v21, 0.0 }
 0x137   : > { %740 = vmatmul.f32.gmra.mxu2 %v611_v22  ;;  %870 = vmatmul.f32.gmra.mxu0 %v611_v22 }
 0x138   : > { %805 = vmatmul.f32.gmra.mxu3 %v612_v23  ;;  %935 = vmatmul.f32.gmra.mxu1 %v612_v23 }
 0x13a   : > { %v512_v27 = vpop.f32.mrf.mxu0 }
 0x13b   : > { %v577_v28 = vpop.f32.mrf.mxu1  ;;  %v513_v29 = vadd.f32 %v512_v27, %v2251_v53 }
 0x13c   : > { %v578_v30 = vadd.f32 %v577_v28, %v2253_v54 }
 0x13d   : > { %v613_v31 = vmax.f32 %v513_v29, 0.0 }
 0x13e   : > { %v614_v32 = vmax.f32 %v578_v30, 0.0 }
 0x13f   : > { %743 = vmatmul.f32.gmra.mxu2 %v613_v31  ;;  %873 = vmatmul.f32.gmra.mxu0 %v613_v31 }
 0x140   : > { %808 = vmatmul.f32.gmra.mxu3 %v614_v32  ;;  %938 = vmatmul.f32.gmra.mxu1 %v614_v32 }
 0x142   : > { %v515_v35 = vpop.f32.mrf.mxu0 }
 0x143   : > { %v580_v36 = vpop.f32.mrf.mxu1  ;;  %v516_v37 = vadd.f32 %v515_v35, %v2251_v53 }
 0x144   : > { %v581_v38 = vadd.f32 %v580_v36, %v2253_v54 }
 0x145   : > { %v615_v39 = vmax.f32 %v516_v37, 0.0 }
 0x146   : > { %v616_v40 = vmax.f32 %v581_v38, 0.0 }
 0x147   : > { %746 = vmatmul.f32.gmra.mxu2 %v615_v39  ;;  %876 = vmatmul.f32.gmra.mxu0 %v615_v39 }
 0x148   : > { %811 = vmatmul.f32.gmra.mxu3 %v616_v40  ;;  %941 = vmatmul.f32.gmra.mxu1 %v616_v40 }
 0x14a   : > { %v518_v41 = vpop.f32.mrf.mxu0 }
 0x14b   : > { %v583_v42 = vpop.f32.mrf.mxu1  ;;  %v519_v43 = vadd.f32 %v518_v41, %v2251_v53 }
 0x14c   : > { %v584_v44 = vadd.f32 %v583_v42, %v2253_v54 }
 0x14d   : > { %v617_v45 = vmax.f32 %v519_v43, 0.0 }
 0x14e   : > { %v618_v46 = vmax.f32 %v584_v44, 0.0 }
 0x14f   : > { %749 = vmatmul.f32.gmra.mxu2 %v617_v45  ;;  %879 = vmatmul.f32.gmra.mxu0 %v617_v45 }
 0x150   : > { %814 = vmatmul.f32.gmra.mxu3 %v618_v46  ;;  %944 = vmatmul.f32.gmra.mxu1 %v618_v46 }
 0x152   : > { %v521_v47 = vpop.f32.mrf.mxu0 }
 0x153   : > { %v586_v48 = vpop.f32.mrf.mxu1  ;;  %v522_v49 = vadd.f32 %v521_v47, %v2251_v53  ;;  %v2293_v53 = vperm.slane %v685_v55, 0 }
 0x154   : > { %v587_v50 = vadd.f32 %v586_v48, %v2253_v54 }
 0x155   : > { %v619_v51 = vmax.f32 %v522_v49, 0.0 }
 0x156   : > { %v620_v52 = vmax.f32 %v587_v50, 0.0 }
 0x157   : > { %752 = vmatmul.f32.gmra.mxu2 %v619_v51  ;;  %882 = vmatmul.f32.gmra.mxu0 %v619_v51 }
 0x158   : > { %817 = vmatmul.f32.gmra.mxu3 %v620_v52  ;;  %947 = vmatmul.f32.gmra.mxu1 %v620_v52 }
 0x15c   : > { %v838_v57 = vpop.f32.mrf.mxu0 }
 0x15d   : > { %v839_v58 = vadd.f32 %v838_v57, %v2290_v56  ;;  %v903_v59 = vpop.f32.mrf.mxu1 }
 0x15f   : > { %v904_v60 = vadd.f32 %v903_v59, %v839_v58 }
 0x161   : > { %v952_v54 = vmax.f32 %v904_v60, 0.0 }
 0x162   : > { %v708_v61 = vpop.f32.mrf.mxu2 }
 0x163   : > { %v709_v62 = vadd.f32 %v708_v61, %v2293_v53  ;;  %1100 = vmatmul.f32.vlgmr.msrb.gmra.mxu3 %v952_v54  ;;  %v773_v63 = vpop.f32.mrf.mxu3 }
 0x164   : > { %v841_v0 = vpop.f32.mrf.mxu0 }
 0x165   : > { %v774_v1 = vadd.f32 %v773_v63, %v709_v62  ;;  %v842_v2 = vadd.f32 %v841_v0, %v2290_v56  ;;  %v906_v3 = vpop.f32.mrf.mxu1 }
 0x167   : > { %v951_v4 = vmax.f32 %v774_v1, 0.0  ;;  %v907_v5 = vadd.f32 %v906_v3, %v842_v2 }
 0x169   : > { %v954_v6 = vmax.f32 %v907_v5, 0.0  ;;  %1035 = vmatmul.f32.vlgmr.msrb.gmra.mxu2 %v951_v4 }
 0x16a   : > { %v711_v7 = vpop.f32.mrf.mxu2 }
 0x16b   : > { %v712_v8 = vadd.f32 %v711_v7, %v2293_v53  ;;  %1103 = vmatmul.f32.gmra.mxu3 %v954_v6  ;;  %v776_v9 = vpop.f32.mrf.mxu3 }
 0x16c   : > { %v844_v10 = vpop.f32.mrf.mxu0 }
 0x16d   : > { %v777_v11 = vadd.f32 %v776_v9, %v712_v8  ;;  %v845_v12 = vadd.f32 %v844_v10, %v2290_v56  ;;  %v909_v13 = vpop.f32.mrf.mxu1 }
 0x16f   : > { %v910_v14 = vadd.f32 %v909_v13, %v845_v12  ;;  %v953_v15 = vmax.f32 %v777_v11, 0.0 }
 0x171   : > { %v956_v16 = vmax.f32 %v910_v14, 0.0  ;;  %1038 = vmatmul.f32.gmra.mxu2 %v953_v15 }
 0x172   : > { %v714_v17 = vpop.f32.mrf.mxu2 }
 0x173   : > { %v715_v18 = vadd.f32 %v714_v17, %v2293_v53  ;;  %1106 = vmatmul.f32.gmra.mxu3 %v956_v16  ;;  %v779_v19 = vpop.f32.mrf.mxu3 }
 0x174   : > { %v847_v20 = vpop.f32.mrf.mxu0 }
 0x175   : > { %v780_v21 = vadd.f32 %v779_v19, %v715_v18  ;;  %v848_v22 = vadd.f32 %v847_v20, %v2290_v56  ;;  %v912_v23 = vpop.f32.mrf.mxu1 }
 0x177   : > { %v913_v24 = vadd.f32 %v912_v23, %v848_v22  ;;  %v955_v25 = vmax.f32 %v780_v21, 0.0 }
 0x179   : > { %v958_v26 = vmax.f32 %v913_v24, 0.0  ;;  %1041 = vmatmul.f32.gmra.mxu2 %v955_v25 }
 0x17a   : > { %v717_v27 = vpop.f32.mrf.mxu2 }
 0x17b   : > { %v718_v28 = vadd.f32 %v717_v27, %v2293_v53  ;;  %1109 = vmatmul.f32.gmra.mxu3 %v958_v26  ;;  %v782_v29 = vpop.f32.mrf.mxu3 }
 0x17c   : > { %v850_v30 = vpop.f32.mrf.mxu0 }
 0x17d   : > { %v783_v31 = vadd.f32 %v782_v29, %v718_v28  ;;  %v851_v32 = vadd.f32 %v850_v30, %v2290_v56  ;;  %v915_v33 = vpop.f32.mrf.mxu1 }
 0x17f   : > { %v916_v34 = vadd.f32 %v915_v33, %v851_v32  ;;  %v957_v35 = vmax.f32 %v783_v31, 0.0 }
 0x181   : > { %v960_v36 = vmax.f32 %v916_v34, 0.0  ;;  %1044 = vmatmul.f32.gmra.mxu2 %v957_v35 }
 0x182   : > { %v720_v37 = vpop.f32.mrf.mxu2 }
 0x183   : > { %v721_v38 = vadd.f32 %v720_v37, %v2293_v53  ;;  %1112 = vmatmul.f32.gmra.mxu3 %v960_v36  ;;  %v785_v39 = vpop.f32.mrf.mxu3 }
 0x184   : > { %v853_v40 = vpop.f32.mrf.mxu0 }
 0x185   : > { %v786_v41 = vadd.f32 %v785_v39, %v721_v38  ;;  %v854_v42 = vadd.f32 %v853_v40, %v2290_v56  ;;  %v918_v43 = vpop.f32.mrf.mxu1 }
 0x187   : > { %v919_v44 = vadd.f32 %v918_v43, %v854_v42  ;;  %v959_v45 = vmax.f32 %v786_v41, 0.0 }
 0x189   : > { %v962_v46 = vmax.f32 %v919_v44, 0.0  ;;  %1047 = vmatmul.f32.gmra.mxu2 %v959_v45 }
 0x18a   : > { %v723_v47 = vpop.f32.mrf.mxu2 }
 0x18b   : > { %v724_v48 = vadd.f32 %v723_v47, %v2293_v53  ;;  %1115 = vmatmul.f32.gmra.mxu3 %v962_v46  ;;  %v788_v49 = vpop.f32.mrf.mxu3 }
 0x18c   : > { %v856_v50 = vpop.f32.mrf.mxu0 }
 0x18d   : > { %v789_v51 = vadd.f32 %v788_v49, %v724_v48  ;;  %v857_v52 = vadd.f32 %v856_v50, %v2290_v56  ;;  %v921_v55 = vpop.f32.mrf.mxu1 }
 0x18f   : > { %v922_v57 = vadd.f32 %v921_v55, %v857_v52  ;;  %v961_v58 = vmax.f32 %v789_v51, 0.0 }
 0x191   : > { %v964_v59 = vmax.f32 %v922_v57, 0.0  ;;  %1050 = vmatmul.f32.gmra.mxu2 %v961_v58 }
 0x192   : > { %v726_v60 = vpop.f32.mrf.mxu2 }
 0x193   : > { %v727_v54 = vadd.f32 %v726_v60, %v2293_v53  ;;  %1118 = vmatmul.f32.gmra.mxu3 %v964_v59  ;;  %v791_v61 = vpop.f32.mrf.mxu3 }
 0x194   : > { %v859_v62 = vpop.f32.mrf.mxu0 }
 0x195   : > { %v792_v63 = vadd.f32 %v791_v61, %v727_v54  ;;  %v860_v0 = vadd.f32 %v859_v62, %v2290_v56  ;;  %v924_v1 = vpop.f32.mrf.mxu1 }
 0x197   : > { %v925_v2 = vadd.f32 %v924_v1, %v860_v0  ;;  %v963_v3 = vmax.f32 %v792_v63, 0.0 }
 0x199   : > { %v966_v4 = vmax.f32 %v925_v2, 0.0  ;;  %1053 = vmatmul.f32.gmra.mxu2 %v963_v3 }
 0x19a   : > { %v729_v5 = vpop.f32.mrf.mxu2 }
 0x19b   : > { %v730_v6 = vadd.f32 %v729_v5, %v2293_v53  ;;  %1121 = vmatmul.f32.gmra.mxu3 %v966_v4  ;;  %v794_v7 = vpop.f32.mrf.mxu3 }
 0x19c   : > { %v862_v8 = vpop.f32.mrf.mxu0 }
 0x19d   : > { %v795_v9 = vadd.f32 %v794_v7, %v730_v6  ;;  %v863_v10 = vadd.f32 %v862_v8, %v2290_v56  ;;  %v927_v11 = vpop.f32.mrf.mxu1 }
 0x19f   : > { %v928_v12 = vadd.f32 %v927_v11, %v863_v10  ;;  %v965_v13 = vmax.f32 %v795_v9, 0.0 }
 0x1a1   : > { %v968_v14 = vmax.f32 %v928_v12, 0.0  ;;  %1056 = vmatmul.f32.gmra.mxu2 %v965_v13 }
 0x1a2   : > { %v732_v15 = vpop.f32.mrf.mxu2 }
 0x1a3   : > { %v733_v16 = vadd.f32 %v732_v15, %v2293_v53  ;;  %1124 = vmatmul.f32.gmra.mxu3 %v968_v14  ;;  %v797_v17 = vpop.f32.mrf.mxu3 }
 0x1a4   : > { %v865_v18 = vpop.f32.mrf.mxu0 }
 0x1a5   : > { %v798_v19 = vadd.f32 %v797_v17, %v733_v16  ;;  %v866_v20 = vadd.f32 %v865_v18, %v2290_v56  ;;  %v930_v21 = vpop.f32.mrf.mxu1 }
 0x1a7   : > { %v967_v22 = vmax.f32 %v798_v19, 0.0  ;;  %v931_v23 = vadd.f32 %v930_v21, %v866_v20 }
 0x1a9   : > { %v970_v24 = vmax.f32 %v931_v23, 0.0  ;;  %1059 = vmatmul.f32.gmra.mxu2 %v967_v22 }
 0x1aa   : > { %v735_v25 = vpop.f32.mrf.mxu2 }
 0x1ab   : > { %v736_v26 = vadd.f32 %v735_v25, %v2293_v53  ;;  %1127 = vmatmul.f32.gmra.mxu3 %v970_v24  ;;  %v800_v27 = vpop.f32.mrf.mxu3 }
 0x1ac   : > { %v868_v28 = vpop.f32.mrf.mxu0 }
 0x1ad   : > { %v801_v29 = vadd.f32 %v800_v27, %v736_v26  ;;  %v869_v30 = vadd.f32 %v868_v28, %v2290_v56  ;;  %v933_v31 = vpop.f32.mrf.mxu1 }
 0x1af   : > { %v969_v32 = vmax.f32 %v801_v29, 0.0  ;;  %v934_v33 = vadd.f32 %v933_v31, %v869_v30 }
 0x1b1   : > { %v972_v34 = vmax.f32 %v934_v33, 0.0  ;;  %1062 = vmatmul.f32.gmra.mxu2 %v969_v32 }
 0x1b2   : > { %v738_v35 = vpop.f32.mrf.mxu2 }
 0x1b3   : > { %v739_v36 = vadd.f32 %v738_v35, %v2293_v53  ;;  %1130 = vmatmul.f32.gmra.mxu3 %v972_v34  ;;  %v803_v37 = vpop.f32.mrf.mxu3  ;;  %v1825_v34 = vld [vmem:[%s2218_s21] sm:$0xff] }
 0x1b4   : > { %v871_v38 = vpop.f32.mrf.mxu0 }
 0x1b5   : > { %v804_v39 = vadd.f32 %v803_v37, %v739_v36  ;;  %v872_v40 = vadd.f32 %v871_v38, %v2290_v56  ;;  %v936_v41 = vpop.f32.mrf.mxu1 }
 0x1b7   : > { %v971_v42 = vmax.f32 %v804_v39, 0.0  ;;  %v937_v43 = vadd.f32 %v936_v41, %v872_v40  ;;  %v1826_v40 = vld [vmem:[%s2218_s21 + $0x8] sm:$0xff] }
 0x1b9   : > { %v974_v44 = vmax.f32 %v937_v43, 0.0  ;;  %1065 = vmatmul.f32.gmra.mxu2 %v971_v42 }
 0x1ba   : > { %v741_v45 = vpop.f32.mrf.mxu2 }
 0x1bb   : > { %v742_v46 = vadd.f32 %v741_v45, %v2293_v53  ;;  %1133 = vmatmul.f32.gmra.mxu3 %v974_v44  ;;  %v806_v47 = vpop.f32.mrf.mxu3 }
 0x1bc   : > { %v874_v48 = vpop.f32.mrf.mxu0 }
 0x1bd   : > { %v807_v49 = vadd.f32 %v806_v47, %v742_v46  ;;  %v875_v50 = vadd.f32 %v874_v48, %v2290_v56  ;;  %v939_v51 = vpop.f32.mrf.mxu1  ;;  %v1827_v47 = vld [vmem:[%s2218_s21 + $0x10] sm:$0xff] }
 0x1bf   : > { %v973_v52 = vmax.f32 %v807_v49, 0.0  ;;  %v940_v55 = vadd.f32 %v939_v51, %v875_v50 }
 0x1c1   : > { %v976_v57 = vmax.f32 %v940_v55, 0.0  ;;  %1068 = vmatmul.f32.gmra.mxu2 %v973_v52 }
 0x1c2   : > { %v744_v58 = vpop.f32.mrf.mxu2 }
 0x1c3   : > { %v745_v59 = vadd.f32 %v744_v58, %v2293_v53  ;;  %1136 = vmatmul.f32.gmra.mxu3 %v976_v57  ;;  %v809_v60 = vpop.f32.mrf.mxu3  ;;  %v1828_v57 = vld [vmem:[%s2218_s21 + $0x18] sm:$0xff] }
 0x1c4   : > { %v877_v54 = vpop.f32.mrf.mxu0 }
 0x1c5   : > { %v810_v61 = vadd.f32 %v809_v60, %v745_v59  ;;  %v878_v62 = vadd.f32 %v877_v54, %v2290_v56  ;;  %v942_v63 = vpop.f32.mrf.mxu1 }
 0x1c7   : > { %v975_v0 = vmax.f32 %v810_v61, 0.0  ;;  %v943_v1 = vadd.f32 %v942_v63, %v878_v62  ;;  %v1829_v63 = vld [vmem:[%s2218_s21 + $0x20] sm:$0xff] }
 0x1c9   : > { %v978_v2 = vmax.f32 %v943_v1, 0.0  ;;  %1071 = vmatmul.f32.gmra.mxu2 %v975_v0 }
 0x1ca   : > { %v747_v3 = vpop.f32.mrf.mxu2 }
 0x1cb   : > { %v748_v4 = vadd.f32 %v747_v3, %v2293_v53  ;;  %1139 = vmatmul.f32.gmra.mxu3 %v978_v2  ;;  %v812_v5 = vpop.f32.mrf.mxu3 }
 0x1cc   : > { %v880_v6 = vpop.f32.mrf.mxu0 }
 0x1cd   : > { %v813_v7 = vadd.f32 %v812_v5, %v748_v4  ;;  %v881_v8 = vadd.f32 %v880_v6, %v2290_v56  ;;  %v945_v9 = vpop.f32.mrf.mxu1  ;;  %v1830_v6 = vld [vmem:[%s2218_s21 + $0x28] sm:$0xff] }
 0x1cf   : > { %v977_v10 = vmax.f32 %v813_v7, 0.0  ;;  %v946_v11 = vadd.f32 %v945_v9, %v881_v8 }
 0x1d1   : > { %v980_v12 = vmax.f32 %v946_v11, 0.0  ;;  %1074 = vmatmul.f32.gmra.mxu2 %v977_v10 }
 0x1d2   : > { %v750_v13 = vpop.f32.mrf.mxu2 }
 0x1d3   : > { %v751_v14 = vadd.f32 %v750_v13, %v2293_v53  ;;  %1142 = vmatmul.f32.gmra.mxu3 %v980_v12  ;;  %v815_v15 = vpop.f32.mrf.mxu3  ;;  %v1831_v13 = vld [vmem:[%s2218_s21 + $0x30] sm:$0xff] }
 0x1d4   : > { %v883_v16 = vpop.f32.mrf.mxu0 }
 0x1d5   : > { %v816_v17 = vadd.f32 %v815_v15, %v751_v14  ;;  %v884_v18 = vadd.f32 %v883_v16, %v2290_v56  ;;  %v948_v19 = vpop.f32.mrf.mxu1  ;;  %v2329_v56 = vld [vmem:[%s2643_s6] ss:$0 sm:$0xff] }
 0x1d7   : > { %v979_v20 = vmax.f32 %v816_v17, 0.0  ;;  %v949_v21 = vadd.f32 %v948_v19, %v884_v18 }
 0x1d9   : > { %v982_v22 = vmax.f32 %v949_v21, 0.0  ;;  %1077 = vmatmul.f32.gmra.mxu2 %v979_v20  ;;  %v1832_v20 = vld [vmem:[%s2218_s21 + $0x38] sm:$0xff] }
 0x1da   : > { %v753_v23 = vpop.f32.mrf.mxu2 }
 0x1db   : > { %v754_v24 = vadd.f32 %v753_v23, %v2293_v53  ;;  %1145 = vmatmul.f32.gmra.mxu3 %v982_v22  ;;  %v818_v25 = vpop.f32.mrf.mxu3 }
 0x1dd   : > { %v819_v26 = vadd.f32 %v818_v25, %v754_v24 }
 0x1df   : > { %v981_v27 = vmax.f32 %v819_v26, 0.0 }
 0x1e1   : > { %1080 = vmatmul.f32.gmra.mxu2 %v981_v27  ;;  %v1833_v27 = vld [vmem:[%s2218_s21 + $0x40] sm:$0xff] }
 0x1e6   : > { %v1101_v28 = vpop.f32.mrf.mxu3 }
 0x1ec   : > { %v1036_v29 = vpop.f32.mrf.mxu2 }
 0x1ed   : > { %v1037_v30 = vadd.f32 %v2329_v56, %v1036_v29 }
 0x1ee   : > { %v1104_v31 = vpop.f32.mrf.mxu3 }
 0x1ef   : > { %v1102_v32 = vadd.f32 %v1101_v28, %v1037_v30 }
 0x1f1   : > { %v1149_v33 = vmax.f32 %v1102_v32, 0.0 }
 0x1f3   : > { %v2333_v53 = vadd.f32 %v1825_v34, %v1149_v33  ;;  %v1834_v34 = vld [vmem:[%s2218_s21 + $0x48] sm:$0xff] }
 0x1f4   : > { %v1039_v35 = vpop.f32.mrf.mxu2 }
 0x1f5   : > { %v1040_v36 = vadd.f32 %v2329_v56, %v1039_v35  ;;  %1181 = vadd.xlane.f32.xlu0 %v2333_v53 }
 0x1f6   : > { %v1107_v37 = vpop.f32.mrf.mxu3 }
 0x1f7   : > { %v1105_v38 = vadd.f32 %v1104_v31, %v1040_v36 }
 0x1f9   : > { %v1150_v39 = vmax.f32 %v1105_v38, 0.0 }
 0x1fb   : > { %v2338_v41 = vadd.f32 %v1826_v40, %v1150_v39 }
 0x1fc   : > { %v1042_v42 = vpop.f32.mrf.mxu2 }
 0x1fd   : > { %v1043_v43 = vadd.f32 %v2329_v56, %v1042_v42  ;;  %1183 = vadd.xlane.f32.xlu0 %v2338_v41  ;;  %v1835_v42 = vld [vmem:[%s2218_s21 + $0x50] sm:$0xff] }
 0x1fe   : > { %v1110_v44 = vpop.f32.mrf.mxu3 }
 0x1ff   : > { %v1108_v45 = vadd.f32 %v1107_v37, %v1043_v43 }
 0x201   : > { %v1151_v46 = vmax.f32 %v1108_v45, 0.0 }
 0x203   : > { %v2343_v48 = vadd.f32 %v1827_v47, %v1151_v46 }
 0x204   : > { %v1045_v49 = vpop.f32.mrf.mxu2 }
 0x205   : > { %v1046_v50 = vadd.f32 %v2329_v56, %v1045_v49  ;;  %1185 = vadd.xlane.f32.xlu1 %v2343_v48 }
 0x206   : > { %v1113_v51 = vpop.f32.mrf.mxu3 }
 0x207   : > { %v1111_v52 = vadd.f32 %v1110_v44, %v1046_v50  ;;  %v1836_v50 = vld [vmem:[%s2218_s21 + $0x58] sm:$0xff] }
 0x209   : > { %v1152_v55 = vmax.f32 %v1111_v52, 0.0 }
 0x20b   : > { %v2348_v58 = vadd.f32 %v1828_v57, %v1152_v55  ;;  %v2044_v57 = vmov 128.0  }
 0x20c   : > { %v1048_v59 = vpop.f32.mrf.mxu2  ;;  %1791 = vrcp.f32 %v2044_v57 }
 0x20d   : > { %v1049_v60 = vadd.f32 %v2329_v56, %v1048_v59  ;;  %1187 = vadd.xlane.f32.xlu1 %v2348_v58 }
 0x20e   : > { %v1116_v54 = vpop.f32.mrf.mxu3 }
 0x20f   : > { %v1114_v61 = vadd.f32 %v1113_v51, %v1049_v60 }
 0x211   : > { %v1153_v62 = vmax.f32 %v1114_v61, 0.0 }
 0x212   : > { %v1792_v61 = vpop.eup %1791 }
 0x213   : > { %v2353_v0 = vadd.f32 %v1829_v63, %v1153_v62  ;;  %v1837_v62 = vld [vmem:[%s2218_s21 + $0x60] sm:$0xff]  ;;  %vm1218_vm0 = vweird.f32 %v1792_v61 }
 0x214   : > { %v1051_v1 = vpop.f32.mrf.mxu2 }
 0x215   : > { %v1052_v2 = vadd.f32 %v2329_v56, %v1051_v1  ;;  %1189 = vadd.xlane.f32.xlu2 %v2353_v0 }
 0x216   : > { %v1119_v3 = vpop.f32.mrf.mxu3 }
 0x217   : > { %v1117_v4 = vadd.f32 %v1116_v54, %v1052_v2 }
 0x219   : > { %v1154_v5 = vmax.f32 %v1117_v4, 0.0 }
 0x21b   : > { %v2358_v7 = vadd.f32 %v1830_v6, %v1154_v5 }
 0x21c   : > { %v1054_v8 = vpop.f32.mrf.mxu2 }
 0x21d   : > { %v1055_v9 = vadd.f32 %v2329_v56, %v1054_v8  ;;  %1191 = vadd.xlane.f32.xlu2 %v2358_v7  ;;  %v1838_v8 = vld [vmem:[%s2218_s21 + $0x68] sm:$0xff] }
 0x21e   : > { %v1122_v10 = vpop.f32.mrf.mxu3 }
 0x21f   : > { %v1120_v11 = vadd.f32 %v1119_v3, %v1055_v9  ;;  %v1214_v3 = vmul.f32 128.0, %v1792_v61 }
 0x221   : > { %v1155_v12 = vmax.f32 %v1120_v11, 0.0  ;;  %v1215_v6 = vsub.f32 1.0, %v1214_v3 }
 0x223   : > { %v2363_v14 = vadd.f32 %v1831_v13, %v1155_v12  ;;  %v1216_v13 = vmul.f32 %v1792_v61, %v1215_v6 }
 0x224   : > { %v1057_v15 = vpop.f32.mrf.mxu2 }
 0x225   : > { %v1058_v16 = vadd.f32 %v2329_v56, %v1057_v15  ;;  %1193 = vadd.xlane.f32.xlu0 %v2363_v14 }
 0x226   : > { %v1125_v17 = vpop.f32.mrf.mxu3 }
 0x227   : > { %v1123_v18 = vadd.f32 %v1122_v10, %v1058_v16 }
 0x229   : > { %v1156_v19 = vmax.f32 %v1123_v18, 0.0  ;;  %v1839_v18 = vld [vmem:[%s2218_s21 + $0x70] sm:$0xff] }
 0x22b   : > { %v2368_v21 = vadd.f32 %v1832_v20, %v1156_v19 }
 0x22c   : > { %v1060_v22 = vpop.f32.mrf.mxu2 }
 0x22d   : > { %v1061_v23 = vadd.f32 %v2329_v56, %v1060_v22  ;;  %1195 = vadd.xlane.f32.xlu1 %v2368_v21 }
 0x22e   : > { %v1128_v24 = vpop.f32.mrf.mxu3 }
 0x22f   : > { %v1126_v25 = vadd.f32 %v1125_v17, %v1061_v23  ;;  %v1217_v17 = vadd.f32 %v1792_v61, %v1216_v13 }
 0x231   : > { %v1157_v26 = vmax.f32 %v1126_v25, 0.0 }
 0x233   : > { %v2373_v28 = vadd.f32 %v1833_v27, %v1157_v26 }
 0x234   : > { %v1063_v29 = vpop.f32.mrf.mxu2 }
 0x235   : > { %v1064_v30 = vadd.f32 %v2329_v56, %v1063_v29  ;;  %1197 = vadd.xlane.f32.xlu2 %v2373_v28 }
 0x236   : > { %v1131_v31 = vpop.f32.mrf.mxu3 }
 0x237   : > { %v1129_v32 = vadd.f32 %v1128_v24, %v1064_v30  ;;  %v2407_v24 = vsel %vm1218_vm0, %v1792_v61, %v1217_v17 }
 0x239   : > { %v1158_v33 = vmax.f32 %v1129_v32, 0.0 }
 0x23b   : > { %v2378_v35 = vadd.f32 %v1834_v34, %v1158_v33 }
 0x23c   : > { %v1066_v36 = vpop.f32.mrf.mxu2 }
 0x23d   : > { %v1067_v37 = vadd.f32 %v2329_v56, %v1066_v36  ;;  %1199 = vadd.xlane.f32.xlu0 %v2378_v35 }
 0x23e   : > { %v1134_v38 = vpop.f32.mrf.mxu3 }
 0x23f   : > { %v1132_v39 = vadd.f32 %v1131_v31, %v1067_v37  ;;  %v1840_v31 = vld [vmem:[%s2218_s21 + $0x78] sm:$0xff] }
 0x241   : > { %v1159_v40 = vmax.f32 %v1132_v39, 0.0 }
 0x243   : > { %v2383_v43 = vadd.f32 %v1835_v42, %v1159_v40 }
 0x244   : > { %v1069_v44 = vpop.f32.mrf.mxu2 }
 0x245   : > { %v1070_v45 = vadd.f32 %v2329_v56, %v1069_v44  ;;  %1201 = vadd.xlane.f32.xlu1 %v2383_v43 }
 0x246   : > { %v1137_v47 = vpop.f32.mrf.mxu3 }
 0x247   : > { %v1135_v46 = vadd.f32 %v1134_v38, %v1070_v45 }
 0x249   : > { %v1160_v49 = vmax.f32 %v1135_v46, 0.0 }
 0x24b   : > { %v2388_v51 = vadd.f32 %v1836_v50, %v1160_v49 }
 0x24c   : > { %v1072_v52 = vpop.f32.mrf.mxu2 }
 0x24d   : > { %v1073_v55 = vadd.f32 %v2329_v56, %v1072_v52  ;;  %1203 = vadd.xlane.f32.xlu2 %v2388_v51 }
 0x24e   : > { %v1140_v54 = vpop.f32.mrf.mxu3 }
 0x24f   : > { %v1138_v59 = vadd.f32 %v1137_v47, %v1073_v55 }
 0x251   : > { %v1161_v60 = vmax.f32 %v1138_v59, 0.0 }
 0x253   : > { %v2393_v63 = vadd.f32 %v1837_v62, %v1161_v60 }
 0x254   : > { %v1075_v1 = vpop.f32.mrf.mxu2 }
 0x255   : > { %v1076_v2 = vadd.f32 %v2329_v56, %v1075_v1  ;;  %1205 = vadd.xlane.f32.xlu0 %v2393_v63 }
 0x256   : > { %v1143_v10 = vpop.f32.mrf.mxu3 }
 0x257   : > { %v1141_v4 = vadd.f32 %v1140_v54, %v1076_v2 }
 0x259   : > { %v1162_v5 = vmax.f32 %v1141_v4, 0.0 }
 0x25b   : > { %v2398_v9 = vadd.f32 %v1838_v8, %v1162_v5 }
 0x25c   : > { %v1078_v11 = vpop.f32.mrf.mxu2 }
 0x25d   : > { %v1079_v12 = vadd.f32 %v2329_v56, %v1078_v11  ;;  %1207 = vadd.xlane.f32.xlu1 %v2398_v9 }
 0x25e   : > { %v1146_v23 = vpop.f32.mrf.mxu3 }
 0x25f   : > { %v1144_v15 = vadd.f32 %v1143_v10, %v1079_v12 }
 0x261   : > { %v1163_v16 = vmax.f32 %v1144_v15, 0.0 }
 0x263   : > { %v2403_v19 = vadd.f32 %v1839_v18, %v1163_v16 }
 0x264   : > { %v1081_v20 = vpop.f32.mrf.mxu2 }
 0x265   : > { %v1082_v22 = vadd.f32 %v2329_v56, %v1081_v20  ;;  %1209 = vadd.xlane.f32.xlu2 %v2403_v19 }
 0x267   : > { %v1147_v25 = vadd.f32 %v1146_v23, %v1082_v22 }
 0x268   : > { %v1182_v26 = vpop.xlane.xlu0 %1181 }
 0x269   : > { %v1164_v27 = vmax.f32 %v1147_v25, 0.0  ;;  %v1220_v29 = vmul.f32 %v2407_v24, %v1182_v26 }
 0x26b   : > { %v2411_v30 = vsub.f32 %v2333_v53, %v1220_v29  ;;  %v2414_v32 = vadd.f32 %v1840_v31, %v1164_v27 }
 0x26d   : > { %1211 = vadd.xlane.f32.xlu0 %v2414_v32  ;;  %v1252_v56 = vmul.f32 %v2411_v30, %v2411_v30 }
 0x26f   : > { %1268 = vadd.xlane.f32.xlu1 %v1252_v56 }
 0x270   : > { %v1184_v33 = vpop.xlane.xlu0 %1183 }
 0x271   : > { %v1221_v34 = vmul.f32 %v2407_v24, %v1184_v33 }
 0x273   : > { %v2421_v36 = vsub.f32 %v2338_v41, %v1221_v34 }
 0x275   : > { %v1253_v37 = vmul.f32 %v2421_v36, %v2421_v36 }
 0x277   : > { %1270 = vadd.xlane.f32.xlu2 %v1253_v37 }
 0x278   : > { %v1186_v53 = vpop.xlane.xlu1 %1185 }
 0x279   : > { %v1222_v38 = vmul.f32 %v2407_v24, %v1186_v53 }
 0x27b   : > { %v2427_v39 = vsub.f32 %v2343_v48, %v1222_v38 }
 0x27d   : > { %v1254_v40 = vmul.f32 %v2427_v39, %v2427_v39 }
 0x27f   : > { %1272 = vadd.xlane.f32.xlu0 %v1254_v40 }
 0x280   : > { %v1188_v42 = vpop.xlane.xlu1 %1187 }
 0x281   : > { %v1223_v44 = vmul.f32 %v2407_v24, %v1188_v42 }
 0x283   : > { %v2433_v41 = vsub.f32 %v2348_v58, %v1223_v44 }
 0x285   : > { %v1255_v45 = vmul.f32 %v2433_v41, %v2433_v41 }
 0x287   : > { %1274 = vadd.xlane.f32.xlu1 %v1255_v45 }
 0x288   : > { %v1190_v46 = vpop.xlane.xlu2 %1189 }
 0x289   : > { %v1224_v47 = vmul.f32 %v2407_v24, %v1190_v46 }
 0x28b   : > { %v2439_v48 = vsub.f32 %v2353_v0, %v1224_v47 }
 0x28d   : > { %v1256_v49 = vmul.f32 %v2439_v48, %v2439_v48 }
 0x28f   : > { %1276 = vadd.xlane.f32.xlu2 %v1256_v49 }
 0x290   : > { %v1192_v50 = vpop.xlane.xlu2 %1191 }
 0x291   : > { %v1225_v52 = vmul.f32 %v2407_v24, %v1192_v50 }
 0x293   : > { %v2445_v58 = vsub.f32 %v2358_v7, %v1225_v52 }
 0x295   : > { %v1257_v55 = vmul.f32 %v2445_v58, %v2445_v58 }
 0x297   : > { %1278 = vadd.xlane.f32.xlu0 %v1257_v55 }
 0x298   : > { %v1194_v57 = vpop.xlane.xlu0 %1193 }
 0x299   : > { %v1226_v59 = vmul.f32 %v2407_v24, %v1194_v57  ;;  %v2515_v57 = vld [vmem:[%s2644_s7] ss:$0 sm:$0xff] }
 0x29b   : > { %v2451_v0 = vsub.f32 %v2363_v14, %v1226_v59 }
 0x29d   : > { %v1258_v60 = vmul.f32 %v2451_v0, %v2451_v0 }
 0x29f   : > { %1280 = vadd.xlane.f32.xlu1 %v1258_v60 }
 0x2a0   : > { %v1196_v54 = vpop.xlane.xlu1 %1195 }
 0x2a1   : > { %v1227_v61 = vmul.f32 %v2407_v24, %v1196_v54  ;;  %v2520_v54 = vld [vmem:[%s2645_s8] ss:$0 sm:$0xff] }
 0x2a3   : > { %v2457_v7 = vsub.f32 %v2368_v21, %v1227_v61 }
 0x2a5   : > { %v1259_v62 = vmul.f32 %v2457_v7, %v2457_v7 }
 0x2a7   : > { %1282 = vadd.xlane.f32.xlu2 %v1259_v62 }
 0x2a8   : > { %v1198_v1 = vpop.xlane.xlu2 %1197 }
 0x2a9   : > { %v1228_v2 = vmul.f32 %v2407_v24, %v1198_v1 }
 0x2ab   : > { %v2463_v14 = vsub.f32 %v2373_v28, %v1228_v2 }
 0x2ad   : > { %v1260_v3 = vmul.f32 %v2463_v14, %v2463_v14 }
 0x2af   : > { %1284 = vadd.xlane.f32.xlu0 %v1260_v3 }
 0x2b0   : > { %v1200_v4 = vpop.xlane.xlu0 %1199 }
 0x2b1   : > { %v1229_v5 = vmul.f32 %v2407_v24, %v1200_v4 }
 0x2b3   : > { %v2469_v21 = vsub.f32 %v2378_v35, %v1229_v5 }
 0x2b5   : > { %v1261_v6 = vmul.f32 %v2469_v21, %v2469_v21 }
 0x2b7   : > { %1286 = vadd.xlane.f32.xlu1 %v1261_v6 }
 0x2b8   : > { %v1202_v8 = vpop.xlane.xlu1 %1201 }
 0x2b9   : > { %v1230_v10 = vmul.f32 %v2407_v24, %v1202_v8 }
 0x2bb   : > { %v2475_v28 = vsub.f32 %v2383_v43, %v1230_v10 }
 0x2bd   : > { %v1262_v11 = vmul.f32 %v2475_v28, %v2475_v28 }
 0x2bf   : > { %1288 = vadd.xlane.f32.xlu2 %v1262_v11 }
 0x2c0   : > { %v1204_v12 = vpop.xlane.xlu2 %1203 }
 0x2c1   : > { %v1231_v13 = vmul.f32 %v2407_v24, %v1204_v12 }
 0x2c3   : > { %v2481_v35 = vsub.f32 %v2388_v51, %v1231_v13 }
 0x2c5   : > { %v1263_v15 = vmul.f32 %v2481_v35, %v2481_v35 }
 0x2c7   : > { %1290 = vadd.xlane.f32.xlu0 %v1263_v15 }
 0x2c8   : > { %v1206_v16 = vpop.xlane.xlu0 %1205 }
 0x2c9   : > { %v1232_v17 = vmul.f32 %v2407_v24, %v1206_v16 }
 0x2cb   : > { %v2487_v43 = vsub.f32 %v2393_v63, %v1232_v17 }
 0x2cd   : > { %v1264_v18 = vmul.f32 %v2487_v43, %v2487_v43 }
 0x2cf   : > { %1292 = vadd.xlane.f32.xlu1 %v1264_v18 }
 0x2d0   : > { %v1208_v20 = vpop.xlane.xlu1 %1207 }
 0x2d1   : > { %v1233_v22 = vmul.f32 %v2407_v24, %v1208_v20 }
 0x2d3   : > { %v2493_v51 = vsub.f32 %v2398_v9, %v1233_v22 }
 0x2d5   : > { %v1265_v23 = vmul.f32 %v2493_v51, %v2493_v51 }
 0x2d7   : > { %1294 = vadd.xlane.f32.xlu2 %v1265_v23 }
 0x2d8   : > { %v1210_v25 = vpop.xlane.xlu2 %1209 }
 0x2d9   : > { %v1234_v26 = vmul.f32 %v2407_v24, %v1210_v25 }
 0x2db   : > { %v2499_v63 = vsub.f32 %v2403_v19, %v1234_v26 }
 0x2dd   : > { %v1266_v27 = vmul.f32 %v2499_v63, %v2499_v63 }
 0x2df   : > { %1296 = vadd.xlane.f32.xlu0 %v1266_v27 }
 0x2e0   : > { %v1212_v29 = vpop.xlane.xlu0 %1211 }
 0x2e1   : > { %v1235_v31 = vmul.f32 %v2407_v24, %v1212_v29 }
 0x2e2   : > { %v1269_v56 = vpop.xlane.xlu1 %1268 }
 0x2e3   : > { %v2505_v9 = vsub.f32 %v2414_v32, %v1235_v31  ;;  %v1300_v33 = vmul.f32 %v1269_v56, %v2407_v24 }
 0x2e5   : > { %v1316_v34 = vadd.f32 1e-05, %v1300_v33  ;;  %v1267_v37 = vmul.f32 %v2505_v9, %v2505_v9 }
 0x2e7   : > { %1793 = vrsqrt.f32 %v1316_v34  ;;  %1298 = vadd.xlane.f32.xlu1 %v1267_v37  ;;  %vm1338_vm2 = vweird.f32 %v1316_v34 }
 0x2ea   : > { %v1271_v19 = vpop.xlane.xlu2 %1270 }
 0x2eb   : > { %v1301_v53 = vmul.f32 %v1271_v19, %v2407_v24 }
 0x2ed   : > { %v1794_v38 = vpop.eup %1793  ;;  %v1317_v40 = vadd.f32 1e-05, %v1301_v53 }
 0x2ee   : > { %v1333_v42 = vmul.f32 %v1794_v38, %v1316_v34  ;;  %vm1339_vm1 = vweird.f32 %v1794_v38 }
 0x2ef   : > { %1795 = vrsqrt.f32 %v1317_v40  ;;  %vm1340_vm3 = vmor %vm1338_vm2, %vm1339_vm1  ;;  %vm1348_vm5 = vweird.f32 %v1317_v40 }
 0x2f0   : > { %v1334_v44 = vmul.f32 %v1794_v38, %v1333_v42 }
 0x2f2   : > { %v1335_v45 = vmul.f32 0.5, %v1334_v44  ;;  %v1273_v46 = vpop.xlane.xlu0 %1272 }
 0x2f3   : > { %v1302_v32 = vmul.f32 %v1273_v46, %v2407_v24 }
 0x2f4   : > { %v1336_v47 = vsub.f32 1.5, %v1335_v45 }
 0x2f5   : > { %v1796_v49 = vpop.eup %1795  ;;  %v1318_v50 = vadd.f32 1e-05, %v1302_v32 }
 0x2f6   : > { %v1337_v52 = vmul.f32 %v1794_v38, %v1336_v47  ;;  %v1343_v55 = vmul.f32 %v1796_v49, %v1317_v40  ;;  %vm1349_vm4 = vweird.f32 %v1796_v49 }
 0x2f7   : > { %1797 = vrsqrt.f32 %v1318_v50  ;;  %vm1350_vm6 = vmor %vm1348_vm5, %vm1349_vm4  ;;  %vm1358_vm8 = vweird.f32 %v1318_v50 }
 0x2f8   : > { %v1341_v59 = vsel %vm1340_vm3, %v1794_v38, %v1337_v52  ;;  %v1344_v60 = vmul.f32 %v1796_v49, %v1343_v55 }
 0x2f9   : > { %v1492_v61 = vmul.f32 %v1341_v59, %v2411_v30 }
 0x2fa   : > { %v1345_v62 = vmul.f32 0.5, %v1344_v60  ;;  %v1275_v1 = vpop.xlane.xlu1 %1274 }
 0x2fb   : > { %v1512_v2 = vmul.f32 %v2515_v57, %v1492_v61  ;;  %v1303_v3 = vmul.f32 %v1275_v1, %v2407_v24 }
 0x2fc   : > { %v1346_v4 = vsub.f32 1.5, %v1345_v62 }
 0x2fd   : > { %v1798_v5 = vpop.eup %1797  ;;  %v1532_v6 = vadd.f32 %v2520_v54, %v1512_v2  ;;  %v1319_v8 = vadd.f32 1e-05, %v1303_v3 }
 0x2fe   : > { %v1347_v10 = vmul.f32 %v1796_v49, %v1346_v4  ;;  %v1353_v11 = vmul.f32 %v1798_v5, %v1318_v50  ;;  %vm1359_vm7 = vweird.f32 %v1798_v5 }
 0x2ff   : > { %1548 = vst [vmem:[%s2528_s17] sm:$0xff] %v1532_v6  ;;  %1799 = vrsqrt.f32 %v1319_v8  ;;  %vm1360_vm9 = vmor %vm1358_vm8, %vm1359_vm7  ;;  %vm1368_vm11 = vweird.f32 %v1319_v8 }
 0x300   : > { %v1351_v30 = vsel %vm1350_vm6, %v1796_v49, %v1347_v10  ;;  %v1354_v12 = vmul.f32 %v1798_v5, %v1353_v11 }
 0x301   : > { %v1493_v13 = vmul.f32 %v1351_v30, %v2421_v36 }
 0x302   : > { %v1355_v15 = vmul.f32 0.5, %v1354_v12  ;;  %v1277_v16 = vpop.xlane.xlu2 %1276 }
 0x303   : > { %v1513_v17 = vmul.f32 %v2515_v57, %v1493_v13  ;;  %v1304_v18 = vmul.f32 %v1277_v16, %v2407_v24 }
 0x304   : > { %v1356_v20 = vsub.f32 1.5, %v1355_v15 }
 0x305   : > { %v1800_v22 = vpop.eup %1799  ;;  %v1533_v23 = vadd.f32 %v2520_v54, %v1513_v17  ;;  %v1320_v25 = vadd.f32 1e-05, %v1304_v18 }
 0x306   : > { %v1357_v26 = vmul.f32 %v1798_v5, %v1356_v20  ;;  %v1363_v27 = vmul.f32 %v1800_v22, %v1319_v8  ;;  %vm1369_vm10 = vweird.f32 %v1800_v22 }
 0x307   : > { %1549 = vst [vmem:[%s2528_s17 + $0x8] sm:$0xff] %v1533_v23  ;;  %1801 = vrsqrt.f32 %v1320_v25  ;;  %vm1370_vm12 = vmor %vm1368_vm11, %vm1369_vm10  ;;  %vm1378_vm14 = vweird.f32 %v1320_v25 }
 0x308   : > { %v1361_v36 = vsel %vm1360_vm9, %v1798_v5, %v1357_v26  ;;  %v1364_v29 = vmul.f32 %v1800_v22, %v1363_v27 }
 0x309   : > { %v1494_v31 = vmul.f32 %v1361_v36, %v2427_v39 }
 0x30a   : > { %v1365_v56 = vmul.f32 0.5, %v1364_v29  ;;  %v1279_v33 = vpop.xlane.xlu0 %1278 }
 0x30b   : > { %v1514_v34 = vmul.f32 %v2515_v57, %v1494_v31  ;;  %v1305_v37 = vmul.f32 %v1279_v33, %v2407_v24 }
 0x30c   : > { %v1366_v19 = vsub.f32 1.5, %v1365_v56 }
 0x30d   : > { %v1802_v53 = vpop.eup %1801  ;;  %v1534_v38 = vadd.f32 %v2520_v54, %v1514_v34  ;;  %v1321_v40 = vadd.f32 1e-05, %v1305_v37 }
 0x30e   : > { %v1367_v42 = vmul.f32 %v1800_v22, %v1366_v19  ;;  %v1373_v44 = vmul.f32 %v1802_v53, %v1320_v25  ;;  %vm1379_vm13 = vweird.f32 %v1802_v53 }
 0x30f   : > { %1550 = vst [vmem:[%s2528_s17 + $0x10] sm:$0xff] %v1534_v38  ;;  %1803 = vrsqrt.f32 %v1321_v40  ;;  %vm1380_vm15 = vmor %vm1378_vm14, %vm1379_vm13  ;;  %vm1388_vm1 = vweird.f32 %v1321_v40 }
 0x310   : > { %v1371_v39 = vsel %vm1370_vm12, %v1800_v22, %v1367_v42  ;;  %v1374_v45 = vmul.f32 %v1802_v53, %v1373_v44 }
 0x311   : > { %v1495_v46 = vmul.f32 %v1371_v39, %v2433_v41 }
 0x312   : > { %v1375_v32 = vmul.f32 0.5, %v1374_v45  ;;  %v1281_v47 = vpop.xlane.xlu1 %1280 }
 0x313   : > { %v1515_v49 = vmul.f32 %v2515_v57, %v1495_v46  ;;  %v1306_v50 = vmul.f32 %v1281_v47, %v2407_v24 }
 0x314   : > { %v1376_v52 = vsub.f32 1.5, %v1375_v32 }
 0x315   : > { %v1804_v55 = vpop.eup %1803  ;;  %v1535_v59 = vadd.f32 %v2520_v54, %v1515_v49  ;;  %v1322_v60 = vadd.f32 1e-05, %v1306_v50 }
 0x316   : > { %v1377_v61 = vmul.f32 %v1802_v53, %v1376_v52  ;;  %v1383_v62 = vmul.f32 %v1804_v55, %v1321_v40  ;;  %vm1389_vm0 = vweird.f32 %v1804_v55 }
 0x317   : > { %1551 = vst [vmem:[%s2528_s17 + $0x18] sm:$0xff] %v1535_v59  ;;  %1805 = vrsqrt.f32 %v1322_v60  ;;  %vm1390_vm2 = vmor %vm1388_vm1, %vm1389_vm0  ;;  %vm1398_vm4 = vweird.f32 %v1322_v60 }
 0x318   : > { %v1381_v41 = vsel %vm1380_vm15, %v1802_v53, %v1377_v61  ;;  %v1384_v1 = vmul.f32 %v1804_v55, %v1383_v62 }
 0x319   : > { %v1496_v2 = vmul.f32 %v1381_v41, %v2439_v48 }
 0x31a   : > { %v1385_v3 = vmul.f32 0.5, %v1384_v1  ;;  %v1283_v4 = vpop.xlane.xlu2 %1282 }
 0x31b   : > { %v1516_v5 = vmul.f32 %v2515_v57, %v1496_v2  ;;  %v1307_v6 = vmul.f32 %v1283_v4, %v2407_v24 }
 0x31c   : > { %v1386_v8 = vsub.f32 1.5, %v1385_v3 }
 0x31d   : > { %v1806_v10 = vpop.eup %1805  ;;  %v1536_v11 = vadd.f32 %v2520_v54, %v1516_v5  ;;  %v1323_v30 = vadd.f32 1e-05, %v1307_v6 }
 0x31e   : > { %v1387_v12 = vmul.f32 %v1804_v55, %v1386_v8  ;;  %v1393_v13 = vmul.f32 %v1806_v10, %v1322_v60  ;;  %vm1399_vm3 = vweird.f32 %v1806_v10 }
 0x31f   : > { %1552 = vst [vmem:[%s2528_s17 + $0x20] sm:$0xff] %v1536_v11  ;;  %1807 = vrsqrt.f32 %v1323_v30  ;;  %vm1400_vm5 = vmor %vm1398_vm4, %vm1399_vm3  ;;  %vm1408_vm7 = vweird.f32 %v1323_v30 }
 0x320   : > { %v1391_v48 = vsel %vm1390_vm2, %v1804_v55, %v1387_v12  ;;  %v1394_v15 = vmul.f32 %v1806_v10, %v1393_v13 }
 0x321   : > { %v1497_v16 = vmul.f32 %v1391_v48, %v2445_v58 }
 0x322   : > { %v1395_v17 = vmul.f32 0.5, %v1394_v15  ;;  %v1285_v18 = vpop.xlane.xlu0 %1284 }
 0x323   : > { %v1517_v20 = vmul.f32 %v2515_v57, %v1497_v16  ;;  %v1308_v22 = vmul.f32 %v1285_v18, %v2407_v24 }
 0x324   : > { %v1396_v23 = vsub.f32 1.5, %v1395_v17 }
 0x325   : > { %v1808_v25 = vpop.eup %1807  ;;  %v1537_v26 = vadd.f32 %v2520_v54, %v1517_v20  ;;  %v1324_v27 = vadd.f32 1e-05, %v1308_v22 }
 0x326   : > { %v1397_v36 = vmul.f32 %v1806_v10, %v1396_v23  ;;  %v1403_v29 = vmul.f32 %v1808_v25, %v1323_v30  ;;  %vm1409_vm6 = vweird.f32 %v1808_v25 }
 0x327   : > { %1553 = vst [vmem:[%s2528_s17 + $0x28] sm:$0xff] %v1537_v26  ;;  %1809 = vrsqrt.f32 %v1324_v27  ;;  %vm1410_vm8 = vmor %vm1408_vm7, %vm1409_vm6  ;;  %vm1418_vm10 = vweird.f32 %v1324_v27 }
 0x328   : > { %v1401_v58 = vsel %vm1400_vm5, %v1806_v10, %v1397_v36  ;;  %v1404_v31 = vmul.f32 %v1808_v25, %v1403_v29 }
 0x329   : > { %v1498_v56 = vmul.f32 %v1401_v58, %v2451_v0 }
 0x32a   : > { %v1405_v33 = vmul.f32 0.5, %v1404_v31  ;;  %v1287_v34 = vpop.xlane.xlu1 %1286 }
 0x32b   : > { %v1518_v37 = vmul.f32 %v2515_v57, %v1498_v56  ;;  %v1309_v19 = vmul.f32 %v1287_v34, %v2407_v24 }
 0x32c   : > { %v1406_v53 = vsub.f32 1.5, %v1405_v33 }
 0x32d   : > { %v1810_v38 = vpop.eup %1809  ;;  %v1538_v40 = vadd.f32 %v2520_v54, %v1518_v37  ;;  %v1325_v42 = vadd.f32 1e-05, %v1309_v19 }
 0x32e   : > { %v1407_v44 = vmul.f32 %v1808_v25, %v1406_v53  ;;  %v1413_v39 = vmul.f32 %v1810_v38, %v1324_v27  ;;  %vm1419_vm9 = vweird.f32 %v1810_v38 }
 0x32f   : > { %1554 = vst [vmem:[%s2528_s17 + $0x30] sm:$0xff] %v1538_v40  ;;  %1811 = vrsqrt.f32 %v1325_v42  ;;  %vm1420_vm11 = vmor %vm1418_vm10, %vm1419_vm9  ;;  %vm1428_vm13 = vweird.f32 %v1325_v42 }
 0x330   : > { %v1411_v0 = vsel %vm1410_vm8, %v1808_v25, %v1407_v44  ;;  %v1414_v45 = vmul.f32 %v1810_v38, %v1413_v39 }
 0x331   : > { %v1499_v46 = vmul.f32 %v1411_v0, %v2457_v7 }
 0x332   : > { %v1415_v32 = vmul.f32 0.5, %v1414_v45  ;;  %v1289_v47 = vpop.xlane.xlu2 %1288 }
 0x333   : > { %v1519_v49 = vmul.f32 %v2515_v57, %v1499_v46  ;;  %v1310_v50 = vmul.f32 %v1289_v47, %v2407_v24 }
 0x334   : > { %v1416_v52 = vsub.f32 1.5, %v1415_v32 }
 0x335   : > { %v1812_v55 = vpop.eup %1811  ;;  %v1539_v59 = vadd.f32 %v2520_v54, %v1519_v49  ;;  %v1326_v60 = vadd.f32 1e-05, %v1310_v50 }
 0x336   : > { %v1417_v61 = vmul.f32 %v1810_v38, %v1416_v52  ;;  %v1423_v62 = vmul.f32 %v1812_v55, %v1325_v42  ;;  %vm1429_vm12 = vweird.f32 %v1812_v55 }
 0x337   : > { %1555 = vst [vmem:[%s2528_s17 + $0x38] sm:$0xff] %v1539_v59  ;;  %1813 = vrsqrt.f32 %v1326_v60  ;;  %vm1430_vm14 = vmor %vm1428_vm13, %vm1429_vm12  ;;  %vm1438_vm0 = vweird.f32 %v1326_v60 }
 0x338   : > { %v1421_v7 = vsel %vm1420_vm11, %v1810_v38, %v1417_v61  ;;  %v1424_v41 = vmul.f32 %v1812_v55, %v1423_v62 }
 0x339   : > { %v1500_v1 = vmul.f32 %v1421_v7, %v2463_v14 }
 0x33a   : > { %v1425_v2 = vmul.f32 0.5, %v1424_v41  ;;  %v1291_v3 = vpop.xlane.xlu0 %1290 }
 0x33b   : > { %v1520_v4 = vmul.f32 %v2515_v57, %v1500_v1  ;;  %v1311_v5 = vmul.f32 %v1291_v3, %v2407_v24 }
 0x33c   : > { %v1426_v6 = vsub.f32 1.5, %v1425_v2 }
 0x33d   : > { %v1814_v8 = vpop.eup %1813  ;;  %v1540_v10 = vadd.f32 %v2520_v54, %v1520_v4  ;;  %v1327_v11 = vadd.f32 1e-05, %v1311_v5 }
 0x33e   : > { %v1427_v30 = vmul.f32 %v1812_v55, %v1426_v6  ;;  %v1433_v12 = vmul.f32 %v1814_v8, %v1326_v60  ;;  %vm1439_vm15 = vweird.f32 %v1814_v8 }
 0x33f   : > { %1556 = vst [vmem:[%s2528_s17 + $0x40] sm:$0xff] %v1540_v10  ;;  %1815 = vrsqrt.f32 %v1327_v11  ;;  %vm1440_vm1 = vmor %vm1438_vm0, %vm1439_vm15  ;;  %vm1448_vm3 = vweird.f32 %v1327_v11 }
 0x340   : > { %v1431_v14 = vsel %vm1430_vm14, %v1812_v55, %v1427_v30  ;;  %v1434_v13 = vmul.f32 %v1814_v8, %v1433_v12 }
 0x341   : > { %v1501_v48 = vmul.f32 %v1431_v14, %v2469_v21 }
 0x342   : > { %v1435_v15 = vmul.f32 0.5, %v1434_v13  ;;  %v1293_v16 = vpop.xlane.xlu1 %1292 }
 0x343   : > { %v1521_v17 = vmul.f32 %v2515_v57, %v1501_v48  ;;  %v1312_v18 = vmul.f32 %v1293_v16, %v2407_v24 }
 0x344   : > { %v1436_v20 = vsub.f32 1.5, %v1435_v15 }
 0x345   : > { %v1816_v22 = vpop.eup %1815  ;;  %v1541_v23 = vadd.f32 %v2520_v54, %v1521_v17  ;;  %v1328_v25 = vadd.f32 1e-05, %v1312_v18 }
 0x346   : > { %v1437_v26 = vmul.f32 %v1814_v8, %v1436_v20  ;;  %v1443_v27 = vmul.f32 %v1816_v22, %v1327_v11  ;;  %vm1449_vm2 = vweird.f32 %v1816_v22 }
 0x347   : > { %1557 = vst [vmem:[%s2528_s17 + $0x48] sm:$0xff] %v1541_v23  ;;  %1817 = vrsqrt.f32 %v1328_v25  ;;  %vm1450_vm4 = vmor %vm1448_vm3, %vm1449_vm2  ;;  %vm1458_vm6 = vweird.f32 %v1328_v25 }
 0x348   : > { %v1441_v21 = vsel %vm1440_vm1, %v1814_v8, %v1437_v26  ;;  %v1444_v36 = vmul.f32 %v1816_v22, %v1443_v27 }
 0x349   : > { %v1502_v29 = vmul.f32 %v1441_v21, %v2475_v28 }
 0x34a   : > { %v1445_v58 = vmul.f32 0.5, %v1444_v36  ;;  %v1295_v31 = vpop.xlane.xlu2 %1294 }
 0x34b   : > { %v1522_v56 = vmul.f32 %v2515_v57, %v1502_v29  ;;  %v1313_v33 = vmul.f32 %v1295_v31, %v2407_v24 }
 0x34c   : > { %v1446_v34 = vsub.f32 1.5, %v1445_v58 }
 0x34d   : > { %v1818_v37 = vpop.eup %1817  ;;  %v1542_v19 = vadd.f32 %v2520_v54, %v1522_v56  ;;  %v1329_v53 = vadd.f32 1e-05, %v1313_v33 }
 0x34e   : > { %v1447_v38 = vmul.f32 %v1816_v22, %v1446_v34  ;;  %v1453_v40 = vmul.f32 %v1818_v37, %v1328_v25  ;;  %vm1459_vm5 = vweird.f32 %v1818_v37 }
 0x34f   : > { %1558 = vst [vmem:[%s2528_s17 + $0x50] sm:$0xff] %v1542_v19  ;;  %1819 = vrsqrt.f32 %v1329_v53  ;;  %vm1460_vm7 = vmor %vm1458_vm6, %vm1459_vm5  ;;  %vm1468_vm9 = vweird.f32 %v1329_v53 }
 0x350   : > { %v1451_v28 = vsel %vm1450_vm4, %v1816_v22, %v1447_v38  ;;  %v1454_v42 = vmul.f32 %v1818_v37, %v1453_v40 }
 0x351   : > { %v1503_v44 = vmul.f32 %v1451_v28, %v2481_v35 }
 0x352   : > { %v1455_v39 = vmul.f32 0.5, %v1454_v42  ;;  %v1297_v0 = vpop.xlane.xlu0 %1296 }
 0x353   : > { %v1523_v45 = vmul.f32 %v2515_v57, %v1503_v44  ;;  %v1314_v46 = vmul.f32 %v1297_v0, %v2407_v24 }
 0x354   : > { %v1456_v32 = vsub.f32 1.5, %v1455_v39 }
 0x355   : > { %v1820_v47 = vpop.eup %1819  ;;  %v1543_v49 = vadd.f32 %v2520_v54, %v1523_v45  ;;  %v1330_v50 = vadd.f32 1e-05, %v1314_v46 }
 0x356   : > { %v1457_v52 = vmul.f32 %v1818_v37, %v1456_v32  ;;  %v1463_v55 = vmul.f32 %v1820_v47, %v1329_v53  ;;  %vm1469_vm8 = vweird.f32 %v1820_v47 }
 0x357   : > { %1559 = vst [vmem:[%s2528_s17 + $0x58] sm:$0xff] %v1543_v49  ;;  %1821 = vrsqrt.f32 %v1330_v50  ;;  %vm1470_vm10 = vmor %vm1468_vm9, %vm1469_vm8  ;;  %vm1478_vm12 = vweird.f32 %v1330_v50 }
 0x358   : > { %v1461_v35 = vsel %vm1460_vm7, %v1818_v37, %v1457_v52  ;;  %v1464_v59 = vmul.f32 %v1820_v47, %v1463_v55 }
 0x359   : > { %v1504_v60 = vmul.f32 %v1461_v35, %v2487_v43 }
 0x35a   : > { %v1465_v61 = vmul.f32 0.5, %v1464_v59  ;;  %v1299_v62 = vpop.xlane.xlu1 %1298 }
 0x35b   : > { %v1524_v7 = vmul.f32 %v2515_v57, %v1504_v60  ;;  %v1315_v41 = vmul.f32 %v1299_v62, %v2407_v24 }
 0x35c   : > { %v1466_v1 = vsub.f32 1.5, %v1465_v61 }
 0x35d   : > { %v1822_v2 = vpop.eup %1821  ;;  %v1544_v3 = vadd.f32 %v2520_v54, %v1524_v7  ;;  %v1331_v4 = vadd.f32 1e-05, %v1315_v41 }
 0x35e   : > { %v1467_v5 = vmul.f32 %v1820_v47, %v1466_v1  ;;  %v1473_v6 = vmul.f32 %v1822_v2, %v1330_v50  ;;  %vm1479_vm11 = vweird.f32 %v1822_v2 }
 0x35f   : > { %1560 = vst [vmem:[%s2528_s17 + $0x60] sm:$0xff] %v1544_v3  ;;  %1823 = vrsqrt.f32 %v1331_v4  ;;  %vm1480_vm13 = vmor %vm1478_vm12, %vm1479_vm11  ;;  %vm1488_vm15 = vweird.f32 %v1331_v4 }
 0x360   : > { %v1471_v43 = vsel %vm1470_vm10, %v1820_v47, %v1467_v5  ;;  %v1474_v8 = vmul.f32 %v1822_v2, %v1473_v6 }
 0x361   : > { %v1505_v10 = vmul.f32 %v1471_v43, %v2493_v51 }
 0x362   : > { %v1475_v11 = vmul.f32 0.5, %v1474_v8 }
 0x363   : > { %v1525_v24 = vmul.f32 %v2515_v57, %v1505_v10 }
 0x364   : > { %v1476_v30 = vsub.f32 1.5, %v1475_v11 }
 0x365   : > { %v1824_v12 = vpop.eup %1823  ;;  %v1545_v14 = vadd.f32 %v2520_v54, %v1525_v24 }
 0x366   : > { %v1477_v13 = vmul.f32 %v1822_v2, %v1476_v30  ;;  %v1483_v48 = vmul.f32 %v1824_v12, %v1331_v4  ;;  %vm1489_vm14 = vweird.f32 %v1824_v12 }
 0x367   : > { %1561 = vst [vmem:[%s2528_s17 + $0x68] sm:$0xff] %v1545_v14  ;;  %vm1490_vm0 = vmor %vm1488_vm15, %vm1489_vm14 }
 0x368   : > { %v1481_v15 = vsel %vm1480_vm13, %v1822_v2, %v1477_v13  ;;  %v1484_v16 = vmul.f32 %v1824_v12, %v1483_v48 }
 0x369   : > { %v1506_v51 = vmul.f32 %v1481_v15, %v2499_v63 }
 0x36a   : > { %v1485_v17 = vmul.f32 0.5, %v1484_v16 }
 0x36b   : > { %v1526_v18 = vmul.f32 %v2515_v57, %v1506_v51 }
 0x36c   : > { %v1486_v20 = vsub.f32 1.5, %v1485_v17 }
 0x36d   : > { %v1546_v22 = vadd.f32 %v2520_v54, %v1526_v18 }
 0x36e   : > { %v1487_v23 = vmul.f32 %v1824_v12, %v1486_v20 }
 0x36f   : > { %1562 = vst [vmem:[%s2528_s17 + $0x70] sm:$0xff] %v1546_v22 }
 0x370   : > { %v1491_v63 = vsel %vm1490_vm0, %v1824_v12, %v1487_v23 }
 0x371   : > { %v1507_v25 = vmul.f32 %v1491_v63, %v2505_v9 }
 0x373   : > { %v1527_v26 = vmul.f32 %v2515_v57, %v1507_v25 }
 0x375   : > { %v1547_v27 = vadd.f32 %v2520_v54, %v1527_v26 }
 0x377   : > { %1563 = vst [vmem:[%s2528_s17 + $0x78] sm:$0xff] %v1547_v27 }
 0x378   : > { %1988 = shalt.err (!%p1985_p10)
}
 0x379   : > { %s2045_s28 = smov 128   ;;  %s2046_s17 = smov 8  }
 0x37a   : > { %1718 = dma.vmem_to_hbm [thread:$0]  (%p2182_p3), %s1578_s15, 2048, %s1580_s13, %s1565_s20, %s2045_s28, %s2045_s28, %s2046_s17  }
 0x37b PF: > { %s1594_s3 = sand.u32 1, %s2023_s30   ;;  %p2663_p12 = scmp.ge.s32.totalorder %s2035_s12, 2 }
 0x37c   : > { %s1595_s5 = scalar_lea.sflag [#allocation4], %s1594_s3 }
 0x37d   : > { %p1735_p13 = pnand %p2663_p12, %p2132_p6 }
 0x37f   : > { %p1736_p0 = pneg %p1735_p13 }
 0x381   : > { %2018 = dma.done.wait (%p1736_p0), %s1595_s5, 2048  }
 0x382   : > { %2020 = vsyncadd (%p1736_p0), %s1595_s5, 4294965248  ;;  %p24_p5 = scmp.ge.s32.totalorder %s2169_s29, 4   ;;  %s2664_s30 = smov %s2027_s10 }
 0x383   : > { %s2665_s10 = smov %s2031_s11  ;;  %s2666_s11 = smov %s2178_s26 }
 0x384   : > { %s2667_s12 = smov %s2169_s29  ;;  %26 = sbr.rel (!%p24_p5) target bundleno = 11 (0xb), region = 113 }
 0x389   :  { %1601 = vsyncpa [#allocation3], 1 }
 0x38a   :  { %1603 = vsyncpa [#allocation3 + $0x1], 1 }
 0x38b   :  { %1604 = vsyncpa [#allocation6], 1 }
 0x38c   :  { %1605 = vsyncpa [#allocation9], 1 }
 0x38d   :  { %1606 = vsyncpa [#allocation4], 1 }
 0x38e   :  { %1608 = vsyncpa [#allocation4 + $0x1], 1 }

// kernel: _ffn_pallas.1
= control target key start
LH: loop header
LB: loop body
LE: loop exit
PB: predicated region body
PF: predicated region fallthrough
CT: control target
= control target key end

     0   :  { %s2637_s0 = inlined_call_operand.hbm [shape: f32[256,128], index: 0, kind: input, shape index: {}]   ;;  %s2638_s1 = inlined_call_operand.hbm [shape: f32[128,256], index: 1, kind: input, shape index: {}]   ;;  %s2639_s2 = inlined_call_operand.vmem [shape: f32[1,256], index: 2, kind: input, shape index: {}]   ;;  %s2640_s3 = inlined_call_operand.hbm [shape: f32[256,256], index: 3, kind: input, shape index: {}]   ;;  %s2641_s4 = inlined_call_operand.vmem [shape: f32[1,256], index: 4, kind: input, shape index: {}]   ;;  %s2642_s5 = inlined_call_operand.hbm [shape: f32[256,128], index: 5, kind: input, shape index: {}]   ;;  %s2643_s6 = inlined_call_operand.vmem [shape: f32[1,128], index: 6, kind: input, shape index: {}]   ;;  %s2644_s7 = inlined_call_operand.vmem [shape: f32[1,128], index: 7, kind: input, shape index: {}]   ;;  %s2645_s8 = inlined_call_operand.vmem [shape: f32[1,128], index: 8, kind: input, shape index: {}]   ;;  %s2646_s9 = inlined_call_operand.hbm [shape: f32[256,128], index: 9, kind: output, shape index: {}]  }
   0x1   :  { %2649 = sst [smem:[#allocation15_spill]] %s2638_s1 }
   0x2   :  { %2650 = sst [smem:[#allocation16_spill]] %s2640_s3 }
   0x3   :  { %2651 = sst [smem:[#allocation17_spill]] %s2642_s5 }
   0x4   :  { %14 = vsyncpa [#allocation3], 0 }
   0x5   :  { %16 = vsyncpa [#allocation3 + $0x1], 0 }
   0x6   :  { %17 = vsyncpa [#allocation6], 0 }
   0x7   :  { %18 = vsyncpa [#allocation9], 0 }
   0x8   :  { %19 = vsyncpa [#allocation4], 0 }
   0x9   :  { %21 = vsyncpa [#allocation4 + $0x1], 0  ;;  %s2097_s30 = smov 0   ;;  %s2099_s10 = smov 0  }
   0xa   :  { %s2101_s11 = smov 0   ;;  %s2103_s12 = smov 0  }
   0xb LB: > { %s2118_s13 = sadd.s32 4294967295, %s2035_s12   ;;  %s1682_s14 = sadd.s32 4294967294, %s2035_s12   ;;  %s2035_s12 = sphi %s2103_s12, %s2667_s12   ;;  %s2031_s11 = sphi %s2101_s11, %s2666_s11   ;;  %s2027_s10 = sphi %s2099_s10, %s2665_s10   ;;  %s2023_s30 = sphi %s2097_s30, %s2664_s30  }
   0xc   : > { %p47_p0 = scmp.ne.s32.totalorder %s2027_s10, %s2023_s30  ;;  %p48_p1 = scmp.eq.s32.totalorder %s2118_s13, 0 }
   0xd   : > { %p239_p2 = scmp.eq.s32.totalorder %s2118_s13, 1  ;;  %p245_p3 = scmp.eq.s32.totalorder %s1682_s14, 1 }
   0xe   : > { %p2127_p4 = por %p48_p1, %p47_p0  ;;  %p1683_p5 = scmp.ge.s32.totalorder %s2035_s12, 1 }
   0xf   : > { %p2132_p6 = por %p245_p3, %p47_p0  ;;  %p252_p7 = scmp.lt.s32.totalorder %s2035_s12, 3 }
  0x10   : > { %s2654_s1 = sld [smem:[#allocation15_spill]]  ;;  %s2037_s21 = smov [#allocation5]  }
  0x11   : > { %p2140_p8 = pnand %p1683_p5, %p252_p7  ;;  %s265_s22 = sshll.u32 %s2037_s21, 4  ;;  %s266_s22 = int_to_ptr.vmem [resolvable:$true] %s265_s22 }
  0x12   : > { %s2657_s3 = sld [smem:[#allocation16_spill]]  ;;  %s2038_s27 = smov 256  }
  0x13   : > { %p1720_p9 = pneg %p2140_p8  ;;  %s2039_s28 = smov 16  }
  0x14   : > { %s2040_s29 = smov [#allocation7]   ;;  %s2658_s5 = sld [smem:[#allocation17_spill]] }
  0x15   : > { %p2148_p10 = pnand %p1720_p9, %p48_p1  ;;  %s282_s14 = sshll.u32 %s2040_s29, 4  ;;  %s283_s14 = int_to_ptr.vmem [resolvable:$true] %s282_s14 }
  0x16   : > { %s263_s19 = sshll.u32 %s2654_s1, 4  ;;  %s2041_s24 = smov [#allocation8]   ;;  %s264_s19 = int_to_ptr.hbm [resolvable:$true] %s263_s19 }
  0x17   : > { %1723 = dma.hbm_to_vmem [thread:$0]  (!%p2148_p10), %s264_s19, 4096, %s266_s22, [#allocation6], %s2038_s27, %s2038_s27, %s2039_s28  }
  0x18   : > { %s280_s26 = sshll.u32 %s2657_s3, 4  ;;  %s299_s19 = sshll.u32 %s2041_s24, 4  ;;  %s281_s26 = int_to_ptr.hbm [resolvable:$true] %s280_s26  ;;  %s300_s19 = int_to_ptr.vmem [resolvable:$true] %s299_s19 }
  0x19   : > { %1726 = dma.hbm_to_vmem [thread:$0]  (!%p2148_p10), %s281_s26, 8192, %s283_s14, [#allocation6], %s2038_s27, %s2038_s27, %s2039_s28  }
  0x1a   : > { %s297_s21 = sshll.u32 %s2658_s5, 4  ;;  %s2647_s22 = smov 128   ;;  %s298_s21 = int_to_ptr.hbm [resolvable:$true] %s297_s21 }
  0x1b   : > { %s2648_s25 = smov 8   ;;  %s2169_s29 = sadd.s32 1, %s2035_s12  }
  0x1c   : > { %1729 = dma.hbm_to_vmem [thread:$0]  (!%p2148_p10), %s298_s21, 4096, %s300_s19, [#allocation9], %s2647_s22, %s2647_s22, %s2648_s25  }
  0x1d   : > { %s31_s17 = ssub.s32 %s2035_s12, %s2169_s29  ;;  %s34_s18 = sadd.s32 1, %s2031_s11 }
  0x1e   : > { %p32_p12 = scmp.eq.s32.totalorder %s31_s17, 0  ;;  %p41_p13 = scmp.ne.s32.totalorder %s2031_s11, %s2027_s10 }
  0x1f   : > { %p42_p0 = scmp.eq.s32.totalorder %s2035_s12, 0  ;;  %p1741_p5 = scmp.lt.s32.totalorder %s2035_s12, 2 }
  0x20   : > { %s2178_s26 = scalar_select %p32_p12, %s2031_s11, %s34_s18  }
  0x21   : > { %p2182_p3 = por %p239_p2, %p41_p13  ;;  %s322_s23 = sand.u32 1, %s2031_s11  }
  0x22   : > { %s1702_s28 = sshll.u32 %s2035_s12, 7  ;;  %p43_p7 = por %p42_p0, %p41_p13 }
  0x23   : > { %s1688_s14 = sshll.u32 %s322_s23, 7  ;;  %s331_s19 = scalar_lea.hbm %s2637_s0, %s1702_s28 }
  0x24   : > { %s332_s22 = sshll.u32 %s331_s19, 4  ;;  %s326_s17 = scalar_lea.vmem [#allocation2], %s1688_s14  ;;  %s333_s22 = int_to_ptr.hbm [resolvable:$true] %s332_s22 }
  0x25   : > { %s334_s25 = sshll.u32 %s326_s17, 4  ;;  %p2192_p9 = pnand %p1741_p5, %p43_p7  ;;  %s335_s25 = int_to_ptr.vmem [resolvable:$true] %s334_s25 }
  0x26   : > { %s323_s1 = scalar_lea.sflag [#allocation3], %s322_s23  ;;  %s1931_s3 = sshra.s32 %s333_s22, 4  ;;  %s1932_s3 = int_to_ptr.hbm [resolvable:$true] %s1931_s3 }
  0x27   : > { %s1933_s5 = scalar_lea.hbm %s1932_s3, 128  ;;  %p1935_p10 = pneg %p2192_p9 }
  0x28   : > { %p1934_p2 = scmp.ne.s32.totalorder %s1932_s3, %s1933_s5  ;;  %s1938_s14 = scalar_lea.hbm %s2637_s0, 256 }
  0x29   : > { %p1939_p0 = scmp.lt.s32.totalorder %s1932_s3, %s2637_s0  ;;  %p1940_p5 = scmp.lt.s32.totalorder %s1938_s14, %s1933_s5 }
  0x2a   : > { %p1936_p12 = pnand %p1935_p10, %p1934_p2 }
  0x2b   : > { %p1941_p7 = por %p1940_p5, %p1939_p0 }
  0x2c   : > { %p1937_p13 = pneg %p1936_p12 }
  0x2e   : > { %p1942_p11 = pnand %p1941_p7, %p1937_p13 }
  0x30   : > { %1945 = shalt.err (!%p1942_p11)
}
  0x31   : > { %s2661_s23 = smov 8   ;;  %s2662_s17 = smov 128  }
  0x32   : > { %1733 = dma.hbm_to_vmem [thread:$0]  (!%p2192_p9), %s333_s22, 2048, %s335_s25, %s323_s1, %s2662_s17, %s2662_s17, %s2661_s23  }
  0x33   : > { %346 = sbr.rel (%p2140_p8) target bundleno = 891 (0x37b), region = 56  ;;  %s2212_s28 = sand.u32 (!%p2140_p8), 1, %s2027_s10  }
  0x34   : > { %s1692_s3 = sshll.u32 (!%p2140_p8), %s2212_s28, 7  ;;  %s349_s5 = scalar_lea.sflag (!%p2140_p8), [#allocation3], %s2212_s28 }
  0x35   : > { %s2218_s21 = scalar_lea.vmem (!%p2140_p8), [#allocation2], %s1692_s3 }
  0x38   : > { %2006 = dma.done.wait (%p2127_p4), %s349_s5, 2048  }
  0x39   : > { %2008 = vsyncadd (%p2127_p4), %s349_s5, 4294965248 }
  0x3a   : > { %2010 = dma.done.wait (%p48_p1), [#allocation6], 12288  }
  0x3b   : > { %2012 = vsyncadd (%p48_p1), [#allocation6], 4294955008 }
  0x3c   : > { %2014 = dma.done.wait (%p48_p1), [#allocation9], 4096  }
  0x3d   : > { %2016 = vsyncadd (%p48_p1), [#allocation9], 4294963200  ;;  %v451_v0 = vld [vmem:[#allocation5 + $0xf0] sm:$0xff]  ;;  %v449_v1 = vld [vmem:[#allocation5 + $0xe0] sm:$0xff]  ;;  %s2528_s17 = scalar_lea.vmem [#allocation10], %s1692_s3  ;;  %s1703_s3 = sshll.u32 %s2118_s13, 7 }
  0x3e   : > { %v452_v2 = vld [vmem:[#allocation5 + $0xf8] sm:$0xff]  ;;  %459 = vmatpush.msra.mxu0 %v451_v0  ;;  %v450_v3 = vld [vmem:[#allocation5 + $0xe8] sm:$0xff]  ;;  %v447_v4 = vld [vmem:[#allocation5 + $0xd0] sm:$0xff]  ;;  %s1576_s1 = scalar_lea.hbm %s2646_s9, %s1703_s3  ;;  %s1577_s15 = sshll.u32 %s2528_s17, 4  ;;  %s1578_s15 = int_to_ptr.vmem [resolvable:$true] %s1577_s15 }
  0x3f   : > { %524 = vmatpush.msra.mxu1 %v452_v2  ;;  %v448_v5 = vld [vmem:[#allocation5 + $0xd8] sm:$0xff]  ;;  %v445_v6 = vld [vmem:[#allocation5 + $0xc0] sm:$0xff]  ;;  %v446_v7 = vld [vmem:[#allocation5 + $0xc8] sm:$0xff]  ;;  %s1579_s13 = sshll.u32 %s1576_s1, 4  ;;  %s1565_s20 = scalar_lea.sflag [#allocation4], %s2212_s28  ;;  %s1580_s13 = int_to_ptr.hbm [resolvable:$true] %s1579_s13 }
  0x40   : > { %460 = vmatpush.msra.mxu0 %v449_v1  ;;  %v443_v8 = vld [vmem:[#allocation5 + $0xb0] sm:$0xff]  ;;  %v444_v9 = vld [vmem:[#allocation5 + $0xb8] sm:$0xff]  ;;  %v441_v10 = vld [vmem:[#allocation5 + $0xa0] sm:$0xff]  ;;  %s1975_s22 = sshra.s32 %s1580_s13, 4  ;;  %s1981_s24 = scalar_lea.hbm %s2646_s9, 256  ;;  %s1976_s22 = int_to_ptr.hbm [resolvable:$true] %s1975_s22 }
  0x41   : > { %525 = vmatpush.msra.mxu1 %v450_v3  ;;  %v442_v11 = vld [vmem:[#allocation5 + $0xa8] sm:$0xff]  ;;  %v439_v12 = vld [vmem:[#allocation5 + $0x90] sm:$0xff]  ;;  %v440_v13 = vld [vmem:[#allocation5 + $0x98] sm:$0xff]  ;;  %s1977_s25 = scalar_lea.hbm %s1976_s22, 128  ;;  %p1982_p11 = scmp.lt.s32.totalorder %s1976_s22, %s2646_s9 }
  0x42   : > { %461 = vmatpush.msra.mxu0 %v447_v4  ;;  %v437_v14 = vld [vmem:[#allocation5 + $0x80] sm:$0xff]  ;;  %v438_v15 = vld [vmem:[#allocation5 + $0x88] sm:$0xff]  ;;  %v435_v16 = vld [vmem:[#allocation5 + $0x70] sm:$0xff]  ;;  %p1978_p1 = scmp.ne.s32.totalorder %s1976_s22, %s1977_s25  ;;  %p1983_p9 = scmp.lt.s32.totalorder %s1981_s24, %s1977_s25 }
  0x43   : > { %526 = vmatpush.msra.mxu1 %v448_v5  ;;  %v436_v17 = vld [vmem:[#allocation5 + $0x78] sm:$0xff]  ;;  %v433_v18 = vld [vmem:[#allocation5 + $0x60] sm:$0xff]  ;;  %v434_v19 = vld [vmem:[#allocation5 + $0x68] sm:$0xff] }
  0x44   : > { %462 = vmatpush.msra.mxu0 %v445_v6  ;;  %v431_v20 = vld [vmem:[#allocation5 + $0x50] sm:$0xff]  ;;  %v432_v21 = vld [vmem:[#allocation5 + $0x58] sm:$0xff]  ;;  %v429_v22 = vld [vmem:[#allocation5 + $0x40] sm:$0xff]  ;;  %p1979_p4 = pnand %p1978_p1, %p2182_p3  ;;  %p1984_p2 = por %p1983_p9, %p1982_p11 }
  0x45   : > { %527 = vmatpush.msra.mxu1 %v446_v7  ;;  %v430_v23 = vld [vmem:[#allocation5 + $0x48] sm:$0xff]  ;;  %v427_v24 = vld [vmem:[#allocation5 + $0x30] sm:$0xff]  ;;  %v428_v25 = vld [vmem:[#allocation5 + $0x38] sm:$0xff] }
  0x46   : > { %463 = vmatpush.msra.mxu0 %v443_v8  ;;  %v425_v26 = vld [vmem:[#allocation5 + $0x20] sm:$0xff]  ;;  %v426_v27 = vld [vmem:[#allocation5 + $0x28] sm:$0xff]  ;;  %v423_v28 = vld [vmem:[#allocation5 + $0x10] sm:$0xff]  ;;  %p1980_p8 = pneg %p1979_p4 }
  0x47   : > { %528 = vmatpush.msra.mxu1 %v444_v9  ;;  %v424_v29 = vld [vmem:[#allocation5 + $0x18] sm:$0xff]  ;;  %v421_v30 = vld [vmem:[#allocation5] sm:$0xff]  ;;  %v422_v31 = vld [vmem:[#allocation5 + $0x8] sm:$0xff] }
  0x48   : > { %464 = vmatpush.msra.mxu0 %v441_v10  ;;  %v405_v32 = vld [vmem:[%s2218_s21] sm:$0xff]  ;;  %v652_v33 = vld [vmem:[#allocation7 + $0xf8] sm:$0xff]  ;;  %v650_v35 = vld [vmem:[#allocation7 + $0xe8] sm:$0xff]  ;;  %p1985_p10 = pnand %p1984_p2, %p1980_p8 }
  0x49   : > { %529 = vmatpush.msra.mxu1 %v442_v11  ;;  %v684_v34 = vld [vmem:[#allocation7 + $0x1f8] sm:$0xff]  ;;  %v682_v36 = vld [vmem:[#allocation7 + $0x1e8] sm:$0xff]  ;;  %v407_v44 = vld [vmem:[%s2218_s21 + $0x10] sm:$0xff] }
  0x4a   : > { %465 = vmatpush.msra.mxu0 %v439_v12  ;;  %v648_v37 = vld [vmem:[#allocation7 + $0xd8] sm:$0xff]  ;;  %v646_v39 = vld [vmem:[#allocation7 + $0xc8] sm:$0xff]  ;;  %v409_v50 = vld [vmem:[%s2218_s21 + $0x20] sm:$0xff] }
  0x4b   : > { %530 = vmatpush.msra.mxu1 %v440_v13  ;;  %v680_v38 = vld [vmem:[#allocation7 + $0x1d8] sm:$0xff]  ;;  %v678_v40 = vld [vmem:[#allocation7 + $0x1c8] sm:$0xff]  ;;  %v411_v56 = vld [vmem:[%s2218_s21 + $0x30] sm:$0xff] }
  0x4c   : > { %466 = vmatpush.msra.mxu0 %v437_v14  ;;  %v406_v41 = vld [vmem:[%s2218_s21 + $0x8] sm:$0xff]  ;;  %v644_v42 = vld [vmem:[#allocation7 + $0xb8] sm:$0xff]  ;;  %v413_v62 = vld [vmem:[%s2218_s21 + $0x40] sm:$0xff] }
  0x4d   : > { %531 = vmatpush.msra.mxu1 %v438_v15  ;;  %v676_v43 = vld [vmem:[#allocation7 + $0x1b8] sm:$0xff]  ;;  %v642_v45 = vld [vmem:[#allocation7 + $0xa8] sm:$0xff]  ;;  %v651_v0 = vld [vmem:[#allocation7 + $0xf0] sm:$0xff] }
  0x4e   : > { %467 = vmatpush.msra.mxu0 %v435_v16  ;;  %v674_v46 = vld [vmem:[#allocation7 + $0x1a8] sm:$0xff]  ;;  %v408_v47 = vld [vmem:[%s2218_s21 + $0x18] sm:$0xff]  ;;  %691 = vmatpush.msra.mxu2 %v651_v0  ;;  %v649_v2 = vld [vmem:[#allocation7 + $0xe0] sm:$0xff] }
  0x4f   : > { %532 = vmatpush.msra.mxu1 %v436_v17  ;;  %v640_v48 = vld [vmem:[#allocation7 + $0x98] sm:$0xff]  ;;  %v638_v51 = vld [vmem:[#allocation7 + $0x88] sm:$0xff]  ;;  %v683_v3 = vld [vmem:[#allocation7 + $0x1f0] sm:$0xff] }
  0x50   : > { %468 = vmatpush.msra.mxu0 %v433_v18  ;;  %v672_v49 = vld [vmem:[#allocation7 + $0x198] sm:$0xff]  ;;  %v670_v52 = vld [vmem:[#allocation7 + $0x188] sm:$0xff]  ;;  %756 = vmatpush.msra.mxu3 %v683_v3  ;;  %v647_v4 = vld [vmem:[#allocation7 + $0xd0] sm:$0xff] }
  0x51   : > { %533 = vmatpush.msra.mxu1 %v434_v19  ;;  %v410_v53 = vld [vmem:[%s2218_s21 + $0x28] sm:$0xff]  ;;  %v636_v54 = vld [vmem:[#allocation7 + $0x78] sm:$0xff]  ;;  %v681_v5 = vld [vmem:[#allocation7 + $0x1e0] sm:$0xff]  ;;  %692 = vmatpush.msra.mxu2 %v649_v2 }
  0x52   : > { %469 = vmatpush.msra.mxu0 %v431_v20  ;;  %v668_v55 = vld [vmem:[#allocation7 + $0x178] sm:$0xff]  ;;  %v634_v57 = vld [vmem:[#allocation7 + $0x68] sm:$0xff]  ;;  %757 = vmatpush.msra.mxu3 %v681_v5  ;;  %v645_v7 = vld [vmem:[#allocation7 + $0xc0] sm:$0xff] }
  0x53   : > { %534 = vmatpush.msra.mxu1 %v432_v21  ;;  %v666_v58 = vld [vmem:[#allocation7 + $0x168] sm:$0xff]  ;;  %v412_v59 = vld [vmem:[%s2218_s21 + $0x38] sm:$0xff]  ;;  %693 = vmatpush.msra.mxu2 %v647_v4  ;;  %v679_v8 = vld [vmem:[#allocation7 + $0x1d0] sm:$0xff] }
  0x54   : > { %470 = vmatpush.msra.mxu0 %v429_v22  ;;  %v632_v60 = vld [vmem:[#allocation7 + $0x58] sm:$0xff]  ;;  %v630_v63 = vld [vmem:[#allocation7 + $0x48] sm:$0xff]  ;;  %758 = vmatpush.msra.mxu3 %v679_v8  ;;  %v643_v10 = vld [vmem:[#allocation7 + $0xb0] sm:$0xff] }
  0x55   : > { %535 = vmatpush.msra.mxu1 %v430_v23  ;;  %v664_v61 = vld [vmem:[#allocation7 + $0x158] sm:$0xff]  ;;  %v662_v1 = vld [vmem:[#allocation7 + $0x148] sm:$0xff]  ;;  %694 = vmatpush.msra.mxu2 %v645_v7  ;;  %v677_v11 = vld [vmem:[#allocation7 + $0x1c0] sm:$0xff] }
  0x56   : > { %471 = vmatpush.msra.mxu0 %v427_v24  ;;  %v414_v6 = vld [vmem:[%s2218_s21 + $0x48] sm:$0xff]  ;;  %v628_v9 = vld [vmem:[#allocation7 + $0x38] sm:$0xff]  ;;  %v641_v13 = vld [vmem:[#allocation7 + $0xa0] sm:$0xff]  ;;  %759 = vmatpush.msra.mxu3 %v677_v11 }
  0x57   : > { %536 = vmatpush.msra.mxu1 %v428_v25  ;;  %v660_v12 = vld [vmem:[#allocation7 + $0x138] sm:$0xff]  ;;  %v675_v14 = vld [vmem:[#allocation7 + $0x1b0] sm:$0xff]  ;;  %695 = vmatpush.msra.mxu2 %v643_v10  ;;  %v673_v16 = vld [vmem:[#allocation7 + $0x1a0] sm:$0xff] }
  0x58   : > { %472 = vmatpush.msra.mxu0 %v425_v26  ;;  %v639_v15 = vld [vmem:[#allocation7 + $0x90] sm:$0xff]  ;;  %760 = vmatpush.msra.mxu3 %v675_v14  ;;  %v637_v18 = vld [vmem:[#allocation7 + $0x80] sm:$0xff]  ;;  %v626_v20 = vld [vmem:[#allocation7 + $0x28] sm:$0xff] }
  0x59   : > { %537 = vmatpush.msra.mxu1 %v426_v27  ;;  %v415_v17 = vld [vmem:[%s2218_s21 + $0x50] sm:$0xff]  ;;  %696 = vmatpush.msra.mxu2 %v641_v13  ;;  %v669_v22 = vld [vmem:[#allocation7 + $0x180] sm:$0xff]  ;;  %v658_v23 = vld [vmem:[#allocation7 + $0x128] sm:$0xff] }
  0x5a   : > { %473 = vmatpush.msra.mxu0 %v423_v28  ;;  %761 = vmatpush.msra.mxu3 %v673_v16  ;;  %v671_v19 = vld [vmem:[#allocation7 + $0x190] sm:$0xff]  ;;  %v633_v24 = vld [vmem:[#allocation7 + $0x60] sm:$0xff]  ;;  %v416_v28 = vld [vmem:[%s2218_s21 + $0x58] sm:$0xff] }
  0x5b   : > { %538 = vmatpush.msra.mxu1 %v424_v29  ;;  %697 = vmatpush.msra.mxu2 %v639_v15  ;;  %v635_v21 = vld [vmem:[#allocation7 + $0x70] sm:$0xff]  ;;  %v665_v27 = vld [vmem:[#allocation7 + $0x160] sm:$0xff]  ;;  %v994_v7 = vld [vmem:[#allocation8 + $0x58] sm:$0xff] }
  0x5c   : > { %474 = vmatpush.msra.mxu0 %v421_v30  ;;  %762 = vmatpush.msra.mxu3 %v671_v19  ;;  %v667_v25 = vld [vmem:[#allocation7 + $0x170] sm:$0xff]  ;;  %v629_v29 = vld [vmem:[#allocation7 + $0x40] sm:$0xff] }
  0x5d   : > { %539 = vmatpush.msra.mxu1 %v422_v31  ;;  %475 = vmatmul.f32.vlgmr.msra.gmra.mxu0 %v405_v32  ;;  %v631_v26 = vld [vmem:[#allocation7 + $0x50] sm:$0xff]  ;;  %v624_v31 = vld [vmem:[#allocation7 + $0x18] sm:$0xff]  ;;  %v1011_v4 = vld [vmem:[#allocation8 + $0xe0] sm:$0xff] }
  0x5e   : > { %540 = vmatmul.f32.vlgmr.msra.gmra.mxu1 %v405_v32  ;;  %821 = vmatpush.msrb.mxu0 %v652_v33  ;;  %v663_v30 = vld [vmem:[#allocation7 + $0x150] sm:$0xff]  ;;  %v661_v33 = vld [vmem:[#allocation7 + $0x140] sm:$0xff] }
  0x5f   : > { %886 = vmatpush.msrb.mxu1 %v684_v34  ;;  %698 = vmatpush.msra.mxu2 %v637_v18  ;;  %v627_v32 = vld [vmem:[#allocation7 + $0x30] sm:$0xff]  ;;  %v656_v34 = vld [vmem:[#allocation7 + $0x118] sm:$0xff] }
  0x60   : > { %822 = vmatpush.msrb.mxu0 %v650_v35  ;;  %763 = vmatpush.msra.mxu3 %v669_v22  ;;  %v625_v35 = vld [vmem:[#allocation7 + $0x20] sm:$0xff]  ;;  %v993_v15 = vld [vmem:[#allocation8 + $0x50] sm:$0xff] }
  0x61   : > { %887 = vmatpush.msrb.mxu1 %v682_v36  ;;  %699 = vmatpush.msra.mxu2 %v635_v21  ;;  %v659_v36 = vld [vmem:[#allocation7 + $0x130] sm:$0xff] }
  0x62   : > { %823 = vmatpush.msrb.mxu0 %v648_v37  ;;  %764 = vmatpush.msra.mxu3 %v667_v25  ;;  %v417_v37 = vld [vmem:[%s2218_s21 + $0x60] sm:$0xff] }
  0x63   : > { %888 = vmatpush.msrb.mxu1 %v680_v38  ;;  %700 = vmatpush.msra.mxu2 %v633_v24  ;;  %v623_v38 = vld [vmem:[#allocation7 + $0x10] sm:$0xff] }
  0x64   : > { %824 = vmatpush.msrb.mxu0 %v646_v39  ;;  %765 = vmatpush.msra.mxu3 %v665_v27  ;;  %v657_v39 = vld [vmem:[#allocation7 + $0x120] sm:$0xff] }
  0x65   : > { %889 = vmatpush.msrb.mxu1 %v678_v40  ;;  %478 = vmatmul.f32.gmra.mxu0 %v406_v41  ;;  %v621_v40 = vld [vmem:[#allocation7] sm:$0xff] }
  0x66   : > { %543 = vmatmul.f32.gmra.mxu1 %v406_v41  ;;  %825 = vmatpush.msrb.mxu0 %v644_v42  ;;  %v655_v41 = vld [vmem:[#allocation7 + $0x110] sm:$0xff]  ;;  %v622_v42 = vld [vmem:[#allocation7 + $0x8] sm:$0xff] }
  0x67   : > { %890 = vmatpush.msrb.mxu1 %v676_v43  ;;  %701 = vmatpush.msra.mxu2 %v631_v26  ;;  %v653_v43 = vld [vmem:[#allocation7 + $0x100] sm:$0xff] }
  0x68   : > { %826 = vmatpush.msrb.mxu0 %v642_v45  ;;  %766 = vmatpush.msra.mxu3 %v663_v30  ;;  %v418_v45 = vld [vmem:[%s2218_s21 + $0x68] sm:$0xff] }
  0x69   : > { %891 = vmatpush.msrb.mxu1 %v674_v46  ;;  %702 = vmatpush.msra.mxu2 %v629_v29  ;;  %v998_v46 = vld [vmem:[#allocation8 + $0x78] sm:$0xff]  ;;  %v1008_v30 = vld [vmem:[#allocation8 + $0xc8] sm:$0xff] }
  0x6a   : > { %827 = vmatpush.msrb.mxu0 %v640_v48  ;;  %767 = vmatpush.msra.mxu3 %v661_v33  ;;  %v1014_v48 = vld [vmem:[#allocation8 + $0xf8] sm:$0xff] }
  0x6b   : > { %892 = vmatpush.msrb.mxu1 %v672_v49  ;;  %703 = vmatpush.msra.mxu2 %v627_v32  ;;  %v997_v49 = vld [vmem:[#allocation8 + $0x70] sm:$0xff] }
  0x6c   : > { %828 = vmatpush.msrb.mxu0 %v638_v51  ;;  %768 = vmatpush.msra.mxu3 %v659_v36  ;;  %v1013_v51 = vld [vmem:[#allocation8 + $0xf0] sm:$0xff] }
  0x6d   : > { %481 = vmatmul.f32.gmra.mxu0 %v407_v44  ;;  %893 = vmatpush.msrb.mxu1 %v670_v52  ;;  %v453_v52 = vld [vmem:[%s2639_s2] sm:$0x3] }
  0x6e   : > { %546 = vmatmul.f32.gmra.mxu1 %v407_v44  ;;  %829 = vmatpush.msrb.mxu0 %v636_v54  ;;  %v654_v44 = vld [vmem:[#allocation7 + $0x108] sm:$0xff]  ;;  %v2253_v54 = vperm.slane %v453_v52, 1 }
  0x6f   : > { %894 = vmatpush.msrb.mxu1 %v668_v55  ;;  %704 = vmatpush.msra.mxu2 %v625_v35  ;;  %v996_v55 = vld [vmem:[#allocation8 + $0x68] sm:$0xff] }
  0x70   : > { %830 = vmatpush.msrb.mxu0 %v634_v57  ;;  %769 = vmatpush.msra.mxu3 %v657_v39  ;;  %v990_v39 = vld [vmem:[#allocation8 + $0x38] sm:$0xff] }
  0x71   : > { %895 = vmatpush.msrb.mxu1 %v666_v58  ;;  %705 = vmatpush.msra.mxu2 %v623_v38  ;;  %v1007_v38 = vld [vmem:[#allocation8 + $0xc0] sm:$0xff] }
  0x72   : > { %831 = vmatpush.msrb.mxu0 %v632_v60  ;;  %770 = vmatpush.msra.mxu3 %v655_v41  ;;  %v1012_v60 = vld [vmem:[#allocation8 + $0xe8] sm:$0xff] }
  0x73   : > { %896 = vmatpush.msrb.mxu1 %v664_v61  ;;  %706 = vmatpush.msra.mxu2 %v621_v40 }
  0x74   : > { %832 = vmatpush.msrb.mxu0 %v630_v63  ;;  %771 = vmatpush.msra.mxu3 %v653_v43  ;;  %v995_v63 = vld [vmem:[#allocation8 + $0x60] sm:$0xff] }
  0x75   : > { %484 = vmatmul.f32.gmra.mxu0 %v408_v47  ;;  %897 = vmatpush.msrb.mxu1 %v662_v1 }
  0x76   : > { %549 = vmatmul.f32.gmra.mxu1 %v408_v47  ;;  %833 = vmatpush.msrb.mxu0 %v628_v9  ;;  %v419_v47 = vld [vmem:[%s2218_s21 + $0x70] sm:$0xff] }
  0x77   : > { %898 = vmatpush.msrb.mxu1 %v660_v12  ;;  %1019 = vmatpush.msrb.mxu2 %v998_v46  ;;  %v1010_v12 = vld [vmem:[#allocation8 + $0xd8] sm:$0xff] }
  0x78   : > { %834 = vmatpush.msrb.mxu0 %v626_v20  ;;  %1084 = vmatpush.msrb.mxu3 %v1014_v48  ;;  %v1009_v20 = vld [vmem:[#allocation8 + $0xd0] sm:$0xff]  ;;  %v1006_v46 = vld [vmem:[#allocation8 + $0xb8] sm:$0xff] }
  0x79   : > { %899 = vmatpush.msrb.mxu1 %v658_v23  ;;  %1020 = vmatpush.msrb.mxu2 %v997_v49  ;;  %v992_v23 = vld [vmem:[#allocation8 + $0x48] sm:$0xff] }
  0x7a   : > { %835 = vmatpush.msrb.mxu0 %v624_v31  ;;  %1085 = vmatpush.msrb.mxu3 %v1013_v51  ;;  %v991_v31 = vld [vmem:[#allocation8 + $0x40] sm:$0xff] }
  0x7b   : > { %900 = vmatpush.msrb.mxu1 %v656_v34  ;;  %1021 = vmatpush.msrb.mxu2 %v996_v55 }
  0x7c   : > { %836 = vmatpush.msrb.mxu0 %v622_v42  ;;  %1086 = vmatpush.msrb.mxu3 %v1012_v60 }
  0x7d   : > { %487 = vmatmul.f32.gmra.mxu0 %v409_v50  ;;  %901 = vmatpush.msrb.mxu1 %v654_v44 }
  0x7e   : > { %552 = vmatmul.f32.gmra.mxu1 %v409_v50  ;;  %v420_v50 = vld [vmem:[%s2218_s21 + $0x78] sm:$0xff]  ;;  %1022 = vmatpush.msrb.mxu2 %v995_v63 }
  0x7f   : > { %1087 = vmatpush.msrb.mxu3 %v1011_v4 }
  0x80   : > { %1023 = vmatpush.msrb.mxu2 %v994_v7 }
  0x81   : > { %1088 = vmatpush.msrb.mxu3 %v1010_v12 }
  0x82   : > { %1024 = vmatpush.msrb.mxu2 %v993_v15 }
  0x83   : > { %1089 = vmatpush.msrb.mxu3 %v1009_v20 }
  0x84   : > { %1025 = vmatpush.msrb.mxu2 %v992_v23 }
  0x85   : > { %490 = vmatmul.f32.gmra.mxu0 %v410_v53  ;;  %1090 = vmatpush.msrb.mxu3 %v1008_v30 }
  0x86   : > { %555 = vmatmul.f32.gmra.mxu1 %v410_v53  ;;  %v2251_v53 = vperm.slane %v453_v52, 0  ;;  %1026 = vmatpush.msrb.mxu2 %v991_v31 }
  0x87   : > { %1091 = vmatpush.msrb.mxu3 %v1007_v38 }
  0x88   : > { %1027 = vmatpush.msrb.mxu2 %v990_v39 }
  0x89   : > { %1092 = vmatpush.msrb.mxu3 %v1006_v46 }
  0x8d   : > { %493 = vmatmul.f32.gmra.mxu0 %v411_v56 }
  0x8e   : > { %558 = vmatmul.f32.gmra.mxu1 %v411_v56 }
  0x95   : > { %496 = vmatmul.f32.gmra.mxu0 %v412_v59 }
  0x96   : > { %561 = vmatmul.f32.gmra.mxu1 %v412_v59 }
  0x9d   : > { %499 = vmatmul.f32.gmra.mxu0 %v413_v62 }
  0x9e   : > { %564 = vmatmul.f32.gmra.mxu1 %v413_v62 }
  0xa5   : > { %502 = vmatmul.f32.gmra.mxu0 %v414_v6 }
  0xa6   : > { %567 = vmatmul.f32.gmra.mxu1 %v414_v6 }
  0xad   : > { %505 = vmatmul.f32.gmra.mxu0 %v415_v17 }
  0xae   : > { %570 = vmatmul.f32.gmra.mxu1 %v415_v17 }
  0xb5   : > { %508 = vmatmul.f32.gmra.mxu0 %v416_v28 }
  0xb6   : > { %573 = vmatmul.f32.gmra.mxu1 %v416_v28 }
  0xbd   : > { %511 = vmatmul.f32.gmra.mxu0 %v417_v37 }
  0xbe   : > { %576 = vmatmul.f32.gmra.mxu1 %v417_v37 }
  0xc5   : > { %514 = vmatmul.f32.gmra.mxu0 %v418_v45 }
  0xc6   : > { %579 = vmatmul.f32.gmra.mxu1 %v418_v45 }
  0xcd   : > { %517 = vmatmul.f32.gmra.mxu0 %v419_v47 }
  0xce   : > { %582 = vmatmul.f32.gmra.mxu1 %v419_v47  ;;  %v989_v47 = vld [vmem:[#allocation8 + $0x30] sm:$0xff] }
  0xcf   : > { %1028 = vmatpush.msrb.mxu2 %v989_v47 }
  0xd5   : > { %520 = vmatmul.f32.gmra.mxu0 %v420_v50 }
  0xd6   : > { %585 = vmatmul.f32.gmra.mxu1 %v420_v50 }
  0xda   : > { %v476_v56 = vpop.f32.mrf.mxu0 }
  0xdb   : > { %v541_v57 = vpop.f32.mrf.mxu1  ;;  %v477_v58 = vadd.f32 %v476_v56, %v2251_v53  ;;  %v1005_v56 = vld [vmem:[#allocation8 + $0xb0] sm:$0xff] }
  0xdc   : > { %v542_v59 = vadd.f32 %v541_v57, %v2253_v54  ;;  %1093 = vmatpush.msrb.mxu3 %v1005_v56  ;;  %v988_v57 = vld [vmem:[#allocation8 + $0x28] sm:$0xff] }
  0xdd   : > { %v589_v61 = vmax.f32 %v477_v58, 0.0  ;;  %1029 = vmatpush.msrb.mxu2 %v988_v57 }
  0xde   : > { %v590_v62 = vmax.f32 %v542_v59, 0.0 }
  0xdf   : > { %707 = vmatmul.f32.vlgmr.msra.gmra.mxu2 %v589_v61  ;;  %837 = vmatmul.f32.vlgmr.msrb.gmra.mxu0 %v589_v61 }
  0xe0   : > { %772 = vmatmul.f32.vlgmr.msra.gmra.mxu3 %v590_v62  ;;  %902 = vmatmul.f32.vlgmr.msrb.gmra.mxu1 %v590_v62 }
  0xe2   : > { %v479_v0 = vpop.f32.mrf.mxu0 }
  0xe3   : > { %v544_v1 = vpop.f32.mrf.mxu1  ;;  %v480_v2 = vadd.f32 %v479_v0, %v2251_v53  ;;  %v1004_v0 = vld [vmem:[#allocation8 + $0xa8] sm:$0xff] }
  0xe4   : > { %v545_v3 = vadd.f32 %v544_v1, %v2253_v54  ;;  %1094 = vmatpush.msrb.mxu3 %v1004_v0  ;;  %v987_v1 = vld [vmem:[#allocation8 + $0x20] sm:$0xff] }
  0xe5   : > { %v591_v5 = vmax.f32 %v480_v2, 0.0  ;;  %1030 = vmatpush.msrb.mxu2 %v987_v1 }
  0xe6   : > { %v592_v6 = vmax.f32 %v545_v3, 0.0 }
  0xe7   : > { %710 = vmatmul.f32.gmra.mxu2 %v591_v5  ;;  %840 = vmatmul.f32.gmra.mxu0 %v591_v5 }
  0xe8   : > { %775 = vmatmul.f32.gmra.mxu3 %v592_v6  ;;  %905 = vmatmul.f32.gmra.mxu1 %v592_v6 }
  0xea   : > { %v482_v8 = vpop.f32.mrf.mxu0 }
  0xeb   : > { %v547_v9 = vpop.f32.mrf.mxu1  ;;  %v483_v10 = vadd.f32 %v482_v8, %v2251_v53  ;;  %v1003_v8 = vld [vmem:[#allocation8 + $0xa0] sm:$0xff] }
  0xec   : > { %v548_v11 = vadd.f32 %v547_v9, %v2253_v54  ;;  %1095 = vmatpush.msrb.mxu3 %v1003_v8  ;;  %v986_v9 = vld [vmem:[#allocation8 + $0x18] sm:$0xff] }
  0xed   : > { %v593_v13 = vmax.f32 %v483_v10, 0.0  ;;  %1031 = vmatpush.msrb.mxu2 %v986_v9 }
  0xee   : > { %v594_v14 = vmax.f32 %v548_v11, 0.0 }
  0xef   : > { %713 = vmatmul.f32.gmra.mxu2 %v593_v13  ;;  %843 = vmatmul.f32.gmra.mxu0 %v593_v13 }
  0xf0   : > { %778 = vmatmul.f32.gmra.mxu3 %v594_v14  ;;  %908 = vmatmul.f32.gmra.mxu1 %v594_v14 }
  0xf2   : > { %v485_v16 = vpop.f32.mrf.mxu0 }
  0xf3   : > { %v550_v17 = vpop.f32.mrf.mxu1  ;;  %v486_v18 = vadd.f32 %v485_v16, %v2251_v53  ;;  %v1002_v16 = vld [vmem:[#allocation8 + $0x98] sm:$0xff] }
  0xf4   : > { %v551_v19 = vadd.f32 %v550_v17, %v2253_v54  ;;  %1096 = vmatpush.msrb.mxu3 %v1002_v16  ;;  %v985_v17 = vld [vmem:[#allocation8 + $0x10] sm:$0xff] }
  0xf5   : > { %v595_v21 = vmax.f32 %v486_v18, 0.0  ;;  %1032 = vmatpush.msrb.mxu2 %v985_v17 }
  0xf6   : > { %v596_v22 = vmax.f32 %v551_v19, 0.0 }
  0xf7   : > { %716 = vmatmul.f32.gmra.mxu2 %v595_v21  ;;  %846 = vmatmul.f32.gmra.mxu0 %v595_v21 }
  0xf8   : > { %781 = vmatmul.f32.gmra.mxu3 %v596_v22  ;;  %911 = vmatmul.f32.gmra.mxu1 %v596_v22 }
  0xfa   : > { %v488_v24 = vpop.f32.mrf.mxu0 }
  0xfb   : > { %v553_v25 = vpop.f32.mrf.mxu1  ;;  %v489_v26 = vadd.f32 %v488_v24, %v2251_v53  ;;  %v1001_v24 = vld [vmem:[#allocation8 + $0x90] sm:$0xff] }
  0xfc   : > { %v554_v27 = vadd.f32 %v553_v25, %v2253_v54  ;;  %1097 = vmatpush.msrb.mxu3 %v1001_v24  ;;  %v984_v25 = vld [vmem:[#allocation8 + $0x8] sm:$0xff] }
  0xfd   : > { %v597_v28 = vmax.f32 %v489_v26, 0.0  ;;  %v1000_v26 = vld [vmem:[#allocation8 + $0x88] sm:$0xff]  ;;  %1033 = vmatpush.msrb.mxu2 %v984_v25 }
  0xfe   : > { %v598_v29 = vmax.f32 %v554_v27, 0.0  ;;  %1098 = vmatpush.msrb.mxu3 %v1000_v26 }
  0xff   : > { %719 = vmatmul.f32.gmra.mxu2 %v597_v28  ;;  %849 = vmatmul.f32.gmra.mxu0 %v597_v28 }
 0x100   : > { %784 = vmatmul.f32.gmra.mxu3 %v598_v29  ;;  %914 = vmatmul.f32.gmra.mxu1 %v598_v29 }
 0x102   : > { %v491_v32 = vpop.f32.mrf.mxu0 }
 0x103   : > { %v556_v33 = vpop.f32.mrf.mxu1  ;;  %v492_v34 = vadd.f32 %v491_v32, %v2251_v53 }
 0x104   : > { %v557_v35 = vadd.f32 %v556_v33, %v2253_v54  ;;  %v983_v33 = vld [vmem:[#allocation8] sm:$0xff] }
 0x105   : > { %v599_v36 = vmax.f32 %v492_v34, 0.0  ;;  %v999_v34 = vld [vmem:[#allocation8 + $0x80] sm:$0xff]  ;;  %1034 = vmatpush.msrb.mxu2 %v983_v33 }
 0x106   : > { %v600_v37 = vmax.f32 %v557_v35, 0.0  ;;  %1099 = vmatpush.msrb.mxu3 %v999_v34 }
 0x107   : > { %722 = vmatmul.f32.gmra.mxu2 %v599_v36  ;;  %852 = vmatmul.f32.gmra.mxu0 %v599_v36 }
 0x108   : > { %787 = vmatmul.f32.gmra.mxu3 %v600_v37  ;;  %917 = vmatmul.f32.gmra.mxu1 %v600_v37 }
 0x10a   : > { %v494_v40 = vpop.f32.mrf.mxu0 }
 0x10b   : > { %v559_v41 = vpop.f32.mrf.mxu1  ;;  %v495_v42 = vadd.f32 %v494_v40, %v2251_v53 }
 0x10c   : > { %v560_v43 = vadd.f32 %v559_v41, %v2253_v54 }
 0x10d   : > { %v601_v44 = vmax.f32 %v495_v42, 0.0 }
 0x10e   : > { %v602_v45 = vmax.f32 %v560_v43, 0.0 }
 0x10f   : > { %725 = vmatmul.f32.gmra.mxu2 %v601_v44  ;;  %855 = vmatmul.f32.gmra.mxu0 %v601_v44 }
 0x110   : > { %790 = vmatmul.f32.gmra.mxu3 %v602_v45  ;;  %920 = vmatmul.f32.gmra.mxu1 %v602_v45 }
 0x112   : > { %v497_v48 = vpop.f32.mrf.mxu0 }
 0x113   : > { %v562_v49 = vpop.f32.mrf.mxu1  ;;  %v498_v50 = vadd.f32 %v497_v48, %v2251_v53 }
 0x114   : > { %v563_v51 = vadd.f32 %v562_v49, %v2253_v54 }
 0x115   : > { %v603_v52 = vmax.f32 %v498_v50, 0.0 }
 0x116   : > { %v604_v55 = vmax.f32 %v563_v51, 0.0 }
 0x117   : > { %728 = vmatmul.f32.gmra.mxu2 %v603_v52  ;;  %858 = vmatmul.f32.gmra.mxu0 %v603_v52 }
 0x118   : > { %793 = vmatmul.f32.gmra.mxu3 %v604_v55  ;;  %923 = vmatmul.f32.gmra.mxu1 %v604_v55  ;;  %v685_v55 = vld [vmem:[%s2641_s4] sm:$0x3] }
 0x119   : > { %v2290_v56 = vperm.slane %v685_v55, 1 }
 0x11a   : > { %v500_v58 = vpop.f32.mrf.mxu0 }
 0x11b   : > { %v565_v59 = vpop.f32.mrf.mxu1  ;;  %v501_v60 = vadd.f32 %v500_v58, %v2251_v53 }
 0x11c   : > { %v566_v61 = vadd.f32 %v565_v59, %v2253_v54 }
 0x11d   : > { %v605_v62 = vmax.f32 %v501_v60, 0.0 }
 0x11e   : > { %v606_v63 = vmax.f32 %v566_v61, 0.0 }
 0x11f   : > { %731 = vmatmul.f32.gmra.mxu2 %v605_v62  ;;  %861 = vmatmul.f32.gmra.mxu0 %v605_v62 }
 0x120   : > { %796 = vmatmul.f32.gmra.mxu3 %v606_v63  ;;  %926 = vmatmul.f32.gmra.mxu1 %v606_v63 }
 0x122   : > { %v503_v2 = vpop.f32.mrf.mxu0 }
 0x123   : > { %v568_v3 = vpop.f32.mrf.mxu1  ;;  %v504_v4 = vadd.f32 %v503_v2, %v2251_v53 }
 0x124   : > { %v569_v5 = vadd.f32 %v568_v3, %v2253_v54 }
 0x125   : > { %v607_v6 = vmax.f32 %v504_v4, 0.0 }
 0x126   : > { %v608_v7 = vmax.f32 %v569_v5, 0.0 }
 0x127   : > { %734 = vmatmul.f32.gmra.mxu2 %v607_v6  ;;  %864 = vmatmul.f32.gmra.mxu0 %v607_v6 }
 0x128   : > { %799 = vmatmul.f32.gmra.mxu3 %v608_v7  ;;  %929 = vmatmul.f32.gmra.mxu1 %v608_v7 }
 0x12a   : > { %v506_v10 = vpop.f32.mrf.mxu0 }
 0x12b   : > { %v571_v11 = vpop.f32.mrf.mxu1  ;;  %v507_v12 = vadd.f32 %v506_v10, %v2251_v53 }
 0x12c   : > { %v572_v13 = vadd.f32 %v571_v11, %v2253_v54 }
 0x12d   : > { %v609_v14 = vmax.f32 %v507_v12, 0.0 }
 0x12e   : > { %v610_v15 = vmax.f32 %v572_v13, 0.0 }
 0x12f   : > { %737 = vmatmul.f32.gmra.mxu2 %v609_v14  ;;  %867 = vmatmul.f32.gmra.mxu0 %v609_v14 }
 0x130   : > { %802 = vmatmul.f32.gmra.mxu3 %v610_v15  ;;  %932 = vmatmul.f32.gmra.mxu1 %v610_v15 }
 0x132   : > { %v509_v18 = vpop.f32.mrf.mxu0 }
 0x133   : > { %v574_v19 = vpop.f32.mrf.mxu1  ;;  %v510_v20 = vadd.f32 %v509_v18, %v2251_v53 }
 0x134   : > { %v575_v21 = vadd.f32 %v574_v19, %v2253_v54 }
 0x135   : > { %v611_v22 = vmax.f32 %v510_v20, 0.0 }
 0x136   : > { %v612_v23 = vmax.f32 %v575_v21, 0.0 }
 0x137   : > { %740 = vmatmul.f32.gmra.mxu2 %v611_v22  ;;  %870 = vmatmul.f32.gmra.mxu0 %v611_v22 }
 0x138   : > { %805 = vmatmul.f32.gmra.mxu3 %v612_v23  ;;  %935 = vmatmul.f32.gmra.mxu1 %v612_v23 }
 0x13a   : > { %v512_v27 = vpop.f32.mrf.mxu0 }
 0x13b   : > { %v577_v28 = vpop.f32.mrf.mxu1  ;;  %v513_v29 = vadd.f32 %v512_v27, %v2251_v53 }
 0x13c   : > { %v578_v30 = vadd.f32 %v577_v28, %v2253_v54 }
 0x13d   : > { %v613_v31 = vmax.f32 %v513_v29, 0.0 }
 0x13e   : > { %v614_v32 = vmax.f32 %v578_v30, 0.0 }
 0x13f   : > { %743 = vmatmul.f32.gmra.mxu2 %v613_v31  ;;  %873 = vmatmul.f32.gmra.mxu0 %v613_v31 }
 0x140   : > { %808 = vmatmul.f32.gmra.mxu3 %v614_v32  ;;  %938 = vmatmul.f32.gmra.mxu1 %v614_v32 }
 0x142   : > { %v515_v35 = vpop.f32.mrf.mxu0 }
 0x143   : > { %v580_v36 = vpop.f32.mrf.mxu1  ;;  %v516_v37 = vadd.f32 %v515_v35, %v2251_v53 }
 0x144   : > { %v581_v38 = vadd.f32 %v580_v36, %v2253_v54 }
 0x145   : > { %v615_v39 = vmax.f32 %v516_v37, 0.0 }
 0x146   : > { %v616_v40 = vmax.f32 %v581_v38, 0.0 }
 0x147   : > { %746 = vmatmul.f32.gmra.mxu2 %v615_v39  ;;  %876 = vmatmul.f32.gmra.mxu0 %v615_v39 }
 0x148   : > { %811 = vmatmul.f32.gmra.mxu3 %v616_v40  ;;  %941 = vmatmul.f32.gmra.mxu1 %v616_v40 }
 0x14a   : > { %v518_v41 = vpop.f32.mrf.mxu0 }
 0x14b   : > { %v583_v42 = vpop.f32.mrf.mxu1  ;;  %v519_v43 = vadd.f32 %v518_v41, %v2251_v53 }
 0x14c   : > { %v584_v44 = vadd.f32 %v583_v42, %v2253_v54 }
 0x14d   : > { %v617_v45 = vmax.f32 %v519_v43, 0.0 }
 0x14e   : > { %v618_v46 = vmax.f32 %v584_v44, 0.0 }
 0x14f   : > { %749 = vmatmul.f32.gmra.mxu2 %v617_v45  ;;  %879 = vmatmul.f32.gmra.mxu0 %v617_v45 }
 0x150   : > { %814 = vmatmul.f32.gmra.mxu3 %v618_v46  ;;  %944 = vmatmul.f32.gmra.mxu1 %v618_v46 }
 0x152   : > { %v521_v47 = vpop.f32.mrf.mxu0 }
 0x153   : > { %v586_v48 = vpop.f32.mrf.mxu1  ;;  %v522_v49 = vadd.f32 %v521_v47, %v2251_v53  ;;  %v2293_v53 = vperm.slane %v685_v55, 0 }
 0x154   : > { %v587_v50 = vadd.f32 %v586_v48, %v2253_v54 }
 0x155   : > { %v619_v51 = vmax.f32 %v522_v49, 0.0 }
 0x156   : > { %v620_v52 = vmax.f32 %v587_v50, 0.0 }
 0x157   : > { %752 = vmatmul.f32.gmra.mxu2 %v619_v51  ;;  %882 = vmatmul.f32.gmra.mxu0 %v619_v51 }
 0x158   : > { %817 = vmatmul.f32.gmra.mxu3 %v620_v52  ;;  %947 = vmatmul.f32.gmra.mxu1 %v620_v52 }
 0x15c   : > { %v838_v57 = vpop.f32.mrf.mxu0 }
 0x15d   : > { %v839_v58 = vadd.f32 %v838_v57, %v2290_v56  ;;  %v903_v59 = vpop.f32.mrf.mxu1 }
 0x15f   : > { %v904_v60 = vadd.f32 %v903_v59, %v839_v58 }
 0x161   : > { %v952_v54 = vmax.f32 %v904_v60, 0.0 }
 0x162   : > { %v708_v61 = vpop.f32.mrf.mxu2 }
 0x163   : > { %v709_v62 = vadd.f32 %v708_v61, %v2293_v53  ;;  %1100 = vmatmul.f32.vlgmr.msrb.gmra.mxu3 %v952_v54  ;;  %v773_v63 = vpop.f32.mrf.mxu3 }
 0x164   : > { %v841_v0 = vpop.f32.mrf.mxu0 }
 0x165   : > { %v774_v1 = vadd.f32 %v773_v63, %v709_v62  ;;  %v842_v2 = vadd.f32 %v841_v0, %v2290_v56  ;;  %v906_v3 = vpop.f32.mrf.mxu1 }
 0x167   : > { %v951_v4 = vmax.f32 %v774_v1, 0.0  ;;  %v907_v5 = vadd.f32 %v906_v3, %v842_v2 }
 0x169   : > { %v954_v6 = vmax.f32 %v907_v5, 0.0  ;;  %1035 = vmatmul.f32.vlgmr.msrb.gmra.mxu2 %v951_v4 }
 0x16a   : > { %v711_v7 = vpop.f32.mrf.mxu2 }
 0x16b   : > { %v712_v8 = vadd.f32 %v711_v7, %v2293_v53  ;;  %1103 = vmatmul.f32.gmra.mxu3 %v954_v6  ;;  %v776_v9 = vpop.f32.mrf.mxu3 }
 0x16c   : > { %v844_v10 = vpop.f32.mrf.mxu0 }
 0x16d   : > { %v777_v11 = vadd.f32 %v776_v9, %v712_v8  ;;  %v845_v12 = vadd.f32 %v844_v10, %v2290_v56  ;;  %v909_v13 = vpop.f32.mrf.mxu1 }
 0x16f   : > { %v910_v14 = vadd.f32 %v909_v13, %v845_v12  ;;  %v953_v15 = vmax.f32 %v777_v11, 0.0 }
 0x171   : > { %v956_v16 = vmax.f32 %v910_v14, 0.0  ;;  %1038 = vmatmul.f32.gmra.mxu2 %v953_v15 }
 0x172   : > { %v714_v17 = vpop.f32.mrf.mxu2 }
 0x173   : > { %v715_v18 = vadd.f32 %v714_v17, %v2293_v53  ;;  %1106 = vmatmul.f32.gmra.mxu3 %v956_v16  ;;  %v779_v19 = vpop.f32.mrf.mxu3 }
 0x174   : > { %v847_v20 = vpop.f32.mrf.mxu0 }
 0x175   : > { %v780_v21 = vadd.f32 %v779_v19, %v715_v18  ;;  %v848_v22 = vadd.f32 %v847_v20, %v2290_v56  ;;  %v912_v23 = vpop.f32.mrf.mxu1 }
 0x177   : > { %v913_v24 = vadd.f32 %v912_v23, %v848_v22  ;;  %v955_v25 = vmax.f32 %v780_v21, 0.0 }
 0x179   : > { %v958_v26 = vmax.f32 %v913_v24, 0.0  ;;  %1041 = vmatmul.f32.gmra.mxu2 %v955_v25 }
 0x17a   : > { %v717_v27 = vpop.f32.mrf.mxu2 }
 0x17b   : > { %v718_v28 = vadd.f32 %v717_v27, %v2293_v53  ;;  %1109 = vmatmul.f32.gmra.mxu3 %v958_v26  ;;  %v782_v29 = vpop.f32.mrf.mxu3 }
 0x17c   : > { %v850_v30 = vpop.f32.mrf.mxu0 }
 0x17d   : > { %v783_v31 = vadd.f32 %v782_v29, %v718_v28  ;;  %v851_v32 = vadd.f32 %v850_v30, %v2290_v56  ;;  %v915_v33 = vpop.f32.mrf.mxu1 }
 0x17f   : > { %v916_v34 = vadd.f32 %v915_v33, %v851_v32  ;;  %v957_v35 = vmax.f32 %v783_v31, 0.0 }
 0x181   : > { %v960_v36 = vmax.f32 %v916_v34, 0.0  ;;  %1044 = vmatmul.f32.gmra.mxu2 %v957_v35 }
 0x182   : > { %v720_v37 = vpop.f32.mrf.mxu2 }
 0x183   : > { %v721_v38 = vadd.f32 %v720_v37, %v2293_v53  ;;  %1112 = vmatmul.f32.gmra.mxu3 %v960_v36  ;;  %v785_v39 = vpop.f32.mrf.mxu3 }
 0x184   : > { %v853_v40 = vpop.f32.mrf.mxu0 }
 0x185   : > { %v786_v41 = vadd.f32 %v785_v39, %v721_v38  ;;  %v854_v42 = vadd.f32 %v853_v40, %v2290_v56  ;;  %v918_v43 = vpop.f32.mrf.mxu1 }
 0x187   : > { %v919_v44 = vadd.f32 %v918_v43, %v854_v42  ;;  %v959_v45 = vmax.f32 %v786_v41, 0.0 }
 0x189   : > { %v962_v46 = vmax.f32 %v919_v44, 0.0  ;;  %1047 = vmatmul.f32.gmra.mxu2 %v959_v45 }
 0x18a   : > { %v723_v47 = vpop.f32.mrf.mxu2 }
 0x18b   : > { %v724_v48 = vadd.f32 %v723_v47, %v2293_v53  ;;  %1115 = vmatmul.f32.gmra.mxu3 %v962_v46  ;;  %v788_v49 = vpop.f32.mrf.mxu3 }
 0x18c   : > { %v856_v50 = vpop.f32.mrf.mxu0 }
 0x18d   : > { %v789_v51 = vadd.f32 %v788_v49, %v724_v48  ;;  %v857_v52 = vadd.f32 %v856_v50, %v2290_v56  ;;  %v921_v55 = vpop.f32.mrf.mxu1 }
 0x18f   : > { %v922_v57 = vadd.f32 %v921_v55, %v857_v52  ;;  %v961_v58 = vmax.f32 %v789_v51, 0.0 }
 0x191   : > { %v964_v59 = vmax.f32 %v922_v57, 0.0  ;;  %1050 = vmatmul.f32.gmra.mxu2 %v961_v58 }
 0x192   : > { %v726_v60 = vpop.f32.mrf.mxu2 }
 0x193   : > { %v727_v54 = vadd.f32 %v726_v60, %v2293_v53  ;;  %1118 = vmatmul.f32.gmra.mxu3 %v964_v59  ;;  %v791_v61 = vpop.f32.mrf.mxu3 }
 0x194   : > { %v859_v62 = vpop.f32.mrf.mxu0 }
 0x195   : > { %v792_v63 = vadd.f32 %v791_v61, %v727_v54  ;;  %v860_v0 = vadd.f32 %v859_v62, %v2290_v56  ;;  %v924_v1 = vpop.f32.mrf.mxu1 }
 0x197   : > { %v925_v2 = vadd.f32 %v924_v1, %v860_v0  ;;  %v963_v3 = vmax.f32 %v792_v63, 0.0 }
 0x199   : > { %v966_v4 = vmax.f32 %v925_v2, 0.0  ;;  %1053 = vmatmul.f32.gmra.mxu2 %v963_v3 }
 0x19a   : > { %v729_v5 = vpop.f32.mrf.mxu2 }
 0x19b   : > { %v730_v6 = vadd.f32 %v729_v5, %v2293_v53  ;;  %1121 = vmatmul.f32.gmra.mxu3 %v966_v4  ;;  %v794_v7 = vpop.f32.mrf.mxu3 }
 0x19c   : > { %v862_v8 = vpop.f32.mrf.mxu0 }
 0x19d   : > { %v795_v9 = vadd.f32 %v794_v7, %v730_v6  ;;  %v863_v10 = vadd.f32 %v862_v8, %v2290_v56  ;;  %v927_v11 = vpop.f32.mrf.mxu1 }
 0x19f   : > { %v928_v12 = vadd.f32 %v927_v11, %v863_v10  ;;  %v965_v13 = vmax.f32 %v795_v9, 0.0 }
 0x1a1   : > { %v968_v14 = vmax.f32 %v928_v12, 0.0  ;;  %1056 = vmatmul.f32.gmra.mxu2 %v965_v13 }
 0x1a2   : > { %v732_v15 = vpop.f32.mrf.mxu2 }
 0x1a3   : > { %v733_v16 = vadd.f32 %v732_v15, %v2293_v53  ;;  %1124 = vmatmul.f32.gmra.mxu3 %v968_v14  ;;  %v797_v17 = vpop.f32.mrf.mxu3 }
 0x1a4   : > { %v865_v18 = vpop.f32.mrf.mxu0 }
 0x1a5   : > { %v798_v19 = vadd.f32 %v797_v17, %v733_v16  ;;  %v866_v20 = vadd.f32 %v865_v18, %v2290_v56  ;;  %v930_v21 = vpop.f32.mrf.mxu1 }
 0x1a7   : > { %v967_v22 = vmax.f32 %v798_v19, 0.0  ;;  %v931_v23 = vadd.f32 %v930_v21, %v866_v20 }
 0x1a9   : > { %v970_v24 = vmax.f32 %v931_v23, 0.0  ;;  %1059 = vmatmul.f32.gmra.mxu2 %v967_v22 }
 0x1aa   : > { %v735_v25 = vpop.f32.mrf.mxu2 }
 0x1ab   : > { %v736_v26 = vadd.f32 %v735_v25, %v2293_v53  ;;  %1127 = vmatmul.f32.gmra.mxu3 %v970_v24  ;;  %v800_v27 = vpop.f32.mrf.mxu3 }
 0x1ac   : > { %v868_v28 = vpop.f32.mrf.mxu0 }
 0x1ad   : > { %v801_v29 = vadd.f32 %v800_v27, %v736_v26  ;;  %v869_v30 = vadd.f32 %v868_v28, %v2290_v56  ;;  %v933_v31 = vpop.f32.mrf.mxu1 }
 0x1af   : > { %v969_v32 = vmax.f32 %v801_v29, 0.0  ;;  %v934_v33 = vadd.f32 %v933_v31, %v869_v30 }
 0x1b1   : > { %v972_v34 = vmax.f32 %v934_v33, 0.0  ;;  %1062 = vmatmul.f32.gmra.mxu2 %v969_v32 }
 0x1b2   : > { %v738_v35 = vpop.f32.mrf.mxu2 }
 0x1b3   : > { %v739_v36 = vadd.f32 %v738_v35, %v2293_v53  ;;  %1130 = vmatmul.f32.gmra.mxu3 %v972_v34  ;;  %v803_v37 = vpop.f32.mrf.mxu3  ;;  %v1825_v34 = vld [vmem:[%s2218_s21] sm:$0xff] }
 0x1b4   : > { %v871_v38 = vpop.f32.mrf.mxu0 }
 0x1b5   : > { %v804_v39 = vadd.f32 %v803_v37, %v739_v36  ;;  %v872_v40 = vadd.f32 %v871_v38, %v2290_v56  ;;  %v936_v41 = vpop.f32.mrf.mxu1 }
 0x1b7   : > { %v971_v42 = vmax.f32 %v804_v39, 0.0  ;;  %v937_v43 = vadd.f32 %v936_v41, %v872_v40  ;;  %v1826_v40 = vld [vmem:[%s2218_s21 + $0x8] sm:$0xff] }
 0x1b9   : > { %v974_v44 = vmax.f32 %v937_v43, 0.0  ;;  %1065 = vmatmul.f32.gmra.mxu2 %v971_v42 }
 0x1ba   : > { %v741_v45 = vpop.f32.mrf.mxu2 }
 0x1bb   : > { %v742_v46 = vadd.f32 %v741_v45, %v2293_v53  ;;  %1133 = vmatmul.f32.gmra.mxu3 %v974_v44  ;;  %v806_v47 = vpop.f32.mrf.mxu3 }
 0x1bc   : > { %v874_v48 = vpop.f32.mrf.mxu0 }
 0x1bd   : > { %v807_v49 = vadd.f32 %v806_v47, %v742_v46  ;;  %v875_v50 = vadd.f32 %v874_v48, %v2290_v56  ;;  %v939_v51 = vpop.f32.mrf.mxu1  ;;  %v1827_v47 = vld [vmem:[%s2218_s21 + $0x10] sm:$0xff] }
 0x1bf   : > { %v973_v52 = vmax.f32 %v807_v49, 0.0  ;;  %v940_v55 = vadd.f32 %v939_v51, %v875_v50 }
 0x1c1   : > { %v976_v57 = vmax.f32 %v940_v55, 0.0  ;;  %1068 = vmatmul.f32.gmra.mxu2 %v973_v52 }
 0x1c2   : > { %v744_v58 = vpop.f32.mrf.mxu2 }
 0x1c3   : > { %v745_v59 = vadd.f32 %v744_v58, %v2293_v53  ;;  %1136 = vmatmul.f32.gmra.mxu3 %v976_v57  ;;  %v809_v60 = vpop.f32.mrf.mxu3  ;;  %v1828_v57 = vld [vmem:[%s2218_s21 + $0x18] sm:$0xff] }
 0x1c4   : > { %v877_v54 = vpop.f32.mrf.mxu0 }
 0x1c5   : > { %v810_v61 = vadd.f32 %v809_v60, %v745_v59  ;;  %v878_v62 = vadd.f32 %v877_v54, %v2290_v56  ;;  %v942_v63 = vpop.f32.mrf.mxu1 }
 0x1c7   : > { %v975_v0 = vmax.f32 %v810_v61, 0.0  ;;  %v943_v1 = vadd.f32 %v942_v63, %v878_v62  ;;  %v1829_v63 = vld [vmem:[%s2218_s21 + $0x20] sm:$0xff] }
 0x1c9   : > { %v978_v2 = vmax.f32 %v943_v1, 0.0  ;;  %1071 = vmatmul.f32.gmra.mxu2 %v975_v0 }
 0x1ca   : > { %v747_v3 = vpop.f32.mrf.mxu2 }
 0x1cb   : > { %v748_v4 = vadd.f32 %v747_v3, %v2293_v53  ;;  %1139 = vmatmul.f32.gmra.mxu3 %v978_v2  ;;  %v812_v5 = vpop.f32.mrf.mxu3 }
 0x1cc   : > { %v880_v6 = vpop.f32.mrf.mxu0 }
 0x1cd   : > { %v813_v7 = vadd.f32 %v812_v5, %v748_v4  ;;  %v881_v8 = vadd.f32 %v880_v6, %v2290_v56  ;;  %v945_v9 = vpop.f32.mrf.mxu1  ;;  %v1830_v6 = vld [vmem:[%s2218_s21 + $0x28] sm:$0xff] }
 0x1cf   : > { %v977_v10 = vmax.f32 %v813_v7, 0.0  ;;  %v946_v11 = vadd.f32 %v945_v9, %v881_v8 }
 0x1d1   : > { %v980_v12 = vmax.f32 %v946_v11, 0.0  ;;  %1074 = vmatmul.f32.gmra.mxu2 %v977_v10 }
 0x1d2   : > { %v750_v13 = vpop.f32.mrf.mxu2 }
 0x1d3   : > { %v751_v14 = vadd.f32 %v750_v13, %v2293_v53  ;;  %1142 = vmatmul.f32.gmra.mxu3 %v980_v12  ;;  %v815_v15 = vpop.f32.mrf.mxu3  ;;  %v1831_v13 = vld [vmem:[%s2218_s21 + $0x30] sm:$0xff] }
 0x1d4   : > { %v883_v16 = vpop.f32.mrf.mxu0 }
 0x1d5   : > { %v816_v17 = vadd.f32 %v815_v15, %v751_v14  ;;  %v884_v18 = vadd.f32 %v883_v16, %v2290_v56  ;;  %v948_v19 = vpop.f32.mrf.mxu1  ;;  %v2329_v56 = vld [vmem:[%s2643_s6] ss:$0 sm:$0xff] }
 0x1d7   : > { %v979_v20 = vmax.f32 %v816_v17, 0.0  ;;  %v949_v21 = vadd.f32 %v948_v19, %v884_v18 }
 0x1d9   : > { %v982_v22 = vmax.f32 %v949_v21, 0.0  ;;  %1077 = vmatmul.f32.gmra.mxu2 %v979_v20  ;;  %v1832_v20 = vld [vmem:[%s2218_s21 + $0x38] sm:$0xff] }
 0x1da   : > { %v753_v23 = vpop.f32.mrf.mxu2 }
 0x1db   : > { %v754_v24 = vadd.f32 %v753_v23, %v2293_v53  ;;  %1145 = vmatmul.f32.gmra.mxu3 %v982_v22  ;;  %v818_v25 = vpop.f32.mrf.mxu3 }
 0x1dd   : > { %v819_v26 = vadd.f32 %v818_v25, %v754_v24 }
 0x1df   : > { %v981_v27 = vmax.f32 %v819_v26, 0.0 }
 0x1e1   : > { %1080 = vmatmul.f32.gmra.mxu2 %v981_v27  ;;  %v1833_v27 = vld [vmem:[%s2218_s21 + $0x40] sm:$0xff] }
 0x1e6   : > { %v1101_v28 = vpop.f32.mrf.mxu3 }
 0x1ec   : > { %v1036_v29 = vpop.f32.mrf.mxu2 }
 0x1ed   : > { %v1037_v30 = vadd.f32 %v2329_v56, %v1036_v29 }
 0x1ee   : > { %v1104_v31 = vpop.f32.mrf.mxu3 }
 0x1ef   : > { %v1102_v32 = vadd.f32 %v1101_v28, %v1037_v30 }
 0x1f1   : > { %v1149_v33 = vmax.f32 %v1102_v32, 0.0 }
 0x1f3   : > { %v2333_v53 = vadd.f32 %v1825_v34, %v1149_v33  ;;  %v1834_v34 = vld [vmem:[%s2218_s21 + $0x48] sm:$0xff] }
 0x1f4   : > { %v1039_v35 = vpop.f32.mrf.mxu2 }
 0x1f5   : > { %v1040_v36 = vadd.f32 %v2329_v56, %v1039_v35  ;;  %1181 = vadd.xlane.f32.xlu0 %v2333_v53 }
 0x1f6   : > { %v1107_v37 = vpop.f32.mrf.mxu3 }
 0x1f7   : > { %v1105_v38 = vadd.f32 %v1104_v31, %v1040_v36 }
 0x1f9   : > { %v1150_v39 = vmax.f32 %v1105_v38, 0.0 }
 0x1fb   : > { %v2338_v41 = vadd.f32 %v1826_v40, %v1150_v39 }
 0x1fc   : > { %v1042_v42 = vpop.f32.mrf.mxu2 }
 0x1fd   : > { %v1043_v43 = vadd.f32 %v2329_v56, %v1042_v42  ;;  %1183 = vadd.xlane.f32.xlu0 %v2338_v41  ;;  %v1835_v42 = vld [vmem:[%s2218_s21 + $0x50] sm:$0xff] }
 0x1fe   : > { %v1110_v44 = vpop.f32.mrf.mxu3 }
 0x1ff   : > { %v1108_v45 = vadd.f32 %v1107_v37, %v1043_v43 }
 0x201   : > { %v1151_v46 = vmax.f32 %v1108_v45, 0.0 }
 0x203   : > { %v2343_v48 = vadd.f32 %v1827_v47, %v1151_v46 }
 0x204   : > { %v1045_v49 = vpop.f32.mrf.mxu2 }
 0x205   : > { %v1046_v50 = vadd.f32 %v2329_v56, %v1045_v49  ;;  %1185 = vadd.xlane.f32.xlu1 %v2343_v48 }
 0x206   : > { %v1113_v51 = vpop.f32.mrf.mxu3 }
 0x207   : > { %v1111_v52 = vadd.f32 %v1110_v44, %v1046_v50  ;;  %v1836_v50 = vld [vmem:[%s2218_s21 + $0x58] sm:$0xff] }
 0x209   : > { %v1152_v55 = vmax.f32 %v1111_v52, 0.0 }
 0x20b   : > { %v2348_v58 = vadd.f32 %v1828_v57, %v1152_v55  ;;  %v2044_v57 = vmov 128.0  }
 0x20c   : > { %v1048_v59 = vpop.f32.mrf.mxu2  ;;  %1791 = vrcp.f32 %v2044_v57 }
 0x20d   : > { %v1049_v60 = vadd.f32 %v2329_v56, %v1048_v59  ;;  %1187 = vadd.xlane.f32.xlu1 %v2348_v58 }
 0x20e   : > { %v1116_v54 = vpop.f32.mrf.mxu3 }
 0x20f   : > { %v1114_v61 = vadd.f32 %v1113_v51, %v1049_v60 }
 0x211   : > { %v1153_v62 = vmax.f32 %v1114_v61, 0.0 }
 0x212   : > { %v1792_v61 = vpop.eup %1791 }
 0x213   : > { %v2353_v0 = vadd.f32 %v1829_v63, %v1153_v62  ;;  %v1837_v62 = vld [vmem:[%s2218_s21 + $0x60] sm:$0xff]  ;;  %vm1218_vm0 = vweird.f32 %v1792_v61 }
 0x214   : > { %v1051_v1 = vpop.f32.mrf.mxu2 }
 0x215   : > { %v1052_v2 = vadd.f32 %v2329_v56, %v1051_v1  ;;  %1189 = vadd.xlane.f32.xlu2 %v2353_v0 }
 0x216   : > { %v1119_v3 = vpop.f32.mrf.mxu3 }
 0x217   : > { %v1117_v4 = vadd.f32 %v1116_v54, %v1052_v2 }
 0x219   : > { %v1154_v5 = vmax.f32 %v1117_v4, 0.0 }
 0x21b   : > { %v2358_v7 = vadd.f32 %v1830_v6, %v1154_v5 }
 0x21c   : > { %v1054_v8 = vpop.f32.mrf.mxu2 }
 0x21d   : > { %v1055_v9 = vadd.f32 %v2329_v56, %v1054_v8  ;;  %1191 = vadd.xlane.f32.xlu2 %v2358_v7  ;;  %v1838_v8 = vld [vmem:[%s2218_s21 + $0x68] sm:$0xff] }
 0x21e   : > { %v1122_v10 = vpop.f32.mrf.mxu3 }
 0x21f   : > { %v1120_v11 = vadd.f32 %v1119_v3, %v1055_v9  ;;  %v1214_v3 = vmul.f32 128.0, %v1792_v61 }
 0x221   : > { %v1155_v12 = vmax.f32 %v1120_v11, 0.0  ;;  %v1215_v6 = vsub.f32 1.0, %v1214_v3 }
 0x223   : > { %v2363_v14 = vadd.f32 %v1831_v13, %v1155_v12  ;;  %v1216_v13 = vmul.f32 %v1792_v61, %v1215_v6 }
 0x224   : > { %v1057_v15 = vpop.f32.mrf.mxu2 }
 0x225   : > { %v1058_v16 = vadd.f32 %v2329_v56, %v1057_v15  ;;  %1193 = vadd.xlane.f32.xlu0 %v2363_v14 }
 0x226   : > { %v1125_v17 = vpop.f32.mrf.mxu3 }
 0x227   : > { %v1123_v18 = vadd.f32 %v1122_v10, %v1058_v16 }
 0x229   : > { %v1156_v19 = vmax.f32 %v1123_v18, 0.0  ;;  %v1839_v18 = vld [vmem:[%s2218_s21 + $0x70] sm:$0xff] }
 0x22b   : > { %v2368_v21 = vadd.f32 %v1832_v20, %v1156_v19 }
 0x22c   : > { %v1060_v22 = vpop.f32.mrf.mxu2 }
 0x22d   : > { %v1061_v23 = vadd.f32 %v2329_v56, %v1060_v22  ;;  %1195 = vadd.xlane.f32.xlu1 %v2368_v21 }
 0x22e   : > { %v1128_v24 = vpop.f32.mrf.mxu3 }
 0x22f   : > { %v1126_v25 = vadd.f32 %v1125_v17, %v1061_v23  ;;  %v1217_v17 = vadd.f32 %v1792_v61, %v1216_v13 }
 0x231   : > { %v1157_v26 = vmax.f32 %v1126_v25, 0.0 }
 0x233   : > { %v2373_v28 = vadd.f32 %v1833_v27, %v1157_v26 }
 0x234   : > { %v1063_v29 = vpop.f32.mrf.mxu2 }
 0x235   : > { %v1064_v30 = vadd.f32 %v2329_v56, %v1063_v29  ;;  %1197 = vadd.xlane.f32.xlu2 %v2373_v28 }
 0x236   : > { %v1131_v31 = vpop.f32.mrf.mxu3 }
 0x237   : > { %v1129_v32 = vadd.f32 %v1128_v24, %v1064_v30  ;;  %v2407_v24 = vsel %vm1218_vm0, %v1792_v61, %v1217_v17 }
 0x239   : > { %v1158_v33 = vmax.f32 %v1129_v32, 0.0 }
 0x23b   : > { %v2378_v35 = vadd.f32 %v1834_v34, %v1158_v33 }
 0x23c   : > { %v1066_v36 = vpop.f32.mrf.mxu2 }
 0x23d   : > { %v1067_v37 = vadd.f32 %v2329_v56, %v1066_v36  ;;  %1199 = vadd.xlane.f32.xlu0 %v2378_v35 }
 0x23e   : > { %v1134_v38 = vpop.f32.mrf.mxu3 }
 0x23f   : > { %v1132_v39 = vadd.f32 %v1131_v31, %v1067_v37  ;;  %v1840_v31 = vld [vmem:[%s2218_s21 + $0x78] sm:$0xff] }
 0x241   : > { %v1159_v40 = vmax.f32 %v1132_v39, 0.0 }
 0x243   : > { %v2383_v43 = vadd.f32 %v1835_v42, %v1159_v40 }
 0x244   : > { %v1069_v44 = vpop.f32.mrf.mxu2 }
 0x245   : > { %v1070_v45 = vadd.f32 %v2329_v56, %v1069_v44  ;;  %1201 = vadd.xlane.f32.xlu1 %v2383_v43 }
 0x246   : > { %v1137_v47 = vpop.f32.mrf.mxu3 }
 0x247   : > { %v1135_v46 = vadd.f32 %v1134_v38, %v1070_v45 }
 0x249   : > { %v1160_v49 = vmax.f32 %v1135_v46, 0.0 }
 0x24b   : > { %v2388_v51 = vadd.f32 %v1836_v50, %v1160_v49 }
 0x24c   : > { %v1072_v52 = vpop.f32.mrf.mxu2 }
 0x24d   : > { %v1073_v55 = vadd.f32 %v2329_v56, %v1072_v52  ;;  %1203 = vadd.xlane.f32.xlu2 %v2388_v51 }
 0x24e   : > { %v1140_v54 = vpop.f32.mrf.mxu3 }
 0x24f   : > { %v1138_v59 = vadd.f32 %v1137_v47, %v1073_v55 }
 0x251   : > { %v1161_v60 = vmax.f32 %v1138_v59, 0.0 }
 0x253   : > { %v2393_v63 = vadd.f32 %v1837_v62, %v1161_v60 }
 0x254   : > { %v1075_v1 = vpop.f32.mrf.mxu2 }
 0x255   : > { %v1076_v2 = vadd.f32 %v2329_v56, %v1075_v1  ;;  %1205 = vadd.xlane.f32.xlu0 %v2393_v63 }
 0x256   : > { %v1143_v10 = vpop.f32.mrf.mxu3 }
 0x257   : > { %v1141_v4 = vadd.f32 %v1140_v54, %v1076_v2 }
 0x259   : > { %v1162_v5 = vmax.f32 %v1141_v4, 0.0 }
 0x25b   : > { %v2398_v9 = vadd.f32 %v1838_v8, %v1162_v5 }
 0x25c   : > { %v1078_v11 = vpop.f32.mrf.mxu2 }
 0x25d   : > { %v1079_v12 = vadd.f32 %v2329_v56, %v1078_v11  ;;  %1207 = vadd.xlane.f32.xlu1 %v2398_v9 }
 0x25e   : > { %v1146_v23 = vpop.f32.mrf.mxu3 }
 0x25f   : > { %v1144_v15 = vadd.f32 %v1143_v10, %v1079_v12 }
 0x261   : > { %v1163_v16 = vmax.f32 %v1144_v15, 0.0 }
 0x263   : > { %v2403_v19 = vadd.f32 %v1839_v18, %v1163_v16 }
 0x264   : > { %v1081_v20 = vpop.f32.mrf.mxu2 }
 0x265   : > { %v1082_v22 = vadd.f32 %v2329_v56, %v1081_v20  ;;  %1209 = vadd.xlane.f32.xlu2 %v2403_v19 }
 0x267   : > { %v1147_v25 = vadd.f32 %v1146_v23, %v1082_v22 }
 0x268   : > { %v1182_v26 = vpop.xlane.xlu0 %1181 }
 0x269   : > { %v1164_v27 = vmax.f32 %v1147_v25, 0.0  ;;  %v1220_v29 = vmul.f32 %v2407_v24, %v1182_v26 }
 0x26b   : > { %v2411_v30 = vsub.f32 %v2333_v53, %v1220_v29  ;;  %v2414_v32 = vadd.f32 %v1840_v31, %v1164_v27 }
 0x26d   : > { %1211 = vadd.xlane.f32.xlu0 %v2414_v32  ;;  %v1252_v56 = vmul.f32 %v2411_v30, %v2411_v30 }
 0x26f   : > { %1268 = vadd.xlane.f32.xlu1 %v1252_v56 }
 0x270   : > { %v1184_v33 = vpop.xlane.xlu0 %1183 }
 0x271   : > { %v1221_v34 = vmul.f32 %v2407_v24, %v1184_v33 }
 0x273   : > { %v2421_v36 = vsub.f32 %v2338_v41, %v1221_v34 }
 0x275   : > { %v1253_v37 = vmul.f32 %v2421_v36, %v2421_v36 }
 0x277   : > { %1270 = vadd.xlane.f32.xlu2 %v1253_v37 }
 0x278   : > { %v1186_v53 = vpop.xlane.xlu1 %1185 }
 0x279   : > { %v1222_v38 = vmul.f32 %v2407_v24, %v1186_v53 }
 0x27b   : > { %v2427_v39 = vsub.f32 %v2343_v48, %v1222_v38 }
 0x27d   : > { %v1254_v40 = vmul.f32 %v2427_v39, %v2427_v39 }
 0x27f   : > { %1272 = vadd.xlane.f32.xlu0 %v1254_v40 }
 0x280   : > { %v1188_v42 = vpop.xlane.xlu1 %1187 }
 0x281   : > { %v1223_v44 = vmul.f32 %v2407_v24, %v1188_v42 }
 0x283   : > { %v2433_v41 = vsub.f32 %v2348_v58, %v1223_v44 }
 0x285   : > { %v1255_v45 = vmul.f32 %v2433_v41, %v2433_v41 }
 0x287   : > { %1274 = vadd.xlane.f32.xlu1 %v1255_v45 }
 0x288   : > { %v1190_v46 = vpop.xlane.xlu2 %1189 }
 0x289   : > { %v1224_v47 = vmul.f32 %v2407_v24, %v1190_v46 }
 0x28b   : > { %v2439_v48 = vsub.f32 %v2353_v0, %v1224_v47 }
 0x28d   : > { %v1256_v49 = vmul.f32 %v2439_v48, %v2439_v48 }
 0x28f   : > { %1276 = vadd.xlane.f32.xlu2 %v1256_v49 }
 0x290   : > { %v1192_v50 = vpop.xlane.xlu2 %1191 }
 0x291   : > { %v1225_v52 = vmul.f32 %v2407_v24, %v1192_v50 }
 0x293   : > { %v2445_v58 = vsub.f32 %v2358_v7, %v1225_v52 }
 0x295   : > { %v1257_v55 = vmul.f32 %v2445_v58, %v2445_v58 }
 0x297   : > { %1278 = vadd.xlane.f32.xlu0 %v1257_v55 }
 0x298   : > { %v1194_v57 = vpop.xlane.xlu0 %1193 }
 0x299   : > { %v1226_v59 = vmul.f32 %v2407_v24, %v1194_v57  ;;  %v2515_v57 = vld [vmem:[%s2644_s7] ss:$0 sm:$0xff] }
 0x29b   : > { %v2451_v0 = vsub.f32 %v2363_v14, %v1226_v59 }
 0x29d   : > { %v1258_v60 = vmul.f32 %v2451_v0, %v2451_v0 }
 0x29f   : > { %1280 = vadd.xlane.f32.xlu1 %v1258_v60 }
 0x2a0   : > { %v1196_v54 = vpop.xlane.xlu1 %1195 }
 0x2a1   : > { %v1227_v61 = vmul.f32 %v2407_v24, %v1196_v54  ;;  %v2520_v54 = vld [vmem:[%s2645_s8] ss:$0 sm:$0xff] }
 0x2a3   : > { %v2457_v7 = vsub.f32 %v2368_v21, %v1227_v61 }
 0x2a5   : > { %v1259_v62 = vmul.f32 %v2457_v7, %v2457_v7 }
 0x2a7   : > { %1282 = vadd.xlane.f32.xlu2 %v1259_v62 }
 0x2a8   : > { %v1198_v1 = vpop.xlane.xlu2 %1197 }
 0x2a9   : > { %v1228_v2 = vmul.f32 %v2407_v24, %v1198_v1 }
 0x2ab   : > { %v2463_v14 = vsub.f32 %v2373_v28, %v1228_v2 }
 0x2ad   : > { %v1260_v3 = vmul.f32 %v2463_v14, %v2463_v14 }
 0x2af   : > { %1284 = vadd.xlane.f32.xlu0 %v1260_v3 }
 0x2b0   : > { %v1200_v4 = vpop.xlane.xlu0 %1199 }
 0x2b1   : > { %v1229_v5 = vmul.f32 %v2407_v24, %v1200_v4 }
 0x2b3   : > { %v2469_v21 = vsub.f32 %v2378_v35, %v1229_v5 }
 0x2b5   : > { %v1261_v6 = vmul.f32 %v2469_v21, %v2469_v21 }
 0x2b7   : > { %1286 = vadd.xlane.f32.xlu1 %v1261_v6 }
 0x2b8   : > { %v1202_v8 = vpop.xlane.xlu1 %1201 }
 0x2b9   : > { %v1230_v10 = vmul.f32 %v2407_v24, %v1202_v8 }
 0x2bb   : > { %v2475_v28 = vsub.f32 %v2383_v43, %v1230_v10 }
 0x2bd   : > { %v1262_v11 = vmul.f32 %v2475_v28, %v2475_v28 }
 0x2bf   : > { %1288 = vadd.xlane.f32.xlu2 %v1262_v11 }
 0x2c0   : > { %v1204_v12 = vpop.xlane.xlu2 %1203 }
 0x2c1   : > { %v1231_v13 = vmul.f32 %v2407_v24, %v1204_v12 }
 0x2c3   : > { %v2481_v35 = vsub.f32 %v2388_v51, %v1231_v13 }
 0x2c5   : > { %v1263_v15 = vmul.f32 %v2481_v35, %v2481_v35 }
 0x2c7   : > { %1290 = vadd.xlane.f32.xlu0 %v1263_v15 }
 0x2c8   : > { %v1206_v16 = vpop.xlane.xlu0 %1205 }
 0x2c9   : > { %v1232_v17 = vmul.f32 %v2407_v24, %v1206_v16 }
 0x2cb   : > { %v2487_v43 = vsub.f32 %v2393_v63, %v1232_v17 }
 0x2cd   : > { %v1264_v18 = vmul.f32 %v2487_v43, %v2487_v43 }
 0x2cf   : > { %1292 = vadd.xlane.f32.xlu1 %v1264_v18 }
 0x2d0   : > { %v1208_v20 = vpop.xlane.xlu1 %1207 }
 0x2d1   : > { %v1233_v22 = vmul.f32 %v2407_v24, %v1208_v20 }
 0x2d3   : > { %v2493_v51 = vsub.f32 %v2398_v9, %v1233_v22 }
 0x2d5   : > { %v1265_v23 = vmul.f32 %v2493_v51, %v2493_v51 }
 0x2d7   : > { %1294 = vadd.xlane.f32.xlu2 %v1265_v23 }
 0x2d8   : > { %v1210_v25 = vpop.xlane.xlu2 %1209 }
 0x2d9   : > { %v1234_v26 = vmul.f32 %v2407_v24, %v1210_v25 }
 0x2db   : > { %v2499_v63 = vsub.f32 %v2403_v19, %v1234_v26 }
 0x2dd   : > { %v1266_v27 = vmul.f32 %v2499_v63, %v2499_v63 }
 0x2df   : > { %1296 = vadd.xlane.f32.xlu0 %v1266_v27 }
 0x2e0   : > { %v1212_v29 = vpop.xlane.xlu0 %1211 }
 0x2e1   : > { %v1235_v31 = vmul.f32 %v2407_v24, %v1212_v29 }
 0x2e2   : > { %v1269_v56 = vpop.xlane.xlu1 %1268 }
 0x2e3   : > { %v2505_v9 = vsub.f32 %v2414_v32, %v1235_v31  ;;  %v1300_v33 = vmul.f32 %v1269_v56, %v2407_v24 }
 0x2e5   : > { %v1316_v34 = vadd.f32 1e-05, %v1300_v33  ;;  %v1267_v37 = vmul.f32 %v2505_v9, %v2505_v9 }
 0x2e7   : > { %1793 = vrsqrt.f32 %v1316_v34  ;;  %1298 = vadd.xlane.f32.xlu1 %v1267_v37  ;;  %vm1338_vm2 = vweird.f32 %v1316_v34 }
 0x2ea   : > { %v1271_v19 = vpop.xlane.xlu2 %1270 }
 0x2eb   : > { %v1301_v53 = vmul.f32 %v1271_v19, %v2407_v24 }
 0x2ed   : > { %v1794_v38 = vpop.eup %1793  ;;  %v1317_v40 = vadd.f32 1e-05, %v1301_v53 }
 0x2ee   : > { %v1333_v42 = vmul.f32 %v1794_v38, %v1316_v34  ;;  %vm1339_vm1 = vweird.f32 %v1794_v38 }
 0x2ef   : > { %1795 = vrsqrt.f32 %v1317_v40  ;;  %vm1340_vm3 = vmor %vm1338_vm2, %vm1339_vm1  ;;  %vm1348_vm5 = vweird.f32 %v1317_v40 }
 0x2f0   : > { %v1334_v44 = vmul.f32 %v1794_v38, %v1333_v42 }
 0x2f2   : > { %v1335_v45 = vmul.f32 0.5, %v1334_v44  ;;  %v1273_v46 = vpop.xlane.xlu0 %1272 }
 0x2f3   : > { %v1302_v32 = vmul.f32 %v1273_v46, %v2407_v24 }
 0x2f4   : > { %v1336_v47 = vsub.f32 1.5, %v1335_v45 }
 0x2f5   : > { %v1796_v49 = vpop.eup %1795  ;;  %v1318_v50 = vadd.f32 1e-05, %v1302_v32 }
 0x2f6   : > { %v1337_v52 = vmul.f32 %v1794_v38, %v1336_v47  ;;  %v1343_v55 = vmul.f32 %v1796_v49, %v1317_v40  ;;  %vm1349_vm4 = vweird.f32 %v1796_v49 }
 0x2f7   : > { %1797 = vrsqrt.f32 %v1318_v50  ;;  %vm1350_vm6 = vmor %vm1348_vm5, %vm1349_vm4  ;;  %vm1358_vm8 = vweird.f32 %v1318_v50 }
 0x2f8   : > { %v1341_v59 = vsel %vm1340_vm3, %v1794_v38, %v1337_v52  ;;  %v1344_v60 = vmul.f32 %v1796_v49, %v1343_v55 }
 0x2f9   : > { %v1492_v61 = vmul.f32 %v1341_v59, %v2411_v30 }
 0x2fa   : > { %v1345_v62 = vmul.f32 0.5, %v1344_v60  ;;  %v1275_v1 = vpop.xlane.xlu1 %1274 }
 0x2fb   : > { %v1512_v2 = vmul.f32 %v2515_v57, %v1492_v61  ;;  %v1303_v3 = vmul.f32 %v1275_v1, %v2407_v24 }
 0x2fc   : > { %v1346_v4 = vsub.f32 1.5, %v1345_v62 }
 0x2fd   : > { %v1798_v5 = vpop.eup %1797  ;;  %v1532_v6 = vadd.f32 %v2520_v54, %v1512_v2  ;;  %v1319_v8 = vadd.f32 1e-05, %v1303_v3 }
 0x2fe   : > { %v1347_v10 = vmul.f32 %v1796_v49, %v1346_v4  ;;  %v1353_v11 = vmul.f32 %v1798_v5, %v1318_v50  ;;  %vm1359_vm7 = vweird.f32 %v1798_v5 }
 0x2ff   : > { %1548 = vst [vmem:[%s2528_s17] sm:$0xff] %v1532_v6  ;;  %1799 = vrsqrt.f32 %v1319_v8  ;;  %vm1360_vm9 = vmor %vm1358_vm8, %vm1359_vm7  ;;  %vm1368_vm11 = vweird.f32 %v1319_v8 }
 0x300   : > { %v1351_v30 = vsel %vm1350_vm6, %v1796_v49, %v1347_v10  ;;  %v1354_v12 = vmul.f32 %v1798_v5, %v1353_v11 }
 0x301   : > { %v1493_v13 = vmul.f32 %v1351_v30, %v2421_v36 }
 0x302   : > { %v1355_v15 = vmul.f32 0.5, %v1354_v12  ;;  %v1277_v16 = vpop.xlane.xlu2 %1276 }
 0x303   : > { %v1513_v17 = vmul.f32 %v2515_v57, %v1493_v13  ;;  %v1304_v18 = vmul.f32 %v1277_v16, %v2407_v24 }
 0x304   : > { %v1356_v20 = vsub.f32 1.5, %v1355_v15 }
 0x305   : > { %v1800_v22 = vpop.eup %1799  ;;  %v1533_v23 = vadd.f32 %v2520_v54, %v1513_v17  ;;  %v1320_v25 = vadd.f32 1e-05, %v1304_v18 }
 0x306   : > { %v1357_v26 = vmul.f32 %v1798_v5, %v1356_v20  ;;  %v1363_v27 = vmul.f32 %v1800_v22, %v1319_v8  ;;  %vm1369_vm10 = vweird.f32 %v1800_v22 }
 0x307   : > { %1549 = vst [vmem:[%s2528_s17 + $0x8] sm:$0xff] %v1533_v23  ;;  %1801 = vrsqrt.f32 %v1320_v25  ;;  %vm1370_vm12 = vmor %vm1368_vm11, %vm1369_vm10  ;;  %vm1378_vm14 = vweird.f32 %v1320_v25 }
 0x308   : > { %v1361_v36 = vsel %vm1360_vm9, %v1798_v5, %v1357_v26  ;;  %v1364_v29 = vmul.f32 %v1800_v22, %v1363_v27 }
 0x309   : > { %v1494_v31 = vmul.f32 %v1361_v36, %v2427_v39 }
 0x30a   : > { %v1365_v56 = vmul.f32 0.5, %v1364_v29  ;;  %v1279_v33 = vpop.xlane.xlu0 %1278 }
 0x30b   : > { %v1514_v34 = vmul.f32 %v2515_v57, %v1494_v31  ;;  %v1305_v37 = vmul.f32 %v1279_v33, %v2407_v24 }
 0x30c   : > { %v1366_v19 = vsub.f32 1.5, %v1365_v56 }
 0x30d   : > { %v1802_v53 = vpop.eup %1801  ;;  %v1534_v38 = vadd.f32 %v2520_v54, %v1514_v34  ;;  %v1321_v40 = vadd.f32 1e-05, %v1305_v37 }
 0x30e   : > { %v1367_v42 = vmul.f32 %v1800_v22, %v1366_v19  ;;  %v1373_v44 = vmul.f32 %v1802_v53, %v1320_v25  ;;  %vm1379_vm13 = vweird.f32 %v1802_v53 }
 0x30f   : > { %1550 = vst [vmem:[%s2528_s17 + $0x10] sm:$0xff] %v1534_v38  ;;  %1803 = vrsqrt.f32 %v1321_v40  ;;  %vm1380_vm15 = vmor %vm1378_vm14, %vm1379_vm13  ;;  %vm1388_vm1 = vweird.f32 %v1321_v40 }
 0x310   : > { %v1371_v39 = vsel %vm1370_vm12, %v1800_v22, %v1367_v42  ;;  %v1374_v45 = vmul.f32 %v1802_v53, %v1373_v44 }
 0x311   : > { %v1495_v46 = vmul.f32 %v1371_v39, %v2433_v41 }
 0x312   : > { %v1375_v32 = vmul.f32 0.5, %v1374_v45  ;;  %v1281_v47 = vpop.xlane.xlu1 %1280 }
 0x313   : > { %v1515_v49 = vmul.f32 %v2515_v57, %v1495_v46  ;;  %v1306_v50 = vmul.f32 %v1281_v47, %v2407_v24 }
 0x314   : > { %v1376_v52 = vsub.f32 1.5, %v1375_v32 }
 0x315   : > { %v1804_v55 = vpop.eup %1803  ;;  %v1535_v59 = vadd.f32 %v2520_v54, %v1515_v49  ;;  %v1322_v60 = vadd.f32 1e-05, %v1306_v50 }
 0x316   : > { %v1377_v61 = vmul.f32 %v1802_v53, %v1376_v52  ;;  %v1383_v62 = vmul.f32 %v1804_v55, %v1321_v40  ;;  %vm1389_vm0 = vweird.f32 %v1804_v55 }
 0x317   : > { %1551 = vst [vmem:[%s2528_s17 + $0x18] sm:$0xff] %v1535_v59  ;;  %1805 = vrsqrt.f32 %v1322_v60  ;;  %vm1390_vm2 = vmor %vm1388_vm1, %vm1389_vm0  ;;  %vm1398_vm4 = vweird.f32 %v1322_v60 }
 0x318   : > { %v1381_v41 = vsel %vm1380_vm15, %v1802_v53, %v1377_v61  ;;  %v1384_v1 = vmul.f32 %v1804_v55, %v1383_v62 }
 0x319   : > { %v1496_v2 = vmul.f32 %v1381_v41, %v2439_v48 }
 0x31a   : > { %v1385_v3 = vmul.f32 0.5, %v1384_v1  ;;  %v1283_v4 = vpop.xlane.xlu2 %1282 }
 0x31b   : > { %v1516_v5 = vmul.f32 %v2515_v57, %v1496_v2  ;;  %v1307_v6 = vmul.f32 %v1283_v4, %v2407_v24 }
 0x31c   : > { %v1386_v8 = vsub.f32 1.5, %v1385_v3 }
 0x31d   : > { %v1806_v10 = vpop.eup %1805  ;;  %v1536_v11 = vadd.f32 %v2520_v54, %v1516_v5  ;;  %v1323_v30 = vadd.f32 1e-05, %v1307_v6 }
 0x31e   : > { %v1387_v12 = vmul.f32 %v1804_v55, %v1386_v8  ;;  %v1393_v13 = vmul.f32 %v1806_v10, %v1322_v60  ;;  %vm1399_vm3 = vweird.f32 %v1806_v10 }
 0x31f   : > { %1552 = vst [vmem:[%s2528_s17 + $0x20] sm:$0xff] %v1536_v11  ;;  %1807 = vrsqrt.f32 %v1323_v30  ;;  %vm1400_vm5 = vmor %vm1398_vm4, %vm1399_vm3  ;;  %vm1408_vm7 = vweird.f32 %v1323_v30 }
 0x320   : > { %v1391_v48 = vsel %vm1390_vm2, %v1804_v55, %v1387_v12  ;;  %v1394_v15 = vmul.f32 %v1806_v10, %v1393_v13 }
 0x321   : > { %v1497_v16 = vmul.f32 %v1391_v48, %v2445_v58 }
 0x322   : > { %v1395_v17 = vmul.f32 0.5, %v1394_v15  ;;  %v1285_v18 = vpop.xlane.xlu0 %1284 }
 0x323   : > { %v1517_v20 = vmul.f32 %v2515_v57, %v1497_v16  ;;  %v1308_v22 = vmul.f32 %v1285_v18, %v2407_v24 }
 0x324   : > { %v1396_v23 = vsub.f32 1.5, %v1395_v17 }
 0x325   : > { %v1808_v25 = vpop.eup %1807  ;;  %v1537_v26 = vadd.f32 %v2520_v54, %v1517_v20  ;;  %v1324_v27 = vadd.f32 1e-05, %v1308_v22 }
 0x326   : > { %v1397_v36 = vmul.f32 %v1806_v10, %v1396_v23  ;;  %v1403_v29 = vmul.f32 %v1808_v25, %v1323_v30  ;;  %vm1409_vm6 = vweird.f32 %v1808_v25 }
 0x327   : > { %1553 = vst [vmem:[%s2528_s17 + $0x28] sm:$0xff] %v1537_v26  ;;  %1809 = vrsqrt.f32 %v1324_v27  ;;  %vm1410_vm8 = vmor %vm1408_vm7, %vm1409_vm6  ;;  %vm1418_vm10 = vweird.f32 %v1324_v27 }
 0x328   : > { %v1401_v58 = vsel %vm1400_vm5, %v1806_v10, %v1397_v36  ;;  %v1404_v31 = vmul.f32 %v1808_v25, %v1403_v29 }
 0x329   : > { %v1498_v56 = vmul.f32 %v1401_v58, %v2451_v0 }
 0x32a   : > { %v1405_v33 = vmul.f32 0.5, %v1404_v31  ;;  %v1287_v34 = vpop.xlane.xlu1 %1286 }
 0x32b   : > { %v1518_v37 = vmul.f32 %v2515_v57, %v1498_v56  ;;  %v1309_v19 = vmul.f32 %v1287_v34, %v2407_v24 }
 0x32c   : > { %v1406_v53 = vsub.f32 1.5, %v1405_v33 }
 0x32d   : > { %v1810_v38 = vpop.eup %1809  ;;  %v1538_v40 = vadd.f32 %v2520_v54, %v1518_v37  ;;  %v1325_v42 = vadd.f32 1e-05, %v1309_v19 }
 0x32e   : > { %v1407_v44 = vmul.f32 %v1808_v25, %v1406_v53  ;;  %v1413_v39 = vmul.f32 %v1810_v38, %v1324_v27  ;;  %vm1419_vm9 = vweird.f32 %v1810_v38 }
 0x32f   : > { %1554 = vst [vmem:[%s2528_s17 + $0x30] sm:$0xff] %v1538_v40  ;;  %1811 = vrsqrt.f32 %v1325_v42  ;;  %vm1420_vm11 = vmor %vm1418_vm10, %vm1419_vm9  ;;  %vm1428_vm13 = vweird.f32 %v1325_v42 }
 0x330   : > { %v1411_v0 = vsel %vm1410_vm8, %v1808_v25, %v1407_v44  ;;  %v1414_v45 = vmul.f32 %v1810_v38, %v1413_v39 }
 0x331   : > { %v1499_v46 = vmul.f32 %v1411_v0, %v2457_v7 }
 0x332   : > { %v1415_v32 = vmul.f32 0.5, %v1414_v45  ;;  %v1289_v47 = vpop.xlane.xlu2 %1288 }
 0x333   : > { %v1519_v49 = vmul.f32 %v2515_v57, %v1499_v46  ;;  %v1310_v50 = vmul.f32 %v1289_v47, %v2407_v24 }
 0x334   : > { %v1416_v52 = vsub.f32 1.5, %v1415_v32 }
 0x335   : > { %v1812_v55 = vpop.eup %1811  ;;  %v1539_v59 = vadd.f32 %v2520_v54, %v1519_v49  ;;  %v1326_v60 = vadd.f32 1e-05, %v1310_v50 }
 0x336   : > { %v1417_v61 = vmul.f32 %v1810_v38, %v1416_v52  ;;  %v1423_v62 = vmul.f32 %v1812_v55, %v1325_v42  ;;  %vm1429_vm12 = vweird.f32 %v1812_v55 }
 0x337   : > { %1555 = vst [vmem:[%s2528_s17 + $0x38] sm:$0xff] %v1539_v59  ;;  %1813 = vrsqrt.f32 %v1326_v60  ;;  %vm1430_vm14 = vmor %vm1428_vm13, %vm1429_vm12  ;;  %vm1438_vm0 = vweird.f32 %v1326_v60 }
 0x338   : > { %v1421_v7 = vsel %vm1420_vm11, %v1810_v38, %v1417_v61  ;;  %v1424_v41 = vmul.f32 %v1812_v55, %v1423_v62 }
 0x339   : > { %v1500_v1 = vmul.f32 %v1421_v7, %v2463_v14 }
 0x33a   : > { %v1425_v2 = vmul.f32 0.5, %v1424_v41  ;;  %v1291_v3 = vpop.xlane.xlu0 %1290 }
 0x33b   : > { %v1520_v4 = vmul.f32 %v2515_v57, %v1500_v1  ;;  %v1311_v5 = vmul.f32 %v1291_v3, %v2407_v24 }
 0x33c   : > { %v1426_v6 = vsub.f32 1.5, %v1425_v2 }
 0x33d   : > { %v1814_v8 = vpop.eup %1813  ;;  %v1540_v10 = vadd.f32 %v2520_v54, %v1520_v4  ;;  %v1327_v11 = vadd.f32 1e-05, %v1311_v5 }
 0x33e   : > { %v1427_v30 = vmul.f32 %v1812_v55, %v1426_v6  ;;  %v1433_v12 = vmul.f32 %v1814_v8, %v1326_v60  ;;  %vm1439_vm15 = vweird.f32 %v1814_v8 }
 0x33f   : > { %1556 = vst [vmem:[%s2528_s17 + $0x40] sm:$0xff] %v1540_v10  ;;  %1815 = vrsqrt.f32 %v1327_v11  ;;  %vm1440_vm1 = vmor %vm1438_vm0, %vm1439_vm15  ;;  %vm1448_vm3 = vweird.f32 %v1327_v11 }
 0x340   : > { %v1431_v14 = vsel %vm1430_vm14, %v1812_v55, %v1427_v30  ;;  %v1434_v13 = vmul.f32 %v1814_v8, %v1433_v12 }
 0x341   : > { %v1501_v48 = vmul.f32 %v1431_v14, %v2469_v21 }
 0x342   : > { %v1435_v15 = vmul.f32 0.5, %v1434_v13  ;;  %v1293_v16 = vpop.xlane.xlu1 %1292 }
 0x343   : > { %v1521_v17 = vmul.f32 %v2515_v57, %v1501_v48  ;;  %v1312_v18 = vmul.f32 %v1293_v16, %v2407_v24 }
 0x344   : > { %v1436_v20 = vsub.f32 1.5, %v1435_v15 }
 0x345   : > { %v1816_v22 = vpop.eup %1815  ;;  %v1541_v23 = vadd.f32 %v2520_v54, %v1521_v17  ;;  %v1328_v25 = vadd.f32 1e-05, %v1312_v18 }
 0x346   : > { %v1437_v26 = vmul.f32 %v1814_v8, %v1436_v20  ;;  %v1443_v27 = vmul.f32 %v1816_v22, %v1327_v11  ;;  %vm1449_vm2 = vweird.f32 %v1816_v22 }
 0x347   : > { %1557 = vst [vmem:[%s2528_s17 + $0x48] sm:$0xff] %v1541_v23  ;;  %1817 = vrsqrt.f32 %v1328_v25  ;;  %vm1450_vm4 = vmor %vm1448_vm3, %vm1449_vm2  ;;  %vm1458_vm6 = vweird.f32 %v1328_v25 }
 0x348   : > { %v1441_v21 = vsel %vm1440_vm1, %v1814_v8, %v1437_v26  ;;  %v1444_v36 = vmul.f32 %v1816_v22, %v1443_v27 }
 0x349   : > { %v1502_v29 = vmul.f32 %v1441_v21, %v2475_v28 }
 0x34a   : > { %v1445_v58 = vmul.f32 0.5, %v1444_v36  ;;  %v1295_v31 = vpop.xlane.xlu2 %1294 }
 0x34b   : > { %v1522_v56 = vmul.f32 %v2515_v57, %v1502_v29  ;;  %v1313_v33 = vmul.f32 %v1295_v31, %v2407_v24 }
 0x34c   : > { %v1446_v34 = vsub.f32 1.5, %v1445_v58 }
 0x34d   : > { %v1818_v37 = vpop.eup %1817  ;;  %v1542_v19 = vadd.f32 %v2520_v54, %v1522_v56  ;;  %v1329_v53 = vadd.f32 1e-05, %v1313_v33 }
 0x34e   : > { %v1447_v38 = vmul.f32 %v1816_v22, %v1446_v34  ;;  %v1453_v40 = vmul.f32 %v1818_v37, %v1328_v25  ;;  %vm1459_vm5 = vweird.f32 %v1818_v37 }
 0x34f   : > { %1558 = vst [vmem:[%s2528_s17 + $0x50] sm:$0xff] %v1542_v19  ;;  %1819 = vrsqrt.f32 %v1329_v53  ;;  %vm1460_vm7 = vmor %vm1458_vm6, %vm1459_vm5  ;;  %vm1468_vm9 = vweird.f32 %v1329_v53 }
 0x350   : > { %v1451_v28 = vsel %vm1450_vm4, %v1816_v22, %v1447_v38  ;;  %v1454_v42 = vmul.f32 %v1818_v37, %v1453_v40 }
 0x351   : > { %v1503_v44 = vmul.f32 %v1451_v28, %v2481_v35 }
 0x352   : > { %v1455_v39 = vmul.f32 0.5, %v1454_v42  ;;  %v1297_v0 = vpop.xlane.xlu0 %1296 }
 0x353   : > { %v1523_v45 = vmul.f32 %v2515_v57, %v1503_v44  ;;  %v1314_v46 = vmul.f32 %v1297_v0, %v2407_v24 }
 0x354   : > { %v1456_v32 = vsub.f32 1.5, %v1455_v39 }
 0x355   : > { %v1820_v47 = vpop.eup %1819  ;;  %v1543_v49 = vadd.f32 %v2520_v54, %v1523_v45  ;;  %v1330_v50 = vadd.f32 1e-05, %v1314_v46 }
 0x356   : > { %v1457_v52 = vmul.f32 %v1818_v37, %v1456_v32  ;;  %v1463_v55 = vmul.f32 %v1820_v47, %v1329_v53  ;;  %vm1469_vm8 = vweird.f32 %v1820_v47 }
 0x357   : > { %1559 = vst [vmem:[%s2528_s17 + $0x58] sm:$0xff] %v1543_v49  ;;  %1821 = vrsqrt.f32 %v1330_v50  ;;  %vm1470_vm10 = vmor %vm1468_vm9, %vm1469_vm8  ;;  %vm1478_vm12 = vweird.f32 %v1330_v50 }
 0x358   : > { %v1461_v35 = vsel %vm1460_vm7, %v1818_v37, %v1457_v52  ;;  %v1464_v59 = vmul.f32 %v1820_v47, %v1463_v55 }
 0x359   : > { %v1504_v60 = vmul.f32 %v1461_v35, %v2487_v43 }
 0x35a   : > { %v1465_v61 = vmul.f32 0.5, %v1464_v59  ;;  %v1299_v62 = vpop.xlane.xlu1 %1298 }
 0x35b   : > { %v1524_v7 = vmul.f32 %v2515_v57, %v1504_v60  ;;  %v1315_v41 = vmul.f32 %v1299_v62, %v2407_v24 }
 0x35c   : > { %v1466_v1 = vsub.f32 1.5, %v1465_v61 }
 0x35d   : > { %v1822_v2 = vpop.eup %1821  ;;  %v1544_v3 = vadd.f32 %v2520_v54, %v1524_v7  ;;  %v1331_v4 = vadd.f32 1e-05, %v1315_v41 }
 0x35e   : > { %v1467_v5 = vmul.f32 %v1820_v47, %v1466_v1  ;;  %v1473_v6 = vmul.f32 %v1822_v2, %v1330_v50  ;;  %vm1479_vm11 = vweird.f32 %v1822_v2 }
 0x35f   : > { %1560 = vst [vmem:[%s2528_s17 + $0x60] sm:$0xff] %v1544_v3  ;;  %1823 = vrsqrt.f32 %v1331_v4  ;;  %vm1480_vm13 = vmor %vm1478_vm12, %vm1479_vm11  ;;  %vm1488_vm15 = vweird.f32 %v1331_v4 }
 0x360   : > { %v1471_v43 = vsel %vm1470_vm10, %v1820_v47, %v1467_v5  ;;  %v1474_v8 = vmul.f32 %v1822_v2, %v1473_v6 }
 0x361   : > { %v1505_v10 = vmul.f32 %v1471_v43, %v2493_v51 }
 0x362   : > { %v1475_v11 = vmul.f32 0.5, %v1474_v8 }
 0x363   : > { %v1525_v24 = vmul.f32 %v2515_v57, %v1505_v10 }
 0x364   : > { %v1476_v30 = vsub.f32 1.5, %v1475_v11 }
 0x365   : > { %v1824_v12 = vpop.eup %1823  ;;  %v1545_v14 = vadd.f32 %v2520_v54, %v1525_v24 }
 0x366   : > { %v1477_v13 = vmul.f32 %v1822_v2, %v1476_v30  ;;  %v1483_v48 = vmul.f32 %v1824_v12, %v1331_v4  ;;  %vm1489_vm14 = vweird.f32 %v1824_v12 }
 0x367   : > { %1561 = vst [vmem:[%s2528_s17 + $0x68] sm:$0xff] %v1545_v14  ;;  %vm1490_vm0 = vmor %vm1488_vm15, %vm1489_vm14 }
 0x368   : > { %v1481_v15 = vsel %vm1480_vm13, %v1822_v2, %v1477_v13  ;;  %v1484_v16 = vmul.f32 %v1824_v12, %v1483_v48 }
 0x369   : > { %v1506_v51 = vmul.f32 %v1481_v15, %v2499_v63 }
 0x36a   : > { %v1485_v17 = vmul.f32 0.5, %v1484_v16 }
 0x36b   : > { %v1526_v18 = vmul.f32 %v2515_v57, %v1506_v51 }
 0x36c   : > { %v1486_v20 = vsub.f32 1.5, %v1485_v17 }
 0x36d   : > { %v1546_v22 = vadd.f32 %v2520_v54, %v1526_v18 }
 0x36e   : > { %v1487_v23 = vmul.f32 %v1824_v12, %v1486_v20 }
 0x36f   : > { %1562 = vst [vmem:[%s2528_s17 + $0x70] sm:$0xff] %v1546_v22 }
 0x370   : > { %v1491_v63 = vsel %vm1490_vm0, %v1824_v12, %v1487_v23 }
 0x371   : > { %v1507_v25 = vmul.f32 %v1491_v63, %v2505_v9 }
 0x373   : > { %v1527_v26 = vmul.f32 %v2515_v57, %v1507_v25 }
 0x375   : > { %v1547_v27 = vadd.f32 %v2520_v54, %v1527_v26 }
 0x377   : > { %1563 = vst [vmem:[%s2528_s17 + $0x78] sm:$0xff] %v1547_v27 }
 0x378   : > { %1988 = shalt.err (!%p1985_p10)
}
 0x379   : > { %s2045_s28 = smov 128   ;;  %s2046_s17 = smov 8  }
 0x37a   : > { %1718 = dma.vmem_to_hbm [thread:$0]  (%p2182_p3), %s1578_s15, 2048, %s1580_s13, %s1565_s20, %s2045_s28, %s2045_s28, %s2046_s17  }
 0x37b PF: > { %s1594_s3 = sand.u32 1, %s2023_s30   ;;  %p2663_p12 = scmp.ge.s32.totalorder %s2035_s12, 2 }
 0x37c   : > { %s1595_s5 = scalar_lea.sflag [#allocation4], %s1594_s3 }
 0x37d   : > { %p1735_p13 = pnand %p2663_p12, %p2132_p6 }
 0x37f   : > { %p1736_p0 = pneg %p1735_p13 }
 0x381   : > { %2018 = dma.done.wait (%p1736_p0), %s1595_s5, 2048  }
 0x382   : > { %2020 = vsyncadd (%p1736_p0), %s1595_s5, 4294965248  ;;  %p24_p5 = scmp.ge.s32.totalorder %s2169_s29, 4   ;;  %s2664_s30 = smov %s2027_s10 }
 0x383   : > { %s2665_s10 = smov %s2031_s11  ;;  %s2666_s11 = smov %s2178_s26 }
 0x384   : > { %s2667_s12 = smov %s2169_s29  ;;  %26 = sbr.rel (!%p24_p5) target bundleno = 11 (0xb), region = 113 }
 0x389   :  { %1601 = vsyncpa [#allocation3], 1 }
 0x38a   :  { %1603 = vsyncpa [#allocation3 + $0x1], 1 }
 0x38b   :  { %1604 = vsyncpa [#allocation6], 1 }
 0x38c   :  { %1605 = vsyncpa [#allocation9], 1 }
 0x38d   :  { %1606 = vsyncpa [#allocation4], 1 }
 0x38e   :  { %1608 = vsyncpa [#allocation4 + $0x1], 1 }

</bundles_post_ra>
